<compile_context>
chip_gen: v7x
topology: tpu7x:2x2x1
jax: 0.10.0
libtpu: 0.0.40
codegen_flags: <defaults>
</compile_context>

<pallas_src>
import jax
import jax.numpy as jnp
from jax import lax
from jax.experimental import pallas as pl
from jax.experimental.pallas import tpu as pltpu


# ----------------------------- Pallas kernel --------------------------------

def _sigmoid(x):
    # 1/(1+exp(-x)) with the divide done as an EUP vrcp (approx) — keeps the
    # transcendental work on the otherwise-idle EUP slot (matters most on v5e).
    return pl.reciprocal(1.0 + jnp.exp(-x), approx=True)


def _lstm_cell(gates, c_prev, H):
    # PyTorch gate order: [i, f, g, o] stacked along the last axis (lane-aligned, H=128).
    i = _sigmoid(gates[:, 0 * H:1 * H])
    f = _sigmoid(gates[:, 1 * H:2 * H])
    g = jnp.tanh(gates[:, 2 * H:3 * H])
    o = _sigmoid(gates[:, 3 * H:4 * H])
    c = f * c_prev + i * g                        # cell state stays f32
    h = (o * jnp.tanh(c)).astype(jnp.bfloat16)    # h only ever feeds the MXU -> bf16
    return h, c


def char_rnn_kernel(xp_ref, whh0_ref, wih1_ref, whh1_ref, b1_ref, wdec_ref, bdec_ref,
                    out_ref, h0_ref, c0_ref, h1_ref, c1_ref):
    # xp_ref  : (TT, TB, 4H) f32   precomputed layer-0 gate inputs (emb & W_ih_l0 & biases
    #                              folded into one gathered table in the wrapper)
    # whh0    : (H, 4H) bf16       wih1 / whh1 : (H, 4H) bf16       b1 : (1, 4H) f32
    # wdec    : (H, V)  bf16       bdec : (1, V) f32
    # out_ref : (TB, V) f32
    # h*/c*   : (TB, H) VMEM scratch carrying the LSTM state across time tiles
    t_idx = pl.program_id(1)
    TT, TB, _ = xp_ref.shape
    H = whh0_ref.shape[0]

    @pl.when(t_idx == 0)
    def _():
        h0_ref[...] = jnp.zeros_like(h0_ref)
        c0_ref[...] = jnp.zeros_like(c0_ref)
        h1_ref[...] = jnp.zeros_like(h1_ref)
        c1_ref[...] = jnp.zeros_like(c1_ref)

    # Broadcast the layer-1 bias once per tile (JAX does not CSE broadcast_in_dim, so
    # doing this inside the unrolled step would re-emit it every iteration).
    b1 = jnp.broadcast_to(b1_ref[...], (TB, 4 * H))

    def step(t, carry):
        h0, c0, h1, c1 = carry
        # Layer 0: input projection is precomputed; only the recurrent matmul remains on
        # the serial critical path.  Dot directly against the VMEM refs so no large
        # weight values stay live across the unrolled loop.
        g0 = xp_ref[t] + jnp.dot(h0, whh0_ref[...],
                                 preferred_element_type=jnp.float32)
        h0, c0 = _lstm_cell(g0, c0, H)
        # Layer 1 consumes layer 0's output at the same timestep.
        g1 = (jnp.dot(h0, wih1_ref[...], preferred_element_type=jnp.float32)
              + jnp.dot(h1, whh1_ref[...], preferred_element_type=jnp.float32)
              + b1)
        h1, c1 = _lstm_cell(g1, c1, H)
        return h0, c0, h1, c1

    carry = (h0_ref[...], c0_ref[...], h1_ref[...], c1_ref[...])
    # Partial unroll: full unroll only for short time tiles (avoids code-size / vreg
    # blowup at long T while keeping LLO scheduling visibility).
    unroll = TT if TT <= 8 else 4
    h0, c0, h1, c1 = lax.fori_loop(0, TT, step, carry, unroll=unroll)
    h0_ref[...] = h0
    c0_ref[...] = c0
    h1_ref[...] = h1
    c1_ref[...] = c1

    # Decoder on the final timestep's top-layer hidden state (output[:, -1, :]).
    @pl.when(t_idx == pl.num_programs(1) - 1)
    def _():
        out_ref[...] = (jnp.dot(h1, wdec_ref[...], preferred_element_type=jnp.float32)
                        + bdec_ref[...])


# ------------------------------- wrapper -------------------------------------

def _choose_batch_tile(B, max_tile=256):
    if B <= 16:
        return B
    # Aim for >= 2 batch tiles so the "parallel" axis can shard across v7x's two
    # TensorCores, while keeping tiles sublane-aligned and large for MXU M-utilization.
    half = -(-B // 2)
    half = -(-half // 8) * 8
    return min(max_tile, half)


def _choose_time_tile(T, max_tile=16):
    # Time tiles must divide T exactly (padded timesteps would corrupt the recurrence).
    if T <= max_tile:
        return T
    for tt in range(max_tile, 0, -1):
        if T % tt == 0:
            return tt
    return 1


def char_rnn_forward(tokens, params, *, max_batch_tile=256, max_time_tile=16):
    """tokens: (B, T) int32 token ids -> logits (B, vocab)."""
    B, T = tokens.shape
    emb = params["embedding"].astype(jnp.float32)                   # (V, E)
    V, _ = emb.shape
    H = params["w_hh_l0"].shape[1]

    # Fold Embedding + layer-0 input projection (+ both layer-0 biases) into a single
    # gathered (V, 4H) gate table: Embedding followed by a linear is just a lookup.
    gate_tbl0 = (jnp.dot(emb, params["w_ih_l0"].T.astype(jnp.float32),
                         precision=lax.Precision.HIGHEST)
                 + (params["b_ih_l0"] + params["b_hh_l0"]).astype(jnp.float32))
    x_proj = jnp.take(gate_tbl0, tokens, axis=0)                    # (B, T, 4H) gather glue
    xp_t = jnp.transpose(x_proj, (1, 0, 2))                         # (T, B, 4H) time-major

    # PyTorch LSTM stores (4H, Din) weights; transpose once so gates = x @ W.
    # Recurrent / decoder weights feed the MXU as bf16 (f32 accumulate); biases stay f32.
    whh0 = params["w_hh_l0"].T.astype(jnp.bfloat16)                 # (H, 4H)
    wih1 = params["w_ih_l1"].T.astype(jnp.bfloat16)                 # (H, 4H)
    whh1 = params["w_hh_l1"].T.astype(jnp.bfloat16)                 # (H, 4H)
    b1 = (params["b_ih_l1"] + params["b_hh_l1"]).reshape(1, 4 * H).astype(jnp.float32)
    wdec = params["w_dec"].T.astype(jnp.bfloat16)                   # (H, V)
    bdec = params["b_dec"].reshape(1, V).astype(jnp.float32)

    TB = _choose_batch_tile(B, max_batch_tile)
    TT = _choose_time_tile(T, max_time_tile)
    grid = (pl.cdiv(B, TB), T // TT)

    def full2d(shape):
        # Grid-invariant weight block.
        # TODO(synk): single-buffer these (pipeline_mode=pl.Buffered(1)) once TB/T are
        # scaled far enough that the ~0.5 MiB of duplicated weight buffers matters.
        return pl.BlockSpec(shape, lambda b, t: (0, 0))

    flops = int(2 * B * T * 3 * H * 4 * H + 2 * B * H * V)
    transcendentals = int(B * T * 2 * 8 * H)
    bytes_accessed = int(4 * xp_t.size
                         + 2 * (whh0.size + wih1.size + whh1.size + wdec.size)
                         + 4 * (b1.size + bdec.size) + 4 * B * V)

    out = pl.pallas_call(
        char_rnn_kernel,
        out_shape=jax.ShapeDtypeStruct((B, V), jnp.float32),
        grid_spec=pltpu.PrefetchScalarGridSpec(
            num_scalar_prefetch=0,
            grid=grid,
            in_specs=[
                pl.BlockSpec((TT, TB, 4 * H), lambda b, t: (t, b, 0)),  # gate inputs
                full2d((H, 4 * H)),                                     # w_hh layer 0
                full2d((H, 4 * H)),                                     # w_ih layer 1
                full2d((H, 4 * H)),                                     # w_hh layer 1
                full2d((1, 4 * H)),                                     # bias layer 1
                full2d((H, V)),                                         # decoder weight
                full2d((1, V)),                                         # decoder bias
            ],
            out_specs=pl.BlockSpec((TB, V), lambda b, t: (b, 0)),
            scratch_shapes=[
                pltpu.VMEM((TB, H), jnp.bfloat16),   # h, layer 0
                pltpu.VMEM((TB, H), jnp.float32),    # c, layer 0
                pltpu.VMEM((TB, H), jnp.bfloat16),   # h, layer 1
                pltpu.VMEM((TB, H), jnp.float32),    # c, layer 1
            ],
        ),
        compiler_params=pltpu.CompilerParams(
            dimension_semantics=("parallel", "arbitrary")),
        cost_estimate=pl.CostEstimate(flops=flops,
                                      transcendentals=transcendentals,
                                      bytes_accessed=bytes_accessed),
    )(xp_t, whh0, wih1, whh1, b1, wdec, bdec)

    return out.reshape(-1, V)   # matches output.reshape(-1, self.input_size)


# --------------------------- pure-JAX reference ------------------------------

def char_rnn_reference(tokens, params):
    emb = params["embedding"].astype(jnp.float32)
    B = tokens.shape[0]
    H = params["w_hh_l0"].shape[1]
    x = jnp.take(emb, tokens, axis=0)                               # (B, T, E)

    def lstm_layer(x_seq, wih, whh, bih, bhh):
        def step(carry, x_t):
            h, c = carry
            gates = x_t @ wih.T + h @ whh.T + bih + bhh
            i, f, g, o = jnp.split(gates, 4, axis=-1)
            c = jax.nn.sigmoid(f) * c + jax.nn.sigmoid(i) * jnp.tanh(g)
            h = jax.nn.sigmoid(o) * jnp.tanh(c)
            return (h, c), h
        init = (jnp.zeros((B, H), jnp.float32), jnp.zeros((B, H), jnp.float32))
        _, hs = lax.scan(step, init, jnp.transpose(x_seq, (1, 0, 2)))
        return jnp.transpose(hs, (1, 0, 2))                         # (B, T, H)

    y = lstm_layer(x, params["w_ih_l0"], params["w_hh_l0"],
                   params["b_ih_l0"], params["b_hh_l0"])
    y = lstm_layer(y, params["w_ih_l1"], params["w_hh_l1"],
                   params["b_ih_l1"], params["b_hh_l1"])
    last = y[:, -1, :]
    return last @ params["w_dec"].T + params["b_dec"]


# --------------------------------- demo --------------------------------------

def init_params(key, vocab_size, hidden_size, emb_dim):
    ks = jax.random.split(key, 11)
    s = 1.0 / (hidden_size ** 0.5)

    def u(k, shape, scale):
        return jax.random.uniform(k, shape, jnp.float32, -scale, scale)

    H, V, E = hidden_size, vocab_size, emb_dim
    return {
        "embedding": u(ks[0], (V, E), 1.0),
        "w_ih_l0": u(ks[1], (4 * H, E), s),
        "w_hh_l0": u(ks[2], (4 * H, H), s),
        "b_ih_l0": u(ks[3], (4 * H,), s),
        "b_hh_l0": u(ks[4], (4 * H,), s),
        "w_ih_l1": u(ks[5], (4 * H, H), s),
        "w_hh_l1": u(ks[6], (4 * H, H), s),
        "b_ih_l1": u(ks[7], (4 * H,), s),
        "b_hh_l1": u(ks[8], (4 * H,), s),
        "w_dec": u(ks[9], (V, H), s),
        "b_dec": u(ks[10], (V,), s),
    }


if __name__ == "__main__":
    key = jax.random.PRNGKey(0)
    k_tok, k_par = jax.random.split(key)

    # Small, lane-friendly config: vocab(=input_size)=128, hidden=128, emb=8, 2 layers.
    # NOTE: the kernel assumes H is a multiple of 128 (lane-aligned gate slices); the
    # PyTorch default H=100 would need padding+masking.
    V, H, E = 128, 128, 8
    B, T = 2, 8

    params = init_params(k_par, V, H, E)
    tokens = jax.random.randint(k_tok, (B, T), 0, V, dtype=jnp.int32)

    out = char_rnn_forward(tokens, params)
    out = jax.block_until_ready(out)
    assert out.shape == (B, V) and out.dtype == jnp.float32

    # Tolerance loosened vs. a bit-exact f32 check: matmul operands are bf16 (f32
    # accumulate, f32 cell state) per the perf guidance; drift over T=8 steps is ~1e-3.
    ref = char_rnn_reference(tokens, params)
    assert jnp.allclose(out, ref, atol=3e-2, rtol=3e-2), \
        float(jnp.max(jnp.abs(out - ref)))

    print("KERNEL_OK")
</pallas_src>

<mosaic_0001>
module attributes {stable_mosaic.version = 11 : i64} {
  func.func @char_rnn_kernel(%arg0: i32, %arg1: i32, %arg2: memref<8x2x512xf32, #tpu.memory_space<vmem>>, %arg3: memref<128x512xbf16, #tpu.memory_space<vmem>>, %arg4: memref<128x512xbf16, #tpu.memory_space<vmem>>, %arg5: memref<128x512xbf16, #tpu.memory_space<vmem>>, %arg6: memref<1x512xf32, #tpu.memory_space<vmem>>, %arg7: memref<128x128xbf16, #tpu.memory_space<vmem>>, %arg8: memref<1x128xf32, #tpu.memory_space<vmem>>, %arg9: memref<2x128xf32, #tpu.memory_space<vmem>>, %arg10: memref<2x128xbf16, #tpu.memory_space<vmem>>, %arg11: memref<2x128xf32, #tpu.memory_space<vmem>>, %arg12: memref<2x128xbf16, #tpu.memory_space<vmem>>, %arg13: memref<2x128xf32, #tpu.memory_space<vmem>>) attributes {dimension_semantics = [#tpu.dimension_semantics<parallel>, #tpu.dimension_semantics<arbitrary>], iteration_bounds = array<i64: 1, 1>, scalar_prefetch = 0 : i64, scratch_operands = 4 : i64, tpu.core_type = #tpu.core_type<tc>, window_params = [{transform_indices = @transform_0, window_bounds = array<i64: 8, 2, 512>}, {pipeline_mode = #tpu.pipeline_mode<synchronous>, transform_indices = @transform_1, window_bounds = array<i64: 128, 512>}, {pipeline_mode = #tpu.pipeline_mode<synchronous>, transform_indices = @transform_2, window_bounds = array<i64: 128, 512>}, {pipeline_mode = #tpu.pipeline_mode<synchronous>, transform_indices = @transform_3, window_bounds = array<i64: 128, 512>}, {pipeline_mode = #tpu.pipeline_mode<synchronous>, transform_indices = @transform_4, window_bounds = array<i64: 1, 512>}, {pipeline_mode = #tpu.pipeline_mode<synchronous>, transform_indices = @transform_5, window_bounds = array<i64: 128, 128>}, {pipeline_mode = #tpu.pipeline_mode<synchronous>, transform_indices = @transform_6, window_bounds = array<i64: 1, 128>}, {transform_indices = @transform_7, window_bounds = array<i64: 2, 128>}]} {
    %c0_i32 = arith.constant 0 : i32
    %0 = arith.cmpi eq, %arg1, %c0_i32 : i32
    %1 = arith.extui %0 : i1 to i32
    %c0_i32_0 = arith.constant 0 : i32
    %2 = arith.cmpi ne, %1, %c0_i32_0 : i32
    scf.if %2 {
      %cst_204 = arith.constant 0.000000e+00 : bf16
      %577 = vector.broadcast %cst_204 : bf16 to vector<2x128xbf16>
      %c0_205 = arith.constant 0 : index
      %c0_206 = arith.constant 0 : index
      %578 = vector.load %arg10[%c0_205, %c0_206] : memref<2x128xbf16, #tpu.memory_space<vmem>>, vector<2x128xbf16>
      tpu.vector_store %arg10[%c0_205, %c0_206], %577 {strides = array<i32>} : memref<2x128xbf16, #tpu.memory_space<vmem>>, vector<2x128xbf16>,
      %cst_207 = arith.constant 0.000000e+00 : f32
      %579 = vector.broadcast %cst_207 : f32 to vector<2x128xf32>
      %c0_208 = arith.constant 0 : index
      %c0_209 = arith.constant 0 : index
      %580 = vector.load %arg11[%c0_208, %c0_209] : memref<2x128xf32, #tpu.memory_space<vmem>>, vector<2x128xf32>
      tpu.vector_store %arg11[%c0_208, %c0_209], %579 {strides = array<i32>} : memref<2x128xf32, #tpu.memory_space<vmem>>, vector<2x128xf32>,
      %cst_210 = arith.constant 0.000000e+00 : bf16
      %581 = vector.broadcast %cst_210 : bf16 to vector<2x128xbf16>
      %c0_211 = arith.constant 0 : index
      %c0_212 = arith.constant 0 : index
      %582 = vector.load %arg12[%c0_211, %c0_212] : memref<2x128xbf16, #tpu.memory_space<vmem>>, vector<2x128xbf16>
      tpu.vector_store %arg12[%c0_211, %c0_212], %581 {strides = array<i32>} : memref<2x128xbf16, #tpu.memory_space<vmem>>, vector<2x128xbf16>,
      %cst_213 = arith.constant 0.000000e+00 : f32
      %583 = vector.broadcast %cst_213 : f32 to vector<2x128xf32>
      %c0_214 = arith.constant 0 : index
      %c0_215 = arith.constant 0 : index
      %584 = vector.load %arg13[%c0_214, %c0_215] : memref<2x128xf32, #tpu.memory_space<vmem>>, vector<2x128xf32>
      tpu.vector_store %arg13[%c0_214, %c0_215], %583 {strides = array<i32>} : memref<2x128xf32, #tpu.memory_space<vmem>>, vector<2x128xf32>,
    } else {
    }
    %c0 = arith.constant 0 : index
    %c0_1 = arith.constant 0 : index
    %3 = vector.load %arg6[%c0, %c0_1] : memref<1x512xf32, #tpu.memory_space<vmem>>, vector<1x512xf32>
    %4 = vector.shape_cast %3 : vector<1x512xf32> to vector<1x512xf32>
    %5 = vector.broadcast %4 : vector<1x512xf32> to vector<2x512xf32>
    %c0_2 = arith.constant 0 : index
    %c0_3 = arith.constant 0 : index
    %6 = vector.load %arg10[%c0_2, %c0_3] : memref<2x128xbf16, #tpu.memory_space<vmem>>, vector<2x128xbf16>
    %c0_4 = arith.constant 0 : index
    %c0_5 = arith.constant 0 : index
    %7 = vector.load %arg11[%c0_4, %c0_5] : memref<2x128xf32, #tpu.memory_space<vmem>>, vector<2x128xf32>
    %c0_6 = arith.constant 0 : index
    %c0_7 = arith.constant 0 : index
    %8 = vector.load %arg12[%c0_6, %c0_7] : memref<2x128xbf16, #tpu.memory_space<vmem>>, vector<2x128xbf16>
    %c0_8 = arith.constant 0 : index
    %c0_9 = arith.constant 0 : index
    %9 = vector.load %arg13[%c0_8, %c0_9] : memref<2x128xf32, #tpu.memory_space<vmem>>, vector<2x128xf32>
    %c0_i32_10 = arith.constant 0 : i32
    %10 = arith.index_cast %c0_i32_10 : i32 to index
    %c0_11 = arith.constant 0 : index
    %c0_12 = arith.constant 0 : index
    %11 = vector.load %arg2[%10, %c0_11, %c0_12] : memref<8x2x512xf32, #tpu.memory_space<vmem>>, vector<1x2x512xf32>
    %12 = vector.shape_cast %11 : vector<1x2x512xf32> to vector<2x512xf32>
    %c0_13 = arith.constant 0 : index
    %c0_14 = arith.constant 0 : index
    %13 = vector.load %arg3[%c0_13, %c0_14] : memref<128x512xbf16, #tpu.memory_space<vmem>>, vector<128x512xbf16>
    %cst = arith.constant dense<0.000000e+00> : vector<2x512xf32>
    %14 = tpu.matmul %6, %13, %cst {dimension_numbers = #tpu.dot_dimension_numbers<[1], [0], [0], [1], [0, 0, 1, 1], [], []>} : vector<2x128xbf16>, vector<128x512xbf16>, vector<2x512xf32> -> vector<2x512xf32>
    %15 = arith.addf %12, %14 : vector<2x512xf32>
    %16 = vector.extract_strided_slice %15 {offsets = [0, 0], sizes = [2, 128], strides = [1, 1]} : vector<2x512xf32> to vector<2x128xf32>
    %cst_15 = arith.constant 0.000000e+00 : f32
    %17 = vector.broadcast %cst_15 : f32 to vector<2x128xf32>
    %18 = arith.subf %17, %16 : vector<2x128xf32>
    %19 = math.exp %18 : vector<2x128xf32>
    %cst_16 = arith.constant 1.000000e+00 : f32
    %20 = vector.broadcast %cst_16 : f32 to vector<2x128xf32>
    %21 = arith.addf %20, %19 : vector<2x128xf32>
    %22 = tpu.reciprocal %21 {approx = true} : vector<2x128xf32> -> vector<2x128xf32>
    %23 = vector.extract_strided_slice %15 {offsets = [0, 128], sizes = [2, 128], strides = [1, 1]} : vector<2x512xf32> to vector<2x128xf32>
    %cst_17 = arith.constant 0.000000e+00 : f32
    %24 = vector.broadcast %cst_17 : f32 to vector<2x128xf32>
    %25 = arith.subf %24, %23 : vector<2x128xf32>
    %26 = math.exp %25 : vector<2x128xf32>
    %cst_18 = arith.constant 1.000000e+00 : f32
    %27 = vector.broadcast %cst_18 : f32 to vector<2x128xf32>
    %28 = arith.addf %27, %26 : vector<2x128xf32>
    %29 = tpu.reciprocal %28 {approx = true} : vector<2x128xf32> -> vector<2x128xf32>
    %30 = vector.extract_strided_slice %15 {offsets = [0, 256], sizes = [2, 128], strides = [1, 1]} : vector<2x512xf32> to vector<2x128xf32>
    %31 = math.tanh %30 : vector<2x128xf32>
    %32 = vector.extract_strided_slice %15 {offsets = [0, 384], sizes = [2, 128], strides = [1, 1]} : vector<2x512xf32> to vector<2x128xf32>
    %cst_19 = arith.constant 0.000000e+00 : f32
    %33 = vector.broadcast %cst_19 : f32 to vector<2x128xf32>
    %34 = arith.subf %33, %32 : vector<2x128xf32>
    %35 = math.exp %34 : vector<2x128xf32>
    %cst_20 = arith.constant 1.000000e+00 : f32
    %36 = vector.broadcast %cst_20 : f32 to vector<2x128xf32>
    %37 = arith.addf %36, %35 : vector<2x128xf32>
    %38 = tpu.reciprocal %37 {approx = true} : vector<2x128xf32> -> vector<2x128xf32>
    %39 = arith.mulf %29, %7 : vector<2x128xf32>
    %40 = arith.mulf %22, %31 : vector<2x128xf32>
    %41 = arith.addf %39, %40 : vector<2x128xf32>
    %42 = math.tanh %41 : vector<2x128xf32>
    %43 = arith.mulf %38, %42 : vector<2x128xf32>
    %44 = arith.truncf %43 : vector<2x128xf32> to vector<2x128xbf16>
    %c0_21 = arith.constant 0 : index
    %c0_22 = arith.constant 0 : index
    %45 = vector.load %arg4[%c0_21, %c0_22] : memref<128x512xbf16, #tpu.memory_space<vmem>>, vector<128x512xbf16>
    %cst_23 = arith.constant dense<0.000000e+00> : vector<2x512xf32>
    %46 = tpu.matmul %44, %45, %cst_23 {dimension_numbers = #tpu.dot_dimension_numbers<[1], [0], [0], [1], [0, 0, 1, 1], [], []>} : vector<2x128xbf16>, vector<128x512xbf16>, vector<2x512xf32> -> vector<2x512xf32>
    %c0_24 = arith.constant 0 : index
    %c0_25 = arith.constant 0 : index
    %47 = vector.load %arg5[%c0_24, %c0_25] : memref<128x512xbf16, #tpu.memory_space<vmem>>, vector<128x512xbf16>
    %cst_26 = arith.constant dense<0.000000e+00> : vector<2x512xf32>
    %48 = tpu.matmul %8, %47, %cst_26 {dimension_numbers = #tpu.dot_dimension_numbers<[1], [0], [0], [1], [0, 0, 1, 1], [], []>} : vector<2x128xbf16>, vector<128x512xbf16>, vector<2x512xf32> -> vector<2x512xf32>
    %49 = arith.addf %46, %48 : vector<2x512xf32>
    %50 = arith.addf %49, %5 : vector<2x512xf32>
    %51 = vector.extract_strided_slice %50 {offsets = [0, 0], sizes = [2, 128], strides = [1, 1]} : vector<2x512xf32> to vector<2x128xf32>
    %cst_27 = arith.constant 0.000000e+00 : f32
    %52 = vector.broadcast %cst_27 : f32 to vector<2x128xf32>
    %53 = arith.subf %52, %51 : vector<2x128xf32>
    %54 = math.exp %53 : vector<2x128xf32>
    %cst_28 = arith.constant 1.000000e+00 : f32
    %55 = vector.broadcast %cst_28 : f32 to vector<2x128xf32>
    %56 = arith.addf %55, %54 : vector<2x128xf32>
    %57 = tpu.reciprocal %56 {approx = true} : vector<2x128xf32> -> vector<2x128xf32>
    %58 = vector.extract_strided_slice %50 {offsets = [0, 128], sizes = [2, 128], strides = [1, 1]} : vector<2x512xf32> to vector<2x128xf32>
    %cst_29 = arith.constant 0.000000e+00 : f32
    %59 = vector.broadcast %cst_29 : f32 to vector<2x128xf32>
    %60 = arith.subf %59, %58 : vector<2x128xf32>
    %61 = math.exp %60 : vector<2x128xf32>
    %cst_30 = arith.constant 1.000000e+00 : f32
    %62 = vector.broadcast %cst_30 : f32 to vector<2x128xf32>
    %63 = arith.addf %62, %61 : vector<2x128xf32>
    %64 = tpu.reciprocal %63 {approx = true} : vector<2x128xf32> -> vector<2x128xf32>
    %65 = vector.extract_strided_slice %50 {offsets = [0, 256], sizes = [2, 128], strides = [1, 1]} : vector<2x512xf32> to vector<2x128xf32>
    %66 = math.tanh %65 : vector<2x128xf32>
    %67 = vector.extract_strided_slice %50 {offsets = [0, 384], sizes = [2, 128], strides = [1, 1]} : vector<2x512xf32> to vector<2x128xf32>
    %cst_31 = arith.constant 0.000000e+00 : f32
    %68 = vector.broadcast %cst_31 : f32 to vector<2x128xf32>
    %69 = arith.subf %68, %67 : vector<2x128xf32>
    %70 = math.exp %69 : vector<2x128xf32>
    %cst_32 = arith.constant 1.000000e+00 : f32
    %71 = vector.broadcast %cst_32 : f32 to vector<2x128xf32>
    %72 = arith.addf %71, %70 : vector<2x128xf32>
    %73 = tpu.reciprocal %72 {approx = true} : vector<2x128xf32> -> vector<2x128xf32>
    %74 = arith.mulf %64, %9 : vector<2x128xf32>
    %75 = arith.mulf %57, %66 : vector<2x128xf32>
    %76 = arith.addf %74, %75 : vector<2x128xf32>
    %77 = math.tanh %76 : vector<2x128xf32>
    %78 = arith.mulf %73, %77 : vector<2x128xf32>
    %79 = arith.truncf %78 : vector<2x128xf32> to vector<2x128xbf16>
    %c1_i32 = arith.constant 1 : i32
    %80 = arith.index_cast %c1_i32 : i32 to index
    %c0_33 = arith.constant 0 : index
    %c0_34 = arith.constant 0 : index
    %81 = vector.load %arg2[%80, %c0_33, %c0_34] : memref<8x2x512xf32, #tpu.memory_space<vmem>>, vector<1x2x512xf32>
    %82 = vector.shape_cast %81 : vector<1x2x512xf32> to vector<2x512xf32>
    %c0_35 = arith.constant 0 : index
    %c0_36 = arith.constant 0 : index
    %83 = vector.load %arg3[%c0_35, %c0_36] : memref<128x512xbf16, #tpu.memory_space<vmem>>, vector<128x512xbf16>
    %cst_37 = arith.constant dense<0.000000e+00> : vector<2x512xf32>
    %84 = tpu.matmul %44, %83, %cst_37 {dimension_numbers = #tpu.dot_dimension_numbers<[1], [0], [0], [1], [0, 0, 1, 1], [], []>} : vector<2x128xbf16>, vector<128x512xbf16>, vector<2x512xf32> -> vector<2x512xf32>
    %85 = arith.addf %82, %84 : vector<2x512xf32>
    %86 = vector.extract_strided_slice %85 {offsets = [0, 0], sizes = [2, 128], strides = [1, 1]} : vector<2x512xf32> to vector<2x128xf32>
    %cst_38 = arith.constant 0.000000e+00 : f32
    %87 = vector.broadcast %cst_38 : f32 to vector<2x128xf32>
    %88 = arith.subf %87, %86 : vector<2x128xf32>
    %89 = math.exp %88 : vector<2x128xf32>
    %cst_39 = arith.constant 1.000000e+00 : f32
    %90 = vector.broadcast %cst_39 : f32 to vector<2x128xf32>
    %91 = arith.addf %90, %89 : vector<2x128xf32>
    %92 = tpu.reciprocal %91 {approx = true} : vector<2x128xf32> -> vector<2x128xf32>
    %93 = vector.extract_strided_slice %85 {offsets = [0, 128], sizes = [2, 128], strides = [1, 1]} : vector<2x512xf32> to vector<2x128xf32>
    %cst_40 = arith.constant 0.000000e+00 : f32
    %94 = vector.broadcast %cst_40 : f32 to vector<2x128xf32>
    %95 = arith.subf %94, %93 : vector<2x128xf32>
    %96 = math.exp %95 : vector<2x128xf32>
    %cst_41 = arith.constant 1.000000e+00 : f32
    %97 = vector.broadcast %cst_41 : f32 to vector<2x128xf32>
    %98 = arith.addf %97, %96 : vector<2x128xf32>
    %99 = tpu.reciprocal %98 {approx = true} : vector<2x128xf32> -> vector<2x128xf32>
    %100 = vector.extract_strided_slice %85 {offsets = [0, 256], sizes = [2, 128], strides = [1, 1]} : vector<2x512xf32> to vector<2x128xf32>
    %101 = math.tanh %100 : vector<2x128xf32>
    %102 = vector.extract_strided_slice %85 {offsets = [0, 384], sizes = [2, 128], strides = [1, 1]} : vector<2x512xf32> to vector<2x128xf32>
    %cst_42 = arith.constant 0.000000e+00 : f32
    %103 = vector.broadcast %cst_42 : f32 to vector<2x128xf32>
    %104 = arith.subf %103, %102 : vector<2x128xf32>
    %105 = math.exp %104 : vector<2x128xf32>
    %cst_43 = arith.constant 1.000000e+00 : f32
    %106 = vector.broadcast %cst_43 : f32 to vector<2x128xf32>
    %107 = arith.addf %106, %105 : vector<2x128xf32>
    %108 = tpu.reciprocal %107 {approx = true} : vector<2x128xf32> -> vector<2x128xf32>
    %109 = arith.mulf %99, %41 : vector<2x128xf32>
    %110 = arith.mulf %92, %101 : vector<2x128xf32>
    %111 = arith.addf %109, %110 : vector<2x128xf32>
    %112 = math.tanh %111 : vector<2x128xf32>
    %113 = arith.mulf %108, %112 : vector<2x128xf32>
    %114 = arith.truncf %113 : vector<2x128xf32> to vector<2x128xbf16>
    %c0_44 = arith.constant 0 : index
    %c0_45 = arith.constant 0 : index
    %115 = vector.load %arg4[%c0_44, %c0_45] : memref<128x512xbf16, #tpu.memory_space<vmem>>, vector<128x512xbf16>
    %cst_46 = arith.constant dense<0.000000e+00> : vector<2x512xf32>
    %116 = tpu.matmul %114, %115, %cst_46 {dimension_numbers = #tpu.dot_dimension_numbers<[1], [0], [0], [1], [0, 0, 1, 1], [], []>} : vector<2x128xbf16>, vector<128x512xbf16>, vector<2x512xf32> -> vector<2x512xf32>
    %c0_47 = arith.constant 0 : index
    %c0_48 = arith.constant 0 : index
    %117 = vector.load %arg5[%c0_47, %c0_48] : memref<128x512xbf16, #tpu.memory_space<vmem>>, vector<128x512xbf16>
    %cst_49 = arith.constant dense<0.000000e+00> : vector<2x512xf32>
    %118 = tpu.matmul %79, %117, %cst_49 {dimension_numbers = #tpu.dot_dimension_numbers<[1], [0], [0], [1], [0, 0, 1, 1], [], []>} : vector<2x128xbf16>, vector<128x512xbf16>, vector<2x512xf32> -> vector<2x512xf32>
    %119 = arith.addf %116, %118 : vector<2x512xf32>
    %120 = arith.addf %119, %5 : vector<2x512xf32>
    %121 = vector.extract_strided_slice %120 {offsets = [0, 0], sizes = [2, 128], strides = [1, 1]} : vector<2x512xf32> to vector<2x128xf32>
    %cst_50 = arith.constant 0.000000e+00 : f32
    %122 = vector.broadcast %cst_50 : f32 to vector<2x128xf32>
    %123 = arith.subf %122, %121 : vector<2x128xf32>
    %124 = math.exp %123 : vector<2x128xf32>
    %cst_51 = arith.constant 1.000000e+00 : f32
    %125 = vector.broadcast %cst_51 : f32 to vector<2x128xf32>
    %126 = arith.addf %125, %124 : vector<2x128xf32>
    %127 = tpu.reciprocal %126 {approx = true} : vector<2x128xf32> -> vector<2x128xf32>
    %128 = vector.extract_strided_slice %120 {offsets = [0, 128], sizes = [2, 128], strides = [1, 1]} : vector<2x512xf32> to vector<2x128xf32>
    %cst_52 = arith.constant 0.000000e+00 : f32
    %129 = vector.broadcast %cst_52 : f32 to vector<2x128xf32>
    %130 = arith.subf %129, %128 : vector<2x128xf32>
    %131 = math.exp %130 : vector<2x128xf32>
    %cst_53 = arith.constant 1.000000e+00 : f32
    %132 = vector.broadcast %cst_53 : f32 to vector<2x128xf32>
    %133 = arith.addf %132, %131 : vector<2x128xf32>
    %134 = tpu.reciprocal %133 {approx = true} : vector<2x128xf32> -> vector<2x128xf32>
    %135 = vector.extract_strided_slice %120 {offsets = [0, 256], sizes = [2, 128], strides = [1, 1]} : vector<2x512xf32> to vector<2x128xf32>
    %136 = math.tanh %135 : vector<2x128xf32>
    %137 = vector.extract_strided_slice %120 {offsets = [0, 384], sizes = [2, 128], strides = [1, 1]} : vector<2x512xf32> to vector<2x128xf32>
    %cst_54 = arith.constant 0.000000e+00 : f32
    %138 = vector.broadcast %cst_54 : f32 to vector<2x128xf32>
    %139 = arith.subf %138, %137 : vector<2x128xf32>
    %140 = math.exp %139 : vector<2x128xf32>
    %cst_55 = arith.constant 1.000000e+00 : f32
    %141 = vector.broadcast %cst_55 : f32 to vector<2x128xf32>
    %142 = arith.addf %141, %140 : vector<2x128xf32>
    %143 = tpu.reciprocal %142 {approx = true} : vector<2x128xf32> -> vector<2x128xf32>
    %144 = arith.mulf %134, %76 : vector<2x128xf32>
    %145 = arith.mulf %127, %136 : vector<2x128xf32>
    %146 = arith.addf %144, %145 : vector<2x128xf32>
    %147 = math.tanh %146 : vector<2x128xf32>
    %148 = arith.mulf %143, %147 : vector<2x128xf32>
    %149 = arith.truncf %148 : vector<2x128xf32> to vector<2x128xbf16>
    %c2_i32 = arith.constant 2 : i32
    %150 = arith.index_cast %c2_i32 : i32 to index
    %c0_56 = arith.constant 0 : index
    %c0_57 = arith.constant 0 : index
    %151 = vector.load %arg2[%150, %c0_56, %c0_57] : memref<8x2x512xf32, #tpu.memory_space<vmem>>, vector<1x2x512xf32>
    %152 = vector.shape_cast %151 : vector<1x2x512xf32> to vector<2x512xf32>
    %c0_58 = arith.constant 0 : index
    %c0_59 = arith.constant 0 : index
    %153 = vector.load %arg3[%c0_58, %c0_59] : memref<128x512xbf16, #tpu.memory_space<vmem>>, vector<128x512xbf16>
    %cst_60 = arith.constant dense<0.000000e+00> : vector<2x512xf32>
    %154 = tpu.matmul %114, %153, %cst_60 {dimension_numbers = #tpu.dot_dimension_numbers<[1], [0], [0], [1], [0, 0, 1, 1], [], []>} : vector<2x128xbf16>, vector<128x512xbf16>, vector<2x512xf32> -> vector<2x512xf32>
    %155 = arith.addf %152, %154 : vector<2x512xf32>
    %156 = vector.extract_strided_slice %155 {offsets = [0, 0], sizes = [2, 128], strides = [1, 1]} : vector<2x512xf32> to vector<2x128xf32>
    %cst_61 = arith.constant 0.000000e+00 : f32
    %157 = vector.broadcast %cst_61 : f32 to vector<2x128xf32>
    %158 = arith.subf %157, %156 : vector<2x128xf32>
    %159 = math.exp %158 : vector<2x128xf32>
    %cst_62 = arith.constant 1.000000e+00 : f32
    %160 = vector.broadcast %cst_62 : f32 to vector<2x128xf32>
    %161 = arith.addf %160, %159 : vector<2x128xf32>
    %162 = tpu.reciprocal %161 {approx = true} : vector<2x128xf32> -> vector<2x128xf32>
    %163 = vector.extract_strided_slice %155 {offsets = [0, 128], sizes = [2, 128], strides = [1, 1]} : vector<2x512xf32> to vector<2x128xf32>
    %cst_63 = arith.constant 0.000000e+00 : f32
    %164 = vector.broadcast %cst_63 : f32 to vector<2x128xf32>
    %165 = arith.subf %164, %163 : vector<2x128xf32>
    %166 = math.exp %165 : vector<2x128xf32>
    %cst_64 = arith.constant 1.000000e+00 : f32
    %167 = vector.broadcast %cst_64 : f32 to vector<2x128xf32>
    %168 = arith.addf %167, %166 : vector<2x128xf32>
    %169 = tpu.reciprocal %168 {approx = true} : vector<2x128xf32> -> vector<2x128xf32>
    %170 = vector.extract_strided_slice %155 {offsets = [0, 256], sizes = [2, 128], strides = [1, 1]} : vector<2x512xf32> to vector<2x128xf32>
    %171 = math.tanh %170 : vector<2x128xf32>
    %172 = vector.extract_strided_slice %155 {offsets = [0, 384], sizes = [2, 128], strides = [1, 1]} : vector<2x512xf32> to vector<2x128xf32>
    %cst_65 = arith.constant 0.000000e+00 : f32
    %173 = vector.broadcast %cst_65 : f32 to vector<2x128xf32>
    %174 = arith.subf %173, %172 : vector<2x128xf32>
    %175 = math.exp %174 : vector<2x128xf32>
    %cst_66 = arith.constant 1.000000e+00 : f32
    %176 = vector.broadcast %cst_66 : f32 to vector<2x128xf32>
    %177 = arith.addf %176, %175 : vector<2x128xf32>
    %178 = tpu.reciprocal %177 {approx = true} : vector<2x128xf32> -> vector<2x128xf32>
    %179 = arith.mulf %169, %111 : vector<2x128xf32>
    %180 = arith.mulf %162, %171 : vector<2x128xf32>
    %181 = arith.addf %179, %180 : vector<2x128xf32>
    %182 = math.tanh %181 : vector<2x128xf32>
    %183 = arith.mulf %178, %182 : vector<2x128xf32>
    %184 = arith.truncf %183 : vector<2x128xf32> to vector<2x128xbf16>
    %c0_67 = arith.constant 0 : index
    %c0_68 = arith.constant 0 : index
    %185 = vector.load %arg4[%c0_67, %c0_68] : memref<128x512xbf16, #tpu.memory_space<vmem>>, vector<128x512xbf16>
    %cst_69 = arith.constant dense<0.000000e+00> : vector<2x512xf32>
    %186 = tpu.matmul %184, %185, %cst_69 {dimension_numbers = #tpu.dot_dimension_numbers<[1], [0], [0], [1], [0, 0, 1, 1], [], []>} : vector<2x128xbf16>, vector<128x512xbf16>, vector<2x512xf32> -> vector<2x512xf32>
    %c0_70 = arith.constant 0 : index
    %c0_71 = arith.constant 0 : index
    %187 = vector.load %arg5[%c0_70, %c0_71] : memref<128x512xbf16, #tpu.memory_space<vmem>>, vector<128x512xbf16>
    %cst_72 = arith.constant dense<0.000000e+00> : vector<2x512xf32>
    %188 = tpu.matmul %149, %187, %cst_72 {dimension_numbers = #tpu.dot_dimension_numbers<[1], [0], [0], [1], [0, 0, 1, 1], [], []>} : vector<2x128xbf16>, vector<128x512xbf16>, vector<2x512xf32> -> vector<2x512xf32>
    %189 = arith.addf %186, %188 : vector<2x512xf32>
    %190 = arith.addf %189, %5 : vector<2x512xf32>
    %191 = vector.extract_strided_slice %190 {offsets = [0, 0], sizes = [2, 128], strides = [1, 1]} : vector<2x512xf32> to vector<2x128xf32>
    %cst_73 = arith.constant 0.000000e+00 : f32
    %192 = vector.broadcast %cst_73 : f32 to vector<2x128xf32>
    %193 = arith.subf %192, %191 : vector<2x128xf32>
    %194 = math.exp %193 : vector<2x128xf32>
    %cst_74 = arith.constant 1.000000e+00 : f32
    %195 = vector.broadcast %cst_74 : f32 to vector<2x128xf32>
    %196 = arith.addf %195, %194 : vector<2x128xf32>
    %197 = tpu.reciprocal %196 {approx = true} : vector<2x128xf32> -> vector<2x128xf32>
    %198 = vector.extract_strided_slice %190 {offsets = [0, 128], sizes = [2, 128], strides = [1, 1]} : vector<2x512xf32> to vector<2x128xf32>
    %cst_75 = arith.constant 0.000000e+00 : f32
    %199 = vector.broadcast %cst_75 : f32 to vector<2x128xf32>
    %200 = arith.subf %199, %198 : vector<2x128xf32>
    %201 = math.exp %200 : vector<2x128xf32>
    %cst_76 = arith.constant 1.000000e+00 : f32
    %202 = vector.broadcast %cst_76 : f32 to vector<2x128xf32>
    %203 = arith.addf %202, %201 : vector<2x128xf32>
    %204 = tpu.reciprocal %203 {approx = true} : vector<2x128xf32> -> vector<2x128xf32>
    %205 = vector.extract_strided_slice %190 {offsets = [0, 256], sizes = [2, 128], strides = [1, 1]} : vector<2x512xf32> to vector<2x128xf32>
    %206 = math.tanh %205 : vector<2x128xf32>
    %207 = vector.extract_strided_slice %190 {offsets = [0, 384], sizes = [2, 128], strides = [1, 1]} : vector<2x512xf32> to vector<2x128xf32>
    %cst_77 = arith.constant 0.000000e+00 : f32
    %208 = vector.broadcast %cst_77 : f32 to vector<2x128xf32>
    %209 = arith.subf %208, %207 : vector<2x128xf32>
    %210 = math.exp %209 : vector<2x128xf32>
    %cst_78 = arith.constant 1.000000e+00 : f32
    %211 = vector.broadcast %cst_78 : f32 to vector<2x128xf32>
    %212 = arith.addf %211, %210 : vector<2x128xf32>
    %213 = tpu.reciprocal %212 {approx = true} : vector<2x128xf32> -> vector<2x128xf32>
    %214 = arith.mulf %204, %146 : vector<2x128xf32>
    %215 = arith.mulf %197, %206 : vector<2x128xf32>
    %216 = arith.addf %214, %215 : vector<2x128xf32>
    %217 = math.tanh %216 : vector<2x128xf32>
    %218 = arith.mulf %213, %217 : vector<2x128xf32>
    %219 = arith.truncf %218 : vector<2x128xf32> to vector<2x128xbf16>
    %c3_i32 = arith.constant 3 : i32
    %220 = arith.index_cast %c3_i32 : i32 to index
    %c0_79 = arith.constant 0 : index
    %c0_80 = arith.constant 0 : index
    %221 = vector.load %arg2[%220, %c0_79, %c0_80] : memref<8x2x512xf32, #tpu.memory_space<vmem>>, vector<1x2x512xf32>
    %222 = vector.shape_cast %221 : vector<1x2x512xf32> to vector<2x512xf32>
    %c0_81 = arith.constant 0 : index
    %c0_82 = arith.constant 0 : index
    %223 = vector.load %arg3[%c0_81, %c0_82] : memref<128x512xbf16, #tpu.memory_space<vmem>>, vector<128x512xbf16>
    %cst_83 = arith.constant dense<0.000000e+00> : vector<2x512xf32>
    %224 = tpu.matmul %184, %223, %cst_83 {dimension_numbers = #tpu.dot_dimension_numbers<[1], [0], [0], [1], [0, 0, 1, 1], [], []>} : vector<2x128xbf16>, vector<128x512xbf16>, vector<2x512xf32> -> vector<2x512xf32>
    %225 = arith.addf %222, %224 : vector<2x512xf32>
    %226 = vector.extract_strided_slice %225 {offsets = [0, 0], sizes = [2, 128], strides = [1, 1]} : vector<2x512xf32> to vector<2x128xf32>
    %cst_84 = arith.constant 0.000000e+00 : f32
    %227 = vector.broadcast %cst_84 : f32 to vector<2x128xf32>
    %228 = arith.subf %227, %226 : vector<2x128xf32>
    %229 = math.exp %228 : vector<2x128xf32>
    %cst_85 = arith.constant 1.000000e+00 : f32
    %230 = vector.broadcast %cst_85 : f32 to vector<2x128xf32>
    %231 = arith.addf %230, %229 : vector<2x128xf32>
    %232 = tpu.reciprocal %231 {approx = true} : vector<2x128xf32> -> vector<2x128xf32>
    %233 = vector.extract_strided_slice %225 {offsets = [0, 128], sizes = [2, 128], strides = [1, 1]} : vector<2x512xf32> to vector<2x128xf32>
    %cst_86 = arith.constant 0.000000e+00 : f32
    %234 = vector.broadcast %cst_86 : f32 to vector<2x128xf32>
    %235 = arith.subf %234, %233 : vector<2x128xf32>
    %236 = math.exp %235 : vector<2x128xf32>
    %cst_87 = arith.constant 1.000000e+00 : f32
    %237 = vector.broadcast %cst_87 : f32 to vector<2x128xf32>
    %238 = arith.addf %237, %236 : vector<2x128xf32>
    %239 = tpu.reciprocal %238 {approx = true} : vector<2x128xf32> -> vector<2x128xf32>
    %240 = vector.extract_strided_slice %225 {offsets = [0, 256], sizes = [2, 128], strides = [1, 1]} : vector<2x512xf32> to vector<2x128xf32>
    %241 = math.tanh %240 : vector<2x128xf32>
    %242 = vector.extract_strided_slice %225 {offsets = [0, 384], sizes = [2, 128], strides = [1, 1]} : vector<2x512xf32> to vector<2x128xf32>
    %cst_88 = arith.constant 0.000000e+00 : f32
    %243 = vector.broadcast %cst_88 : f32 to vector<2x128xf32>
    %244 = arith.subf %243, %242 : vector<2x128xf32>
    %245 = math.exp %244 : vector<2x128xf32>
    %cst_89 = arith.constant 1.000000e+00 : f32
    %246 = vector.broadcast %cst_89 : f32 to vector<2x128xf32>
    %247 = arith.addf %246, %245 : vector<2x128xf32>
    %248 = tpu.reciprocal %247 {approx = true} : vector<2x128xf32> -> vector<2x128xf32>
    %249 = arith.mulf %239, %181 : vector<2x128xf32>
    %250 = arith.mulf %232, %241 : vector<2x128xf32>
    %251 = arith.addf %249, %250 : vector<2x128xf32>
    %252 = math.tanh %251 : vector<2x128xf32>
    %253 = arith.mulf %248, %252 : vector<2x128xf32>
    %254 = arith.truncf %253 : vector<2x128xf32> to vector<2x128xbf16>
    %c0_90 = arith.constant 0 : index
    %c0_91 = arith.constant 0 : index
    %255 = vector.load %arg4[%c0_90, %c0_91] : memref<128x512xbf16, #tpu.memory_space<vmem>>, vector<128x512xbf16>
    %cst_92 = arith.constant dense<0.000000e+00> : vector<2x512xf32>
    %256 = tpu.matmul %254, %255, %cst_92 {dimension_numbers = #tpu.dot_dimension_numbers<[1], [0], [0], [1], [0, 0, 1, 1], [], []>} : vector<2x128xbf16>, vector<128x512xbf16>, vector<2x512xf32> -> vector<2x512xf32>
    %c0_93 = arith.constant 0 : index
    %c0_94 = arith.constant 0 : index
    %257 = vector.load %arg5[%c0_93, %c0_94] : memref<128x512xbf16, #tpu.memory_space<vmem>>, vector<128x512xbf16>
    %cst_95 = arith.constant dense<0.000000e+00> : vector<2x512xf32>
    %258 = tpu.matmul %219, %257, %cst_95 {dimension_numbers = #tpu.dot_dimension_numbers<[1], [0], [0], [1], [0, 0, 1, 1], [], []>} : vector<2x128xbf16>, vector<128x512xbf16>, vector<2x512xf32> -> vector<2x512xf32>
    %259 = arith.addf %256, %258 : vector<2x512xf32>
    %260 = arith.addf %259, %5 : vector<2x512xf32>
    %261 = vector.extract_strided_slice %260 {offsets = [0, 0], sizes = [2, 128], strides = [1, 1]} : vector<2x512xf32> to vector<2x128xf32>
    %cst_96 = arith.constant 0.000000e+00 : f32
    %262 = vector.broadcast %cst_96 : f32 to vector<2x128xf32>
    %263 = arith.subf %262, %261 : vector<2x128xf32>
    %264 = math.exp %263 : vector<2x128xf32>
    %cst_97 = arith.constant 1.000000e+00 : f32
    %265 = vector.broadcast %cst_97 : f32 to vector<2x128xf32>
    %266 = arith.addf %265, %264 : vector<2x128xf32>
    %267 = tpu.reciprocal %266 {approx = true} : vector<2x128xf32> -> vector<2x128xf32>
    %268 = vector.extract_strided_slice %260 {offsets = [0, 128], sizes = [2, 128], strides = [1, 1]} : vector<2x512xf32> to vector<2x128xf32>
    %cst_98 = arith.constant 0.000000e+00 : f32
    %269 = vector.broadcast %cst_98 : f32 to vector<2x128xf32>
    %270 = arith.subf %269, %268 : vector<2x128xf32>
    %271 = math.exp %270 : vector<2x128xf32>
    %cst_99 = arith.constant 1.000000e+00 : f32
    %272 = vector.broadcast %cst_99 : f32 to vector<2x128xf32>
    %273 = arith.addf %272, %271 : vector<2x128xf32>
    %274 = tpu.reciprocal %273 {approx = true} : vector<2x128xf32> -> vector<2x128xf32>
    %275 = vector.extract_strided_slice %260 {offsets = [0, 256], sizes = [2, 128], strides = [1, 1]} : vector<2x512xf32> to vector<2x128xf32>
    %276 = math.tanh %275 : vector<2x128xf32>
    %277 = vector.extract_strided_slice %260 {offsets = [0, 384], sizes = [2, 128], strides = [1, 1]} : vector<2x512xf32> to vector<2x128xf32>
    %cst_100 = arith.constant 0.000000e+00 : f32
    %278 = vector.broadcast %cst_100 : f32 to vector<2x128xf32>
    %279 = arith.subf %278, %277 : vector<2x128xf32>
    %280 = math.exp %279 : vector<2x128xf32>
    %cst_101 = arith.constant 1.000000e+00 : f32
    %281 = vector.broadcast %cst_101 : f32 to vector<2x128xf32>
    %282 = arith.addf %281, %280 : vector<2x128xf32>
    %283 = tpu.reciprocal %282 {approx = true} : vector<2x128xf32> -> vector<2x128xf32>
    %284 = arith.mulf %274, %216 : vector<2x128xf32>
    %285 = arith.mulf %267, %276 : vector<2x128xf32>
    %286 = arith.addf %284, %285 : vector<2x128xf32>
    %287 = math.tanh %286 : vector<2x128xf32>
    %288 = arith.mulf %283, %287 : vector<2x128xf32>
    %289 = arith.truncf %288 : vector<2x128xf32> to vector<2x128xbf16>
    %c4_i32 = arith.constant 4 : i32
    %290 = arith.index_cast %c4_i32 : i32 to index
    %c0_102 = arith.constant 0 : index
    %c0_103 = arith.constant 0 : index
    %291 = vector.load %arg2[%290, %c0_102, %c0_103] : memref<8x2x512xf32, #tpu.memory_space<vmem>>, vector<1x2x512xf32>
    %292 = vector.shape_cast %291 : vector<1x2x512xf32> to vector<2x512xf32>
    %c0_104 = arith.constant 0 : index
    %c0_105 = arith.constant 0 : index
    %293 = vector.load %arg3[%c0_104, %c0_105] : memref<128x512xbf16, #tpu.memory_space<vmem>>, vector<128x512xbf16>
    %cst_106 = arith.constant dense<0.000000e+00> : vector<2x512xf32>
    %294 = tpu.matmul %254, %293, %cst_106 {dimension_numbers = #tpu.dot_dimension_numbers<[1], [0], [0], [1], [0, 0, 1, 1], [], []>} : vector<2x128xbf16>, vector<128x512xbf16>, vector<2x512xf32> -> vector<2x512xf32>
    %295 = arith.addf %292, %294 : vector<2x512xf32>
    %296 = vector.extract_strided_slice %295 {offsets = [0, 0], sizes = [2, 128], strides = [1, 1]} : vector<2x512xf32> to vector<2x128xf32>
    %cst_107 = arith.constant 0.000000e+00 : f32
    %297 = vector.broadcast %cst_107 : f32 to vector<2x128xf32>
    %298 = arith.subf %297, %296 : vector<2x128xf32>
    %299 = math.exp %298 : vector<2x128xf32>
    %cst_108 = arith.constant 1.000000e+00 : f32
    %300 = vector.broadcast %cst_108 : f32 to vector<2x128xf32>
    %301 = arith.addf %300, %299 : vector<2x128xf32>
    %302 = tpu.reciprocal %301 {approx = true} : vector<2x128xf32> -> vector<2x128xf32>
    %303 = vector.extract_strided_slice %295 {offsets = [0, 128], sizes = [2, 128], strides = [1, 1]} : vector<2x512xf32> to vector<2x128xf32>
    %cst_109 = arith.constant 0.000000e+00 : f32
    %304 = vector.broadcast %cst_109 : f32 to vector<2x128xf32>
    %305 = arith.subf %304, %303 : vector<2x128xf32>
    %306 = math.exp %305 : vector<2x128xf32>
    %cst_110 = arith.constant 1.000000e+00 : f32
    %307 = vector.broadcast %cst_110 : f32 to vector<2x128xf32>
    %308 = arith.addf %307, %306 : vector<2x128xf32>
    %309 = tpu.reciprocal %308 {approx = true} : vector<2x128xf32> -> vector<2x128xf32>
    %310 = vector.extract_strided_slice %295 {offsets = [0, 256], sizes = [2, 128], strides = [1, 1]} : vector<2x512xf32> to vector<2x128xf32>
    %311 = math.tanh %310 : vector<2x128xf32>
    %312 = vector.extract_strided_slice %295 {offsets = [0, 384], sizes = [2, 128], strides = [1, 1]} : vector<2x512xf32> to vector<2x128xf32>
    %cst_111 = arith.constant 0.000000e+00 : f32
    %313 = vector.broadcast %cst_111 : f32 to vector<2x128xf32>
    %314 = arith.subf %313, %312 : vector<2x128xf32>
    %315 = math.exp %314 : vector<2x128xf32>
    %cst_112 = arith.constant 1.000000e+00 : f32
    %316 = vector.broadcast %cst_112 : f32 to vector<2x128xf32>
    %317 = arith.addf %316, %315 : vector<2x128xf32>
    %318 = tpu.reciprocal %317 {approx = true} : vector<2x128xf32> -> vector<2x128xf32>
    %319 = arith.mulf %309, %251 : vector<2x128xf32>
    %320 = arith.mulf %302, %311 : vector<2x128xf32>
    %321 = arith.addf %319, %320 : vector<2x128xf32>
    %322 = math.tanh %321 : vector<2x128xf32>
    %323 = arith.mulf %318, %322 : vector<2x128xf32>
    %324 = arith.truncf %323 : vector<2x128xf32> to vector<2x128xbf16>
    %c0_113 = arith.constant 0 : index
    %c0_114 = arith.constant 0 : index
    %325 = vector.load %arg4[%c0_113, %c0_114] : memref<128x512xbf16, #tpu.memory_space<vmem>>, vector<128x512xbf16>
    %cst_115 = arith.constant dense<0.000000e+00> : vector<2x512xf32>
    %326 = tpu.matmul %324, %325, %cst_115 {dimension_numbers = #tpu.dot_dimension_numbers<[1], [0], [0], [1], [0, 0, 1, 1], [], []>} : vector<2x128xbf16>, vector<128x512xbf16>, vector<2x512xf32> -> vector<2x512xf32>
    %c0_116 = arith.constant 0 : index
    %c0_117 = arith.constant 0 : index
    %327 = vector.load %arg5[%c0_116, %c0_117] : memref<128x512xbf16, #tpu.memory_space<vmem>>, vector<128x512xbf16>
    %cst_118 = arith.constant dense<0.000000e+00> : vector<2x512xf32>
    %328 = tpu.matmul %289, %327, %cst_118 {dimension_numbers = #tpu.dot_dimension_numbers<[1], [0], [0], [1], [0, 0, 1, 1], [], []>} : vector<2x128xbf16>, vector<128x512xbf16>, vector<2x512xf32> -> vector<2x512xf32>
    %329 = arith.addf %326, %328 : vector<2x512xf32>
    %330 = arith.addf %329, %5 : vector<2x512xf32>
    %331 = vector.extract_strided_slice %330 {offsets = [0, 0], sizes = [2, 128], strides = [1, 1]} : vector<2x512xf32> to vector<2x128xf32>
    %cst_119 = arith.constant 0.000000e+00 : f32
    %332 = vector.broadcast %cst_119 : f32 to vector<2x128xf32>
    %333 = arith.subf %332, %331 : vector<2x128xf32>
    %334 = math.exp %333 : vector<2x128xf32>
    %cst_120 = arith.constant 1.000000e+00 : f32
    %335 = vector.broadcast %cst_120 : f32 to vector<2x128xf32>
    %336 = arith.addf %335, %334 : vector<2x128xf32>
    %337 = tpu.reciprocal %336 {approx = true} : vector<2x128xf32> -> vector<2x128xf32>
    %338 = vector.extract_strided_slice %330 {offsets = [0, 128], sizes = [2, 128], strides = [1, 1]} : vector<2x512xf32> to vector<2x128xf32>
    %cst_121 = arith.constant 0.000000e+00 : f32
    %339 = vector.broadcast %cst_121 : f32 to vector<2x128xf32>
    %340 = arith.subf %339, %338 : vector<2x128xf32>
    %341 = math.exp %340 : vector<2x128xf32>
    %cst_122 = arith.constant 1.000000e+00 : f32
    %342 = vector.broadcast %cst_122 : f32 to vector<2x128xf32>
    %343 = arith.addf %342, %341 : vector<2x128xf32>
    %344 = tpu.reciprocal %343 {approx = true} : vector<2x128xf32> -> vector<2x128xf32>
    %345 = vector.extract_strided_slice %330 {offsets = [0, 256], sizes = [2, 128], strides = [1, 1]} : vector<2x512xf32> to vector<2x128xf32>
    %346 = math.tanh %345 : vector<2x128xf32>
    %347 = vector.extract_strided_slice %330 {offsets = [0, 384], sizes = [2, 128], strides = [1, 1]} : vector<2x512xf32> to vector<2x128xf32>
    %cst_123 = arith.constant 0.000000e+00 : f32
    %348 = vector.broadcast %cst_123 : f32 to vector<2x128xf32>
    %349 = arith.subf %348, %347 : vector<2x128xf32>
    %350 = math.exp %349 : vector<2x128xf32>
    %cst_124 = arith.constant 1.000000e+00 : f32
    %351 = vector.broadcast %cst_124 : f32 to vector<2x128xf32>
    %352 = arith.addf %351, %350 : vector<2x128xf32>
    %353 = tpu.reciprocal %352 {approx = true} : vector<2x128xf32> -> vector<2x128xf32>
    %354 = arith.mulf %344, %286 : vector<2x128xf32>
    %355 = arith.mulf %337, %346 : vector<2x128xf32>
    %356 = arith.addf %354, %355 : vector<2x128xf32>
    %357 = math.tanh %356 : vector<2x128xf32>
    %358 = arith.mulf %353, %357 : vector<2x128xf32>
    %359 = arith.truncf %358 : vector<2x128xf32> to vector<2x128xbf16>
    %c5_i32 = arith.constant 5 : i32
    %360 = arith.index_cast %c5_i32 : i32 to index
    %c0_125 = arith.constant 0 : index
    %c0_126 = arith.constant 0 : index
    %361 = vector.load %arg2[%360, %c0_125, %c0_126] : memref<8x2x512xf32, #tpu.memory_space<vmem>>, vector<1x2x512xf32>
    %362 = vector.shape_cast %361 : vector<1x2x512xf32> to vector<2x512xf32>
    %c0_127 = arith.constant 0 : index
    %c0_128 = arith.constant 0 : index
    %363 = vector.load %arg3[%c0_127, %c0_128] : memref<128x512xbf16, #tpu.memory_space<vmem>>, vector<128x512xbf16>
    %cst_129 = arith.constant dense<0.000000e+00> : vector<2x512xf32>
    %364 = tpu.matmul %324, %363, %cst_129 {dimension_numbers = #tpu.dot_dimension_numbers<[1], [0], [0], [1], [0, 0, 1, 1], [], []>} : vector<2x128xbf16>, vector<128x512xbf16>, vector<2x512xf32> -> vector<2x512xf32>
    %365 = arith.addf %362, %364 : vector<2x512xf32>
    %366 = vector.extract_strided_slice %365 {offsets = [0, 0], sizes = [2, 128], strides = [1, 1]} : vector<2x512xf32> to vector<2x128xf32>
    %cst_130 = arith.constant 0.000000e+00 : f32
    %367 = vector.broadcast %cst_130 : f32 to vector<2x128xf32>
    %368 = arith.subf %367, %366 : vector<2x128xf32>
    %369 = math.exp %368 : vector<2x128xf32>
    %cst_131 = arith.constant 1.000000e+00 : f32
    %370 = vector.broadcast %cst_131 : f32 to vector<2x128xf32>
    %371 = arith.addf %370, %369 : vector<2x128xf32>
    %372 = tpu.reciprocal %371 {approx = true} : vector<2x128xf32> -> vector<2x128xf32>
    %373 = vector.extract_strided_slice %365 {offsets = [0, 128], sizes = [2, 128], strides = [1, 1]} : vector<2x512xf32> to vector<2x128xf32>
    %cst_132 = arith.constant 0.000000e+00 : f32
    %374 = vector.broadcast %cst_132 : f32 to vector<2x128xf32>
    %375 = arith.subf %374, %373 : vector<2x128xf32>
    %376 = math.exp %375 : vector<2x128xf32>
    %cst_133 = arith.constant 1.000000e+00 : f32
    %377 = vector.broadcast %cst_133 : f32 to vector<2x128xf32>
    %378 = arith.addf %377, %376 : vector<2x128xf32>
    %379 = tpu.reciprocal %378 {approx = true} : vector<2x128xf32> -> vector<2x128xf32>
    %380 = vector.extract_strided_slice %365 {offsets = [0, 256], sizes = [2, 128], strides = [1, 1]} : vector<2x512xf32> to vector<2x128xf32>
    %381 = math.tanh %380 : vector<2x128xf32>
    %382 = vector.extract_strided_slice %365 {offsets = [0, 384], sizes = [2, 128], strides = [1, 1]} : vector<2x512xf32> to vector<2x128xf32>
    %cst_134 = arith.constant 0.000000e+00 : f32
    %383 = vector.broadcast %cst_134 : f32 to vector<2x128xf32>
    %384 = arith.subf %383, %382 : vector<2x128xf32>
    %385 = math.exp %384 : vector<2x128xf32>
    %cst_135 = arith.constant 1.000000e+00 : f32
    %386 = vector.broadcast %cst_135 : f32 to vector<2x128xf32>
    %387 = arith.addf %386, %385 : vector<2x128xf32>
    %388 = tpu.reciprocal %387 {approx = true} : vector<2x128xf32> -> vector<2x128xf32>
    %389 = arith.mulf %379, %321 : vector<2x128xf32>
    %390 = arith.mulf %372, %381 : vector<2x128xf32>
    %391 = arith.addf %389, %390 : vector<2x128xf32>
    %392 = math.tanh %391 : vector<2x128xf32>
    %393 = arith.mulf %388, %392 : vector<2x128xf32>
    %394 = arith.truncf %393 : vector<2x128xf32> to vector<2x128xbf16>
    %c0_136 = arith.constant 0 : index
    %c0_137 = arith.constant 0 : index
    %395 = vector.load %arg4[%c0_136, %c0_137] : memref<128x512xbf16, #tpu.memory_space<vmem>>, vector<128x512xbf16>
    %cst_138 = arith.constant dense<0.000000e+00> : vector<2x512xf32>
    %396 = tpu.matmul %394, %395, %cst_138 {dimension_numbers = #tpu.dot_dimension_numbers<[1], [0], [0], [1], [0, 0, 1, 1], [], []>} : vector<2x128xbf16>, vector<128x512xbf16>, vector<2x512xf32> -> vector<2x512xf32>
    %c0_139 = arith.constant 0 : index
    %c0_140 = arith.constant 0 : index
    %397 = vector.load %arg5[%c0_139, %c0_140] : memref<128x512xbf16, #tpu.memory_space<vmem>>, vector<128x512xbf16>
    %cst_141 = arith.constant dense<0.000000e+00> : vector<2x512xf32>
    %398 = tpu.matmul %359, %397, %cst_141 {dimension_numbers = #tpu.dot_dimension_numbers<[1], [0], [0], [1], [0, 0, 1, 1], [], []>} : vector<2x128xbf16>, vector<128x512xbf16>, vector<2x512xf32> -> vector<2x512xf32>
    %399 = arith.addf %396, %398 : vector<2x512xf32>
    %400 = arith.addf %399, %5 : vector<2x512xf32>
    %401 = vector.extract_strided_slice %400 {offsets = [0, 0], sizes = [2, 128], strides = [1, 1]} : vector<2x512xf32> to vector<2x128xf32>
    %cst_142 = arith.constant 0.000000e+00 : f32
    %402 = vector.broadcast %cst_142 : f32 to vector<2x128xf32>
    %403 = arith.subf %402, %401 : vector<2x128xf32>
    %404 = math.exp %403 : vector<2x128xf32>
    %cst_143 = arith.constant 1.000000e+00 : f32
    %405 = vector.broadcast %cst_143 : f32 to vector<2x128xf32>
    %406 = arith.addf %405, %404 : vector<2x128xf32>
    %407 = tpu.reciprocal %406 {approx = true} : vector<2x128xf32> -> vector<2x128xf32>
    %408 = vector.extract_strided_slice %400 {offsets = [0, 128], sizes = [2, 128], strides = [1, 1]} : vector<2x512xf32> to vector<2x128xf32>
    %cst_144 = arith.constant 0.000000e+00 : f32
    %409 = vector.broadcast %cst_144 : f32 to vector<2x128xf32>
    %410 = arith.subf %409, %408 : vector<2x128xf32>
    %411 = math.exp %410 : vector<2x128xf32>
    %cst_145 = arith.constant 1.000000e+00 : f32
    %412 = vector.broadcast %cst_145 : f32 to vector<2x128xf32>
    %413 = arith.addf %412, %411 : vector<2x128xf32>
    %414 = tpu.reciprocal %413 {approx = true} : vector<2x128xf32> -> vector<2x128xf32>
    %415 = vector.extract_strided_slice %400 {offsets = [0, 256], sizes = [2, 128], strides = [1, 1]} : vector<2x512xf32> to vector<2x128xf32>
    %416 = math.tanh %415 : vector<2x128xf32>
    %417 = vector.extract_strided_slice %400 {offsets = [0, 384], sizes = [2, 128], strides = [1, 1]} : vector<2x512xf32> to vector<2x128xf32>
    %cst_146 = arith.constant 0.000000e+00 : f32
    %418 = vector.broadcast %cst_146 : f32 to vector<2x128xf32>
    %419 = arith.subf %418, %417 : vector<2x128xf32>
    %420 = math.exp %419 : vector<2x128xf32>
    %cst_147 = arith.constant 1.000000e+00 : f32
    %421 = vector.broadcast %cst_147 : f32 to vector<2x128xf32>
    %422 = arith.addf %421, %420 : vector<2x128xf32>
    %423 = tpu.reciprocal %422 {approx = true} : vector<2x128xf32> -> vector<2x128xf32>
    %424 = arith.mulf %414, %356 : vector<2x128xf32>
    %425 = arith.mulf %407, %416 : vector<2x128xf32>
    %426 = arith.addf %424, %425 : vector<2x128xf32>
    %427 = math.tanh %426 : vector<2x128xf32>
    %428 = arith.mulf %423, %427 : vector<2x128xf32>
    %429 = arith.truncf %428 : vector<2x128xf32> to vector<2x128xbf16>
    %c6_i32 = arith.constant 6 : i32
    %430 = arith.index_cast %c6_i32 : i32 to index
    %c0_148 = arith.constant 0 : index
    %c0_149 = arith.constant 0 : index
    %431 = vector.load %arg2[%430, %c0_148, %c0_149] : memref<8x2x512xf32, #tpu.memory_space<vmem>>, vector<1x2x512xf32>
    %432 = vector.shape_cast %431 : vector<1x2x512xf32> to vector<2x512xf32>
    %c0_150 = arith.constant 0 : index
    %c0_151 = arith.constant 0 : index
    %433 = vector.load %arg3[%c0_150, %c0_151] : memref<128x512xbf16, #tpu.memory_space<vmem>>, vector<128x512xbf16>
    %cst_152 = arith.constant dense<0.000000e+00> : vector<2x512xf32>
    %434 = tpu.matmul %394, %433, %cst_152 {dimension_numbers = #tpu.dot_dimension_numbers<[1], [0], [0], [1], [0, 0, 1, 1], [], []>} : vector<2x128xbf16>, vector<128x512xbf16>, vector<2x512xf32> -> vector<2x512xf32>
    %435 = arith.addf %432, %434 : vector<2x512xf32>
    %436 = vector.extract_strided_slice %435 {offsets = [0, 0], sizes = [2, 128], strides = [1, 1]} : vector<2x512xf32> to vector<2x128xf32>
    %cst_153 = arith.constant 0.000000e+00 : f32
    %437 = vector.broadcast %cst_153 : f32 to vector<2x128xf32>
    %438 = arith.subf %437, %436 : vector<2x128xf32>
    %439 = math.exp %438 : vector<2x128xf32>
    %cst_154 = arith.constant 1.000000e+00 : f32
    %440 = vector.broadcast %cst_154 : f32 to vector<2x128xf32>
    %441 = arith.addf %440, %439 : vector<2x128xf32>
    %442 = tpu.reciprocal %441 {approx = true} : vector<2x128xf32> -> vector<2x128xf32>
    %443 = vector.extract_strided_slice %435 {offsets = [0, 128], sizes = [2, 128], strides = [1, 1]} : vector<2x512xf32> to vector<2x128xf32>
    %cst_155 = arith.constant 0.000000e+00 : f32
    %444 = vector.broadcast %cst_155 : f32 to vector<2x128xf32>
    %445 = arith.subf %444, %443 : vector<2x128xf32>
    %446 = math.exp %445 : vector<2x128xf32>
    %cst_156 = arith.constant 1.000000e+00 : f32
    %447 = vector.broadcast %cst_156 : f32 to vector<2x128xf32>
    %448 = arith.addf %447, %446 : vector<2x128xf32>
    %449 = tpu.reciprocal %448 {approx = true} : vector<2x128xf32> -> vector<2x128xf32>
    %450 = vector.extract_strided_slice %435 {offsets = [0, 256], sizes = [2, 128], strides = [1, 1]} : vector<2x512xf32> to vector<2x128xf32>
    %451 = math.tanh %450 : vector<2x128xf32>
    %452 = vector.extract_strided_slice %435 {offsets = [0, 384], sizes = [2, 128], strides = [1, 1]} : vector<2x512xf32> to vector<2x128xf32>
    %cst_157 = arith.constant 0.000000e+00 : f32
    %453 = vector.broadcast %cst_157 : f32 to vector<2x128xf32>
    %454 = arith.subf %453, %452 : vector<2x128xf32>
    %455 = math.exp %454 : vector<2x128xf32>
    %cst_158 = arith.constant 1.000000e+00 : f32
    %456 = vector.broadcast %cst_158 : f32 to vector<2x128xf32>
    %457 = arith.addf %456, %455 : vector<2x128xf32>
    %458 = tpu.reciprocal %457 {approx = true} : vector<2x128xf32> -> vector<2x128xf32>
    %459 = arith.mulf %449, %391 : vector<2x128xf32>
    %460 = arith.mulf %442, %451 : vector<2x128xf32>
    %461 = arith.addf %459, %460 : vector<2x128xf32>
    %462 = math.tanh %461 : vector<2x128xf32>
    %463 = arith.mulf %458, %462 : vector<2x128xf32>
    %464 = arith.truncf %463 : vector<2x128xf32> to vector<2x128xbf16>
    %c0_159 = arith.constant 0 : index
    %c0_160 = arith.constant 0 : index
    %465 = vector.load %arg4[%c0_159, %c0_160] : memref<128x512xbf16, #tpu.memory_space<vmem>>, vector<128x512xbf16>
    %cst_161 = arith.constant dense<0.000000e+00> : vector<2x512xf32>
    %466 = tpu.matmul %464, %465, %cst_161 {dimension_numbers = #tpu.dot_dimension_numbers<[1], [0], [0], [1], [0, 0, 1, 1], [], []>} : vector<2x128xbf16>, vector<128x512xbf16>, vector<2x512xf32> -> vector<2x512xf32>
    %c0_162 = arith.constant 0 : index
    %c0_163 = arith.constant 0 : index
    %467 = vector.load %arg5[%c0_162, %c0_163] : memref<128x512xbf16, #tpu.memory_space<vmem>>, vector<128x512xbf16>
    %cst_164 = arith.constant dense<0.000000e+00> : vector<2x512xf32>
    %468 = tpu.matmul %429, %467, %cst_164 {dimension_numbers = #tpu.dot_dimension_numbers<[1], [0], [0], [1], [0, 0, 1, 1], [], []>} : vector<2x128xbf16>, vector<128x512xbf16>, vector<2x512xf32> -> vector<2x512xf32>
    %469 = arith.addf %466, %468 : vector<2x512xf32>
    %470 = arith.addf %469, %5 : vector<2x512xf32>
    %471 = vector.extract_strided_slice %470 {offsets = [0, 0], sizes = [2, 128], strides = [1, 1]} : vector<2x512xf32> to vector<2x128xf32>
    %cst_165 = arith.constant 0.000000e+00 : f32
    %472 = vector.broadcast %cst_165 : f32 to vector<2x128xf32>
    %473 = arith.subf %472, %471 : vector<2x128xf32>
    %474 = math.exp %473 : vector<2x128xf32>
    %cst_166 = arith.constant 1.000000e+00 : f32
    %475 = vector.broadcast %cst_166 : f32 to vector<2x128xf32>
    %476 = arith.addf %475, %474 : vector<2x128xf32>
    %477 = tpu.reciprocal %476 {approx = true} : vector<2x128xf32> -> vector<2x128xf32>
    %478 = vector.extract_strided_slice %470 {offsets = [0, 128], sizes = [2, 128], strides = [1, 1]} : vector<2x512xf32> to vector<2x128xf32>
    %cst_167 = arith.constant 0.000000e+00 : f32
    %479 = vector.broadcast %cst_167 : f32 to vector<2x128xf32>
    %480 = arith.subf %479, %478 : vector<2x128xf32>
    %481 = math.exp %480 : vector<2x128xf32>
    %cst_168 = arith.constant 1.000000e+00 : f32
    %482 = vector.broadcast %cst_168 : f32 to vector<2x128xf32>
    %483 = arith.addf %482, %481 : vector<2x128xf32>
    %484 = tpu.reciprocal %483 {approx = true} : vector<2x128xf32> -> vector<2x128xf32>
    %485 = vector.extract_strided_slice %470 {offsets = [0, 256], sizes = [2, 128], strides = [1, 1]} : vector<2x512xf32> to vector<2x128xf32>
    %486 = math.tanh %485 : vector<2x128xf32>
    %487 = vector.extract_strided_slice %470 {offsets = [0, 384], sizes = [2, 128], strides = [1, 1]} : vector<2x512xf32> to vector<2x128xf32>
    %cst_169 = arith.constant 0.000000e+00 : f32
    %488 = vector.broadcast %cst_169 : f32 to vector<2x128xf32>
    %489 = arith.subf %488, %487 : vector<2x128xf32>
    %490 = math.exp %489 : vector<2x128xf32>
    %cst_170 = arith.constant 1.000000e+00 : f32
    %491 = vector.broadcast %cst_170 : f32 to vector<2x128xf32>
    %492 = arith.addf %491, %490 : vector<2x128xf32>
    %493 = tpu.reciprocal %492 {approx = true} : vector<2x128xf32> -> vector<2x128xf32>
    %494 = arith.mulf %484, %426 : vector<2x128xf32>
    %495 = arith.mulf %477, %486 : vector<2x128xf32>
    %496 = arith.addf %494, %495 : vector<2x128xf32>
    %497 = math.tanh %496 : vector<2x128xf32>
    %498 = arith.mulf %493, %497 : vector<2x128xf32>
    %499 = arith.truncf %498 : vector<2x128xf32> to vector<2x128xbf16>
    %c7_i32 = arith.constant 7 : i32
    %500 = arith.index_cast %c7_i32 : i32 to index
    %c0_171 = arith.constant 0 : index
    %c0_172 = arith.constant 0 : index
    %501 = vector.load %arg2[%500, %c0_171, %c0_172] : memref<8x2x512xf32, #tpu.memory_space<vmem>>, vector<1x2x512xf32>
    %502 = vector.shape_cast %501 : vector<1x2x512xf32> to vector<2x512xf32>
    %c0_173 = arith.constant 0 : index
    %c0_174 = arith.constant 0 : index
    %503 = vector.load %arg3[%c0_173, %c0_174] : memref<128x512xbf16, #tpu.memory_space<vmem>>, vector<128x512xbf16>
    %cst_175 = arith.constant dense<0.000000e+00> : vector<2x512xf32>
    %504 = tpu.matmul %464, %503, %cst_175 {dimension_numbers = #tpu.dot_dimension_numbers<[1], [0], [0], [1], [0, 0, 1, 1], [], []>} : vector<2x128xbf16>, vector<128x512xbf16>, vector<2x512xf32> -> vector<2x512xf32>
    %505 = arith.addf %502, %504 : vector<2x512xf32>
    %506 = vector.extract_strided_slice %505 {offsets = [0, 0], sizes = [2, 128], strides = [1, 1]} : vector<2x512xf32> to vector<2x128xf32>
    %cst_176 = arith.constant 0.000000e+00 : f32
    %507 = vector.broadcast %cst_176 : f32 to vector<2x128xf32>
    %508 = arith.subf %507, %506 : vector<2x128xf32>
    %509 = math.exp %508 : vector<2x128xf32>
    %cst_177 = arith.constant 1.000000e+00 : f32
    %510 = vector.broadcast %cst_177 : f32 to vector<2x128xf32>
    %511 = arith.addf %510, %509 : vector<2x128xf32>
    %512 = tpu.reciprocal %511 {approx = true} : vector<2x128xf32> -> vector<2x128xf32>
    %513 = vector.extract_strided_slice %505 {offsets = [0, 128], sizes = [2, 128], strides = [1, 1]} : vector<2x512xf32> to vector<2x128xf32>
    %cst_178 = arith.constant 0.000000e+00 : f32
    %514 = vector.broadcast %cst_178 : f32 to vector<2x128xf32>
    %515 = arith.subf %514, %513 : vector<2x128xf32>
    %516 = math.exp %515 : vector<2x128xf32>
    %cst_179 = arith.constant 1.000000e+00 : f32
    %517 = vector.broadcast %cst_179 : f32 to vector<2x128xf32>
    %518 = arith.addf %517, %516 : vector<2x128xf32>
    %519 = tpu.reciprocal %518 {approx = true} : vector<2x128xf32> -> vector<2x128xf32>
    %520 = vector.extract_strided_slice %505 {offsets = [0, 256], sizes = [2, 128], strides = [1, 1]} : vector<2x512xf32> to vector<2x128xf32>
    %521 = math.tanh %520 : vector<2x128xf32>
    %522 = vector.extract_strided_slice %505 {offsets = [0, 384], sizes = [2, 128], strides = [1, 1]} : vector<2x512xf32> to vector<2x128xf32>
    %cst_180 = arith.constant 0.000000e+00 : f32
    %523 = vector.broadcast %cst_180 : f32 to vector<2x128xf32>
    %524 = arith.subf %523, %522 : vector<2x128xf32>
    %525 = math.exp %524 : vector<2x128xf32>
    %cst_181 = arith.constant 1.000000e+00 : f32
    %526 = vector.broadcast %cst_181 : f32 to vector<2x128xf32>
    %527 = arith.addf %526, %525 : vector<2x128xf32>
    %528 = tpu.reciprocal %527 {approx = true} : vector<2x128xf32> -> vector<2x128xf32>
    %529 = arith.mulf %519, %461 : vector<2x128xf32>
    %530 = arith.mulf %512, %521 : vector<2x128xf32>
    %531 = arith.addf %529, %530 : vector<2x128xf32>
    %532 = math.tanh %531 : vector<2x128xf32>
    %533 = arith.mulf %528, %532 : vector<2x128xf32>
    %534 = arith.truncf %533 : vector<2x128xf32> to vector<2x128xbf16>
    %c0_182 = arith.constant 0 : index
    %c0_183 = arith.constant 0 : index
    %535 = vector.load %arg4[%c0_182, %c0_183] : memref<128x512xbf16, #tpu.memory_space<vmem>>, vector<128x512xbf16>
    %cst_184 = arith.constant dense<0.000000e+00> : vector<2x512xf32>
    %536 = tpu.matmul %534, %535, %cst_184 {dimension_numbers = #tpu.dot_dimension_numbers<[1], [0], [0], [1], [0, 0, 1, 1], [], []>} : vector<2x128xbf16>, vector<128x512xbf16>, vector<2x512xf32> -> vector<2x512xf32>
    %c0_185 = arith.constant 0 : index
    %c0_186 = arith.constant 0 : index
    %537 = vector.load %arg5[%c0_185, %c0_186] : memref<128x512xbf16, #tpu.memory_space<vmem>>, vector<128x512xbf16>
    %cst_187 = arith.constant dense<0.000000e+00> : vector<2x512xf32>
    %538 = tpu.matmul %499, %537, %cst_187 {dimension_numbers = #tpu.dot_dimension_numbers<[1], [0], [0], [1], [0, 0, 1, 1], [], []>} : vector<2x128xbf16>, vector<128x512xbf16>, vector<2x512xf32> -> vector<2x512xf32>
    %539 = arith.addf %536, %538 : vector<2x512xf32>
    %540 = arith.addf %539, %5 : vector<2x512xf32>
    %541 = vector.extract_strided_slice %540 {offsets = [0, 0], sizes = [2, 128], strides = [1, 1]} : vector<2x512xf32> to vector<2x128xf32>
    %cst_188 = arith.constant 0.000000e+00 : f32
    %542 = vector.broadcast %cst_188 : f32 to vector<2x128xf32>
    %543 = arith.subf %542, %541 : vector<2x128xf32>
    %544 = math.exp %543 : vector<2x128xf32>
    %cst_189 = arith.constant 1.000000e+00 : f32
    %545 = vector.broadcast %cst_189 : f32 to vector<2x128xf32>
    %546 = arith.addf %545, %544 : vector<2x128xf32>
    %547 = tpu.reciprocal %546 {approx = true} : vector<2x128xf32> -> vector<2x128xf32>
    %548 = vector.extract_strided_slice %540 {offsets = [0, 128], sizes = [2, 128], strides = [1, 1]} : vector<2x512xf32> to vector<2x128xf32>
    %cst_190 = arith.constant 0.000000e+00 : f32
    %549 = vector.broadcast %cst_190 : f32 to vector<2x128xf32>
    %550 = arith.subf %549, %548 : vector<2x128xf32>
    %551 = math.exp %550 : vector<2x128xf32>
    %cst_191 = arith.constant 1.000000e+00 : f32
    %552 = vector.broadcast %cst_191 : f32 to vector<2x128xf32>
    %553 = arith.addf %552, %551 : vector<2x128xf32>
    %554 = tpu.reciprocal %553 {approx = true} : vector<2x128xf32> -> vector<2x128xf32>
    %555 = vector.extract_strided_slice %540 {offsets = [0, 256], sizes = [2, 128], strides = [1, 1]} : vector<2x512xf32> to vector<2x128xf32>
    %556 = math.tanh %555 : vector<2x128xf32>
    %557 = vector.extract_strided_slice %540 {offsets = [0, 384], sizes = [2, 128], strides = [1, 1]} : vector<2x512xf32> to vector<2x128xf32>
    %cst_192 = arith.constant 0.000000e+00 : f32
    %558 = vector.broadcast %cst_192 : f32 to vector<2x128xf32>
    %559 = arith.subf %558, %557 : vector<2x128xf32>
    %560 = math.exp %559 : vector<2x128xf32>
    %cst_193 = arith.constant 1.000000e+00 : f32
    %561 = vector.broadcast %cst_193 : f32 to vector<2x128xf32>
    %562 = arith.addf %561, %560 : vector<2x128xf32>
    %563 = tpu.reciprocal %562 {approx = true} : vector<2x128xf32> -> vector<2x128xf32>
    %564 = arith.mulf %554, %496 : vector<2x128xf32>
    %565 = arith.mulf %547, %556 : vector<2x128xf32>
    %566 = arith.addf %564, %565 : vector<2x128xf32>
    %567 = math.tanh %566 : vector<2x128xf32>
    %568 = arith.mulf %563, %567 : vector<2x128xf32>
    %569 = arith.truncf %568 : vector<2x128xf32> to vector<2x128xbf16>
    %c8_i32 = arith.constant 8 : i32
    %c0_194 = arith.constant 0 : index
    %c0_195 = arith.constant 0 : index
    %570 = vector.load %arg10[%c0_194, %c0_195] : memref<2x128xbf16, #tpu.memory_space<vmem>>, vector<2x128xbf16>
    tpu.vector_store %arg10[%c0_194, %c0_195], %534 {strides = array<i32>} : memref<2x128xbf16, #tpu.memory_space<vmem>>, vector<2x128xbf16>,
    %c0_196 = arith.constant 0 : index
    %c0_197 = arith.constant 0 : index
    %571 = vector.load %arg11[%c0_196, %c0_197] : memref<2x128xf32, #tpu.memory_space<vmem>>, vector<2x128xf32>
    tpu.vector_store %arg11[%c0_196, %c0_197], %531 {strides = array<i32>} : memref<2x128xf32, #tpu.memory_space<vmem>>, vector<2x128xf32>,
    %c0_198 = arith.constant 0 : index
    %c0_199 = arith.constant 0 : index
    %572 = vector.load %arg12[%c0_198, %c0_199] : memref<2x128xbf16, #tpu.memory_space<vmem>>, vector<2x128xbf16>
    tpu.vector_store %arg12[%c0_198, %c0_199], %569 {strides = array<i32>} : memref<2x128xbf16, #tpu.memory_space<vmem>>, vector<2x128xbf16>,
    %c0_200 = arith.constant 0 : index
    %c0_201 = arith.constant 0 : index
    %573 = vector.load %arg13[%c0_200, %c0_201] : memref<2x128xf32, #tpu.memory_space<vmem>>, vector<2x128xf32>
    tpu.vector_store %arg13[%c0_200, %c0_201], %566 {strides = array<i32>} : memref<2x128xf32, #tpu.memory_space<vmem>>, vector<2x128xf32>,
    %c0_i32_202 = arith.constant 0 : i32
    %574 = arith.cmpi eq, %arg1, %c0_i32_202 : i32
    %575 = arith.extui %574 : i1 to i32
    %c0_i32_203 = arith.constant 0 : i32
    %576 = arith.cmpi ne, %575, %c0_i32_203 : i32
    scf.if %576 {
      %c0_204 = arith.constant 0 : index
      %c0_205 = arith.constant 0 : index
      %577 = vector.load %arg7[%c0_204, %c0_205] : memref<128x128xbf16, #tpu.memory_space<vmem>>, vector<128x128xbf16>
      %cst_206 = arith.constant dense<0.000000e+00> : vector<2x128xf32>
      %578 = tpu.matmul %569, %577, %cst_206 {dimension_numbers = #tpu.dot_dimension_numbers<[1], [0], [0], [1], [0, 0, 1, 1], [], []>} : vector<2x128xbf16>, vector<128x128xbf16>, vector<2x128xf32> -> vector<2x128xf32>
      %c0_207 = arith.constant 0 : index
      %c0_208 = arith.constant 0 : index
      %579 = vector.load %arg8[%c0_207, %c0_208] : memref<1x128xf32, #tpu.memory_space<vmem>>, vector<1x128xf32>
      %580 = vector.broadcast %579 : vector<1x128xf32> to vector<2x128xf32>
      %581 = arith.addf %578, %580 : vector<2x128xf32>
      %c0_209 = arith.constant 0 : index
      %c0_210 = arith.constant 0 : index
      %582 = vector.load %arg9[%c0_209, %c0_210] : memref<2x128xf32, #tpu.memory_space<vmem>>, vector<2x128xf32>
      tpu.vector_store %arg9[%c0_209, %c0_210], %581 {strides = array<i32>} : memref<2x128xf32, #tpu.memory_space<vmem>>, vector<2x128xf32>,
    } else {
    }
    return
  }
  func.func @transform_0(%arg0: i32, %arg1: i32) -> (i32, i32, i32) {
    %c0_i32 = arith.constant 0 : i32
    %c0_i32_0 = arith.constant 0 : i32
    return %arg1, %arg0, %c0_i32 : i32, i32, i32
  }
  func.func @transform_1(%arg0: i32, %arg1: i32) -> (i32, i32) {
    %c0_i32 = arith.constant 0 : i32
    %c0_i32_0 = arith.constant 0 : i32
    %c0_i32_1 = arith.constant 0 : i32
    return %c0_i32, %c0_i32_0 : i32, i32
  }
  func.func @transform_2(%arg0: i32, %arg1: i32) -> (i32, i32) {
    %c0_i32 = arith.constant 0 : i32
    %c0_i32_0 = arith.constant 0 : i32
    %c0_i32_1 = arith.constant 0 : i32
    return %c0_i32, %c0_i32_0 : i32, i32
  }
  func.func @transform_3(%arg0: i32, %arg1: i32) -> (i32, i32) {
    %c0_i32 = arith.constant 0 : i32
    %c0_i32_0 = arith.constant 0 : i32
    %c0_i32_1 = arith.constant 0 : i32
    return %c0_i32, %c0_i32_0 : i32, i32
  }
  func.func @transform_4(%arg0: i32, %arg1: i32) -> (i32, i32) {
    %c0_i32 = arith.constant 0 : i32
    %c0_i32_0 = arith.constant 0 : i32
    %c0_i32_1 = arith.constant 0 : i32
    return %c0_i32, %c0_i32_0 : i32, i32
  }
  func.func @transform_5(%arg0: i32, %arg1: i32) -> (i32, i32) {
    %c0_i32 = arith.constant 0 : i32
    %c0_i32_0 = arith.constant 0 : i32
    %c0_i32_1 = arith.constant 0 : i32
    return %c0_i32, %c0_i32_0 : i32, i32
  }
  func.func @transform_6(%arg0: i32, %arg1: i32) -> (i32, i32) {
    %c0_i32 = arith.constant 0 : i32
    %c0_i32_0 = arith.constant 0 : i32
    %c0_i32_1 = arith.constant 0 : i32
    return %c0_i32, %c0_i32_0 : i32, i32
  }
  func.func @transform_7(%arg0: i32, %arg1: i32) -> (i32, i32) {
    %c0_i32 = arith.constant 0 : i32
    %c0_i32_0 = arith.constant 0 : i32
    return %arg0, %c0_i32 : i32, i32
  }
}

</mosaic_0001>

<bundles_post_ra>
// kernel: tpu_custom_call.1
= control target key start
LH: loop header
LB: loop body
LE: loop exit
PB: predicated region body
PF: predicated region fallthrough
CT: control target
= control target key end

     0   :  { %12 = vsyncpa [#allocation7], 0  ;;  %s6020_s0 = inlined_call_operand.hbm [shape: f32[8,2,512], index: 0, kind: input, shape index: {}]   ;;  %s6021_s1 = inlined_call_operand.hbm [shape: bf16[128,512], index: 1, kind: input, shape index: {}]   ;;  %s6022_s2 = inlined_call_operand.hbm [shape: bf16[128,512], index: 2, kind: input, shape index: {}]   ;;  %s6023_s3 = inlined_call_operand.hbm [shape: bf16[128,512], index: 3, kind: input, shape index: {}]   ;;  %s6024_s4 = inlined_call_operand.vmem [shape: f32[1,512], index: 4, kind: input, shape index: {}]   ;;  %s6025_s5 = inlined_call_operand.hbm [shape: bf16[128,128], index: 5, kind: input, shape index: {}]   ;;  %s6026_s6 = inlined_call_operand.vmem [shape: f32[1,128], index: 6, kind: input, shape index: {}]   ;;  %s6027_s7 = inlined_call_operand.hbm [shape: f32[2,128], index: 7, kind: output, shape index: {}]  }
   0x1   :  { %13 = vsyncpa [#allocation10], 0 }
   0x2   :  { %14 = vsyncpa [#allocation13], 0 }
   0x3   :  { %15 = vsyncpa [#allocation8], 0  ;;  %s4339_s24 = smov [#allocation9]   ;;  %s4199_s28 = scalar_lea.hbm %s6021_s1, 4096 }
   0x4   :  { %s33_s25 = sshll.u32 %s4339_s24, 4  ;;  %p4200_p0 = scmp.ne.s32.totalorder %s6021_s1, %s4199_s28  ;;  %s34_s25 = int_to_ptr.vmem [resolvable:$true] %s33_s25 }
   0x5   :  { %p4203_p1 = scmp.lt.u32.totalorder %s4199_s28, %s6021_s1 }
   0x7   :  { %p4205_p2 = pnand %p4203_p1, %p4200_p0 }
   0x9   :  { %4208 = shalt.err (!%p4205_p2)
}
   0xa   :  { %s4209_s10 = scalar_lea.vmem %s34_s25, 4096  ;;  %p4214_p4 = scmp.lt.s32.totalorder %s34_s25, %s34_s25 }
   0xb   :  { %p4210_p3 = scmp.ne.s32.totalorder %s34_s25, %s4209_s10  ;;  %p4215_p5 = scmp.lt.s32.totalorder %s4209_s10, %s4209_s10 }
   0xd   :  { %p4216_p6 = por %p4215_p5, %p4214_p4 }
   0xf   :  { %p4217_p7 = pnand %p4216_p6, %p4210_p3 }
  0x11   :  { %4220 = shalt.err (!%p4217_p7)
}
  0x12   :  { %s4340_s11 = smov 256   ;;  %s4341_s12 = smov 16  }
  0x13   :  { %39 = dma.hbm_to_vmem [thread:$0]  %s6021_s1, 4096, %s34_s25, [#allocation10], %s4340_s11, %s4340_s11, %s4341_s12  }
  0x14   :  { %s4342_s15 = smov [#allocation12]   ;;  %s4343_s17 = smov [#allocation6]  }
  0x15   :  { %s57_s16 = sshll.u32 %s4342_s15, 4  ;;  %s21_s18 = sshll.u32 %s4343_s17, 4  ;;  %s58_s16 = int_to_ptr.vmem [resolvable:$true] %s57_s16  ;;  %s22_s18 = int_to_ptr.vmem [resolvable:$true] %s21_s18 }
  0x16   :  { %s4221_s21 = scalar_lea.hbm %s6023_s3, 4096 }
  0x17   :  { %p4222_p8 = scmp.ne.s32.totalorder %s6023_s3, %s4221_s21  ;;  %p4225_p9 = scmp.lt.u32.totalorder %s4221_s21, %s6023_s3 }
  0x19   :  { %p4227_p10 = pnand %p4225_p9, %p4222_p8 }
  0x1b   :  { %4230 = shalt.err (!%p4227_p10)
}
  0x1c   :  { %s4231_s1 = scalar_lea.vmem %s58_s16, 4096  ;;  %p4236_p12 = scmp.lt.s32.totalorder %s58_s16, %s58_s16 }
  0x1d   :  { %p4232_p11 = scmp.ne.s32.totalorder %s58_s16, %s4231_s1  ;;  %p4237_p13 = scmp.lt.s32.totalorder %s4231_s1, %s4231_s1 }
  0x1f   :  { %p4238_p0 = por %p4237_p13, %p4236_p12 }
  0x21   :  { %p4239_p1 = pnand %p4238_p0, %p4232_p11 }
  0x23   :  { %4242 = shalt.err (!%p4239_p1)
}
  0x24   :  { %63 = dma.hbm_to_vmem [thread:$0]  %s6023_s3, 4096, %s58_s16, [#allocation13], %s4340_s11, %s4340_s11, %s4341_s12  }
  0x25   :  { %s4243_s30 = scalar_lea.hbm %s6020_s0, 1024 }
  0x26   :  { %p4244_p2 = scmp.ne.s32.totalorder %s6020_s0, %s4243_s30  ;;  %p4247_p3 = scmp.lt.u32.totalorder %s4243_s30, %s6020_s0 }
  0x28   :  { %p4249_p4 = pnand %p4247_p3, %p4244_p2 }
  0x2a   :  { %4252 = shalt.err (!%p4249_p4)
}
  0x2b   :  { %s4253_s14 = scalar_lea.vmem %s22_s18, 1024  ;;  %p4258_p6 = scmp.lt.s32.totalorder %s22_s18, %s22_s18 }
  0x2c   :  { %p4254_p5 = scmp.ne.s32.totalorder %s22_s18, %s4253_s14  ;;  %p4259_p7 = scmp.lt.s32.totalorder %s4253_s14, %s4253_s14 }
  0x2e   :  { %p4260_p8 = por %p4259_p7, %p4258_p6 }
  0x30   :  { %p4261_p9 = pnand %p4260_p8, %p4254_p5 }
  0x32   :  { %4264 = shalt.err (!%p4261_p9)
}
  0x33   :  { %s4344_s3 = smov 128   ;;  %s4345_s15 = smov 8  }
  0x34   :  { %27 = dma.hbm_to_vmem [thread:$0]  %s6020_s0, 1024, %s22_s18, [#allocation7], %s4344_s3, %s4344_s3, %s4345_s15  }
  0x35   :  { %s4346_s19 = smov [#allocation11]   ;;  %s4347_s21 = smov [#allocation14]  }
  0x36   :  { %s45_s20 = sshll.u32 %s4346_s19, 4  ;;  %s71_s22 = sshll.u32 %s4347_s21, 4  ;;  %s46_s20 = int_to_ptr.vmem [resolvable:$true] %s45_s20  ;;  %s72_s22 = int_to_ptr.vmem [resolvable:$true] %s71_s22 }
  0x37   :  { %s4265_s26 = scalar_lea.hbm %s6022_s2, 4096 }
  0x38   :  { %p4266_p10 = scmp.ne.s32.totalorder %s6022_s2, %s4265_s26  ;;  %p4269_p11 = scmp.lt.u32.totalorder %s4265_s26, %s6022_s2 }
  0x3a   :  { %p4271_p12 = pnand %p4269_p11, %p4266_p10 }
  0x3c   :  { %4274 = shalt.err (!%p4271_p12)
}
  0x3d   :  { %s4275_s0 = scalar_lea.vmem %s46_s20, 4096  ;;  %p4280_p0 = scmp.lt.s32.totalorder %s46_s20, %s46_s20 }
  0x3e   :  { %p4276_p13 = scmp.ne.s32.totalorder %s46_s20, %s4275_s0  ;;  %p4281_p1 = scmp.lt.s32.totalorder %s4275_s0, %s4275_s0 }
  0x40   :  { %p4282_p2 = por %p4281_p1, %p4280_p0 }
  0x42   :  { %p4283_p3 = pnand %p4282_p2, %p4276_p13 }
  0x44   :  { %4286 = shalt.err (!%p4283_p3)
}
  0x45   :  { %51 = dma.hbm_to_vmem [thread:$0]  %s6022_s2, 4096, %s46_s20, [#allocation10], %s4340_s11, %s4340_s11, %s4341_s12  }
  0x46   :  { %s4287_s9 = scalar_lea.hbm %s6025_s5, 1024 }
  0x47   :  { %p4288_p4 = scmp.ne.s32.totalorder %s6025_s5, %s4287_s9  ;;  %p4291_p5 = scmp.lt.u32.totalorder %s4287_s9, %s6025_s5 }
  0x49   :  { %p4293_p6 = pnand %p4291_p5, %p4288_p4 }
  0x4b   :  { %4296 = shalt.err (!%p4293_p6)
}
  0x4c   :  { %s4297_s15 = scalar_lea.vmem %s72_s22, 1024  ;;  %p4302_p8 = scmp.lt.s32.totalorder %s72_s22, %s72_s22 }
  0x4d   :  { %p4298_p7 = scmp.ne.s32.totalorder %s72_s22, %s4297_s15  ;;  %p4303_p9 = scmp.lt.s32.totalorder %s4297_s15, %s4297_s15 }
  0x4f   :  { %p4304_p10 = por %p4303_p9, %p4302_p8 }
  0x51   :  { %p4305_p11 = pnand %p4304_p10, %p4298_p7 }
  0x53   :  { %4308 = shalt.err (!%p4305_p11)
}
  0x54   :  { %s4348_s2 = smov 64   ;;  %s4349_s11 = smov 4  }
  0x55   :  { %77 = dma.hbm_to_vmem [thread:$0]  %s6025_s5, 1024, %s72_s22, [#allocation13], %s4348_s2, %s4348_s2, %s4349_s11  }
  0x56   :  { %4331 = dma.done.wait [#allocation7], 1024  }
  0x57   :  { %4332 = vsyncadd [#allocation7], 4294966272 }
  0x58   :  { %4333 = dma.done.wait [#allocation10], 8192  }
  0x59   :  { %4334 = vsyncadd [#allocation10], 4294959104 }
  0x5a   :  { %4335 = dma.done.wait [#allocation13], 5120  }
  0x5b   :  { %4336 = vsyncadd [#allocation13], 4294962176  ;;  %v6028_v0 = vmov 0   ;;  %v4468_v1 = vld [vmem:[#allocation9 + $0x4] ss:$16 sps:$4 sm:$0xff]   ;;  %vm4353_vm0 = vmmov 0  }
  0x5c   :  { %355 = vmatprep.mubr.bf16.mxu0 %v6028_v0  ;;  %100 = vst [vmem:[#allocation2] sm:$0x1] %v6028_v0  ;;  %102 = vst [vmem:[#allocation4] sm:$0x1] %v6028_v0  ;;  %396 = vmatprep.mubr.bf16.mxu1 %v6028_v0  ;;  %v4470_v2 = vld [vmem:[#allocation9 + $0xc] ss:$16 sps:$4 sm:$0xff]  }
  0x5d   :  { %323 = vmatprep.subr.bf16.mxu0 %v4468_v1  ;;  %v4473_v3 = vld [vmem:[#allocation9] ss:$16 sps:$4 sm:$0xff]   ;;  %v4475_v4 = vld [vmem:[#allocation9 + $0x8] ss:$16 sps:$4 sm:$0xff]   ;;  %364 = vmatprep.subr.bf16.mxu1 %v4470_v2  ;;  %v4478_v5 = vld [vmem:[#allocation9 + $0x24] ss:$16 sps:$4 sm:$0xff]  }
  0x5e   :  { %324 = vmatpush1.bf16.msra.mxu0 %v4473_v3  ;;  %365 = vmatpush1.bf16.msra.mxu1 %v4475_v4  ;;  %v4482_v6 = vld [vmem:[#allocation9 + $0x2c] ss:$16 sps:$4 sm:$0xff]   ;;  %v4484_v7 = vld [vmem:[#allocation9 + $0x20] ss:$16 sps:$4 sm:$0xff]   ;;  %v4487_v8 = vld [vmem:[#allocation9 + $0x28] ss:$16 sps:$4 sm:$0xff]  }
  0x5f   :  { %325 = vmatprep.subr.bf16.mxu0 %v4478_v5  ;;  %366 = vmatprep.subr.bf16.mxu1 %v4482_v6  ;;  %v4490_v9 = vld [vmem:[#allocation9 + $0x44] ss:$16 sps:$4 sm:$0xff]   ;;  %v4492_v10 = vld [vmem:[#allocation9 + $0x4c] ss:$16 sps:$4 sm:$0xff]   ;;  %v4494_v11 = vld [vmem:[#allocation9 + $0x40] ss:$16 sps:$4 sm:$0xff]  }
  0x60   :  { %v4496_v12 = vld [vmem:[#allocation9 + $0x48] ss:$16 sps:$4 sm:$0xff]   ;;  %v4500_v13 = vld [vmem:[#allocation9 + $0x64] ss:$16 sps:$4 sm:$0xff]   ;;  %v4504_v14 = vld [vmem:[#allocation9 + $0x6c] ss:$16 sps:$4 sm:$0xff]  }
  0x61   :  { %v4506_v15 = vld [vmem:[#allocation9 + $0x60] ss:$16 sps:$4 sm:$0xff]   ;;  %v4510_v16 = vld [vmem:[#allocation9 + $0x68] ss:$16 sps:$4 sm:$0xff]   ;;  %v4512_v17 = vld [vmem:[#allocation9 + $0x84] ss:$16 sps:$4 sm:$0xff]  }
  0x62   :  { %326 = vmatpush1.bf16.msra.mxu0 %v4484_v7  ;;  %367 = vmatpush1.bf16.msra.mxu1 %v4487_v8  ;;  %v4516_v18 = vld [vmem:[#allocation9 + $0x8c] ss:$16 sps:$4 sm:$0xff]   ;;  %v4518_v19 = vld [vmem:[#allocation9 + $0x80] ss:$16 sps:$4 sm:$0xff]   ;;  %v4520_v20 = vld [vmem:[#allocation9 + $0x88] ss:$16 sps:$4 sm:$0xff]  }
  0x63   :  { %327 = vmatprep.subr.bf16.mxu0 %v4490_v9  ;;  %368 = vmatprep.subr.bf16.mxu1 %v4492_v10  ;;  %v4524_v21 = vld [vmem:[#allocation9 + $0xa4] ss:$16 sps:$4 sm:$0xff]   ;;  %v4528_v22 = vld [vmem:[#allocation9 + $0xac] ss:$16 sps:$4 sm:$0xff]   ;;  %v4532_v23 = vld [vmem:[#allocation9 + $0xa0] ss:$16 sps:$4 sm:$0xff]  }
  0x64   :  { %v4534_v24 = vld [vmem:[#allocation9 + $0xa8] ss:$16 sps:$4 sm:$0xff]   ;;  %v4538_v25 = vld [vmem:[#allocation9 + $0xc4] ss:$16 sps:$4 sm:$0xff]   ;;  %v4540_v26 = vld [vmem:[#allocation9 + $0xcc] ss:$16 sps:$4 sm:$0xff]  }
  0x65   :  { %v4542_v27 = vld [vmem:[#allocation9 + $0xc0] ss:$16 sps:$4 sm:$0xff]   ;;  %v4544_v28 = vld [vmem:[#allocation9 + $0xc8] ss:$16 sps:$4 sm:$0xff]   ;;  %v4548_v29 = vld [vmem:[#allocation9 + $0xe4] ss:$16 sps:$4 sm:$0xff]  }
  0x66   :  { %328 = vmatpush1.bf16.msra.mxu0 %v4494_v11  ;;  %369 = vmatpush1.bf16.msra.mxu1 %v4496_v12  ;;  %v4552_v30 = vld [vmem:[#allocation9 + $0xec] ss:$16 sps:$4 sm:$0xff]   ;;  %v4554_v31 = vld [vmem:[#allocation9 + $0xe0] ss:$16 sps:$4 sm:$0xff]   ;;  %v4556_v32 = vld [vmem:[#allocation9 + $0xe8] ss:$16 sps:$4 sm:$0xff]  }
  0x67   :  { %329 = vmatprep.subr.bf16.mxu0 %v4500_v13  ;;  %370 = vmatprep.subr.bf16.mxu1 %v4504_v14  ;;  %v4558_v33 = vld [vmem:[#allocation12 + $0x4] ss:$16 sps:$4 sm:$0xff]   ;;  %v4560_v34 = vld [vmem:[#allocation12 + $0xc] ss:$16 sps:$4 sm:$0xff]   ;;  %v126_v35 = vld [vmem:[#allocation2] sm:$0x1] }
  0x68   :  { %v4566_v36 = vld [vmem:[#allocation12] ss:$16 sps:$4 sm:$0xff]   ;;  %v4568_v37 = vld [vmem:[#allocation12 + $0x8] ss:$16 sps:$4 sm:$0xff]   ;;  %v4570_v38 = vld [vmem:[#allocation12 + $0x24] ss:$16 sps:$4 sm:$0xff]  }
  0x69   :  { %v4572_v39 = vld [vmem:[#allocation12 + $0x2c] ss:$16 sps:$4 sm:$0xff]   ;;  %v4578_v40 = vld [vmem:[#allocation12 + $0x20] ss:$16 sps:$4 sm:$0xff]   ;;  %v4580_v41 = vld [vmem:[#allocation12 + $0x28] ss:$16 sps:$4 sm:$0xff]  }
  0x6a   :  { %330 = vmatpush1.bf16.msra.mxu0 %v4506_v15  ;;  %371 = vmatpush1.bf16.msra.mxu1 %v4510_v16  ;;  %v4590_v42 = vld [vmem:[#allocation12 + $0x44] ss:$16 sps:$4 sm:$0xff]   ;;  %v4592_v43 = vld [vmem:[#allocation12 + $0x4c] ss:$16 sps:$4 sm:$0xff]   ;;  %v4596_v44 = vld [vmem:[#allocation12 + $0x40] ss:$16 sps:$4 sm:$0xff]  }
  0x6b   :  { %331 = vmatprep.subr.bf16.mxu0 %v4512_v17  ;;  %372 = vmatprep.subr.bf16.mxu1 %v4516_v18  ;;  %v4598_v45 = vld [vmem:[#allocation12 + $0x48] ss:$16 sps:$4 sm:$0xff]   ;;  %v4602_v46 = vld [vmem:[#allocation12 + $0x64] ss:$16 sps:$4 sm:$0xff]   ;;  %v4604_v47 = vld [vmem:[#allocation12 + $0x6c] ss:$16 sps:$4 sm:$0xff]  }
  0x6c   :  { %6394 = vst [vmem:[#allocation20_spill] sm:$0xff] %v4598_v45  ;;  %6395 = vst [vmem:[#allocation21_spill] sm:$0xff] %v4602_v46  ;;  %v4606_v48 = vld [vmem:[#allocation12 + $0x60] ss:$16 sps:$4 sm:$0xff]   ;;  %v4608_v49 = vld [vmem:[#allocation12 + $0x68] ss:$16 sps:$4 sm:$0xff]  }
  0x6d   :  { %6396 = vst [vmem:[#allocation22_spill] sm:$0xff] %v4604_v47  ;;  %6397 = vst [vmem:[#allocation23_spill] sm:$0xff] %v4606_v48  ;;  %v4614_v50 = vld [vmem:[#allocation12 + $0x84] ss:$16 sps:$4 sm:$0xff]   ;;  %v4616_v51 = vld [vmem:[#allocation12 + $0x8c] ss:$16 sps:$4 sm:$0xff]  }
  0x6e   :  { %332 = vmatpush1.bf16.msra.mxu0 %v4518_v19  ;;  %373 = vmatpush1.bf16.msra.mxu1 %v4520_v20  ;;  %6398 = vst [vmem:[#allocation24_spill] sm:$0xff] %v4608_v49  ;;  %6399 = vst [vmem:[#allocation25_spill] sm:$0xff] %v4614_v50  ;;  %v4618_v52 = vld [vmem:[#allocation12 + $0x80] ss:$16 sps:$4 sm:$0xff]   ;;  %v4620_v53 = vld [vmem:[#allocation12 + $0x88] ss:$16 sps:$4 sm:$0xff]  }
  0x6f   :  { %333 = vmatprep.subr.bf16.mxu0 %v4524_v21  ;;  %374 = vmatprep.subr.bf16.mxu1 %v4528_v22  ;;  %6400 = vst [vmem:[#allocation26_spill] sm:$0xff] %v4616_v51  ;;  %6401 = vst [vmem:[#allocation27_spill] sm:$0xff] %v4618_v52  ;;  %v4626_v54 = vld [vmem:[#allocation12 + $0xa4] ss:$16 sps:$4 sm:$0xff]   ;;  %v4628_v55 = vld [vmem:[#allocation12 + $0xac] ss:$16 sps:$4 sm:$0xff]  }
  0x70   :  { %6402 = vst [vmem:[#allocation28_spill] sm:$0xff] %v4620_v53  ;;  %6403 = vst [vmem:[#allocation29_spill] sm:$0xff] %v4626_v54  ;;  %v4630_v56 = vld [vmem:[#allocation12 + $0xa0] ss:$16 sps:$4 sm:$0xff]   ;;  %v4632_v57 = vld [vmem:[#allocation12 + $0xa8] ss:$16 sps:$4 sm:$0xff]  }
  0x71   :  { %6404 = vst [vmem:[#allocation30_spill] sm:$0xff] %v4628_v55  ;;  %6405 = vst [vmem:[#allocation31_spill] sm:$0xff] %v4630_v56  ;;  %v4638_v58 = vld [vmem:[#allocation12 + $0xc4] ss:$16 sps:$4 sm:$0xff]   ;;  %v4640_v59 = vld [vmem:[#allocation12 + $0xcc] ss:$16 sps:$4 sm:$0xff]  }
  0x72   :  { %334 = vmatpush1.bf16.msra.mxu0 %v4532_v23  ;;  %375 = vmatpush1.bf16.msra.mxu1 %v4534_v24  ;;  %6406 = vst [vmem:[#allocation32_spill] sm:$0xff] %v4632_v57  ;;  %6407 = vst [vmem:[#allocation33_spill] sm:$0xff] %v4638_v58  ;;  %v4642_v60 = vld [vmem:[#allocation12 + $0xc0] ss:$16 sps:$4 sm:$0xff]   ;;  %v4644_v61 = vld [vmem:[#allocation12 + $0xc8] ss:$16 sps:$4 sm:$0xff]  }
  0x73   :  { %335 = vmatprep.subr.bf16.mxu0 %v4538_v25  ;;  %376 = vmatprep.subr.bf16.mxu1 %v4540_v26  ;;  %6408 = vst [vmem:[#allocation34_spill] sm:$0xff] %v4640_v59  ;;  %6409 = vst [vmem:[#allocation35_spill] sm:$0xff] %v4642_v60  ;;  %v4650_v62 = vld [vmem:[#allocation12 + $0xe4] ss:$16 sps:$4 sm:$0xff]   ;;  %v4652_v63 = vld [vmem:[#allocation12 + $0xec] ss:$16 sps:$4 sm:$0xff]  }
  0x74   :  { %6410 = vst [vmem:[#allocation36_spill] sm:$0xff] %v4644_v61  ;;  %6411 = vst [vmem:[#allocation37_spill] sm:$0xff] %v4650_v62  ;;  %s4354_s20 = smov [#allocation15]  }
  0x75   :  { %6412 = vst [vmem:[#allocation38_spill] sm:$0xff] %v4652_v63  ;;  %s3438_s21 = sshll.u32 %s4354_s20, 4  ;;  %s3439_s21 = int_to_ptr.vmem [resolvable:$true] %s3438_s21 }
  0x76   :  { %336 = vmatpush1.bf16.msra.mxu0 %v4542_v27  ;;  %377 = vmatpush1.bf16.msra.mxu1 %v4544_v28  ;;  %s4309_s22 = scalar_lea.vmem %s3439_s21, 32  ;;  %p4314_p13 = scmp.lt.s32.totalorder %s3439_s21, %s3439_s21 }
  0x77   :  { %337 = vmatprep.subr.bf16.mxu0 %v4548_v29  ;;  %378 = vmatprep.subr.bf16.mxu1 %v4552_v30  ;;  %p4310_p12 = scmp.ne.s32.totalorder %s3439_s21, %s4309_s22  ;;  %p4315_p0 = scmp.lt.s32.totalorder %s4309_s22, %s4309_s22 }
  0x79   :  { %p4316_p1 = por %p4315_p0, %p4314_p13 }
  0x7a   :  { %338 = vmatpush1.bf16.msra.mxu0 %v4554_v31  ;;  %379 = vmatpush1.bf16.msra.mxu1 %v4556_v32 }
  0x7b   :  { %681 = vmatprep.subr.bf16.mxu0 %v4558_v33  ;;  %722 = vmatprep.subr.bf16.mxu1 %v4560_v34  ;;  %p4317_p2 = pnand %p4316_p1, %p4310_p12 }
  0x7d   :  { %356 = vmatmul.mubr.bf16.vlgmr.msra.gmra.mrb[0].mxu0 %v126_v35  ;;  %397 = vmatmul.mubr.bf16.vlgmr.msra.gmra.mrb[0].mxu1 %v126_v35  ;;  %v4654_v35 = vld [vmem:[#allocation12 + $0xe0] ss:$16 sps:$4 sm:$0xff]  }
  0x7e   :  { %682 = vmatpush1.bf16.msra.mxu0 %v4566_v36  ;;  %723 = vmatpush1.bf16.msra.mxu1 %v4568_v37  ;;  %6413 = vst [vmem:[#allocation39_spill] sm:$0xff] %v4654_v35 }
  0x7f   :  { %683 = vmatprep.subr.bf16.mxu0 %v4570_v38  ;;  %724 = vmatprep.subr.bf16.mxu1 %v4572_v39 }
  0x80   :  { %713 = vmatprep.mubr.bf16.mxu0 %v6028_v0  ;;  %754 = vmatprep.mubr.bf16.mxu1 %v6028_v0  ;;  %v4656_v0 = vld [vmem:[#allocation12 + $0xe8] ss:$16 sps:$4 sm:$0xff]  }
  0x81   :  { %6414 = vst [vmem:[#allocation40_spill] sm:$0xff] %v4656_v0 }
  0x82   :  { %684 = vmatpush1.bf16.msra.mxu0 %v4578_v40  ;;  %725 = vmatpush1.bf16.msra.mxu1 %v4580_v41 }
  0x83   :  { %685 = vmatprep.subr.bf16.mxu0 %v4590_v42  ;;  %726 = vmatprep.subr.bf16.mxu1 %v4592_v43 }
  0x86   :  { %686 = vmatpush1.bf16.msra.mxu0 %v4596_v44  ;;  %727 = vmatpush1.bf16.msra.mxu1 %v4598_v45 }
  0x87   :  { %687 = vmatprep.subr.bf16.mxu0 %v4602_v46  ;;  %728 = vmatprep.subr.bf16.mxu1 %v4604_v47 }
  0x8a   :  { %688 = vmatpush1.bf16.msra.mxu0 %v4606_v48  ;;  %729 = vmatpush1.bf16.msra.mxu1 %v4608_v49 }
  0x8b   :  { %689 = vmatprep.subr.bf16.mxu0 %v4614_v50  ;;  %730 = vmatprep.subr.bf16.mxu1 %v4616_v51 }
  0x8e   :  { %690 = vmatpush1.bf16.msra.mxu0 %v4618_v52  ;;  %731 = vmatpush1.bf16.msra.mxu1 %v4620_v53 }
  0x8f   :  { %691 = vmatprep.subr.bf16.mxu0 %v4626_v54  ;;  %732 = vmatprep.subr.bf16.mxu1 %v4628_v55  ;;  %v4686_v55 = vld [vmem:[#allocation11 + $0x4c] ss:$16 sps:$4 sm:$0xff]  }
  0x90   :  { %6425 = vst [vmem:[#allocation50_spill] sm:$0xff] %v4686_v55 }
  0x92   :  { %692 = vmatpush1.bf16.msra.mxu0 %v4630_v56  ;;  %733 = vmatpush1.bf16.msra.mxu1 %v4632_v57  ;;  %v4668_v57 = vld [vmem:[#allocation11 + $0x8] ss:$16 sps:$4 sm:$0xff]   ;;  %v6419_v56 = vmov 0  }
  0x93   :  { %693 = vmatprep.subr.bf16.mxu0 %v4638_v58  ;;  %734 = vmatprep.subr.bf16.mxu1 %v4640_v59  ;;  %v128_v59 = vld [vmem:[#allocation4] sm:$0x1]  ;;  %v4666_v58 = vld [vmem:[#allocation11] ss:$16 sps:$4 sm:$0xff]   ;;  %6418 = vst [vmem:[#allocation44_spill] sm:$0xff] %v4668_v57 }
  0x94   :  { %6417 = vst [vmem:[#allocation43_spill] sm:$0xff] %v4666_v58 }
  0x96   :  { %694 = vmatpush1.bf16.msra.mxu0 %v4642_v60  ;;  %735 = vmatpush1.bf16.msra.mxu1 %v4644_v61  ;;  %v4662_v61 = vld [vmem:[#allocation11 + $0x4] ss:$16 sps:$4 sm:$0xff]   ;;  %v4664_v60 = vld [vmem:[#allocation11 + $0xc] ss:$16 sps:$4 sm:$0xff]  }
  0x97   :  { %695 = vmatprep.subr.bf16.mxu0 %v4650_v62  ;;  %736 = vmatprep.subr.bf16.mxu1 %v4652_v63  ;;  %6415 = vst [vmem:[#allocation41_spill] sm:$0xff] %v4662_v61  ;;  %6416 = vst [vmem:[#allocation42_spill] sm:$0xff] %v4664_v60  ;;  %v4682_v63 = vld [vmem:[#allocation11 + $0x28] ss:$16 sps:$4 sm:$0xff]   ;;  %v4684_v62 = vld [vmem:[#allocation11 + $0x44] ss:$16 sps:$4 sm:$0xff]  }
  0x98   :  { %6423 = vst [vmem:[#allocation48_spill] sm:$0xff] %v4682_v63  ;;  %6424 = vst [vmem:[#allocation49_spill] sm:$0xff] %v4684_v62 }
  0x9a   :  { %696 = vmatpush1.bf16.msra.mxu0 %v4654_v35  ;;  %737 = vmatpush1.bf16.msra.mxu1 %v4656_v0  ;;  %v4678_v0 = vld [vmem:[#allocation11 + $0x2c] ss:$16 sps:$4 sm:$0xff]   ;;  %v4680_v35 = vld [vmem:[#allocation11 + $0x20] ss:$16 sps:$4 sm:$0xff]  }
  0x9b   :  { %923 = vmatprep.subr.bf16.mxu0 %v4662_v61  ;;  %964 = vmatprep.subr.bf16.mxu1 %v4664_v60  ;;  %6421 = vst [vmem:[#allocation46_spill] sm:$0xff] %v4678_v0  ;;  %6422 = vst [vmem:[#allocation47_spill] sm:$0xff] %v4680_v35  ;;  %v4698_v60 = vld [vmem:[#allocation11 + $0x64] ss:$16 sps:$4 sm:$0xff]   ;;  %v4700_v61 = vld [vmem:[#allocation11 + $0x6c] ss:$16 sps:$4 sm:$0xff]  }
  0x9c   :  { %6428 = vst [vmem:[#allocation53_spill] sm:$0xff] %v4698_v60  ;;  %6429 = vst [vmem:[#allocation54_spill] sm:$0xff] %v4700_v61 }
  0x9d   :  { %714 = vmatmul.mubr.bf16.vlgmr.msra.gmra.mrb[4].mxu0 %v128_v59  ;;  %755 = vmatmul.mubr.bf16.vlgmr.msra.gmra.mrb[4].mxu1 %v128_v59  ;;  %v4676_v59 = vld [vmem:[#allocation11 + $0x24] ss:$16 sps:$4 sm:$0xff]  }
  0x9e   :  { %955 = vmatprep.mubr.bf16.mxu0 %v6419_v56  ;;  %996 = vmatprep.mubr.bf16.mxu1 %v6419_v56  ;;  %6420 = vst [vmem:[#allocation45_spill] sm:$0xff] %v4676_v59 }
  0x9f   :  { %924 = vmatpush1.bf16.msra.mxu0 %v4666_v58  ;;  %965 = vmatpush1.bf16.msra.mxu1 %v4668_v57  ;;  %v4692_v57 = vld [vmem:[#allocation11 + $0x40] ss:$16 sps:$4 sm:$0xff]   ;;  %v4694_v58 = vld [vmem:[#allocation11 + $0x48] ss:$16 sps:$4 sm:$0xff]  }
  0xa0   :  { %925 = vmatprep.subr.bf16.mxu0 %v4676_v59  ;;  %966 = vmatprep.subr.bf16.mxu1 %v4678_v0  ;;  %6426 = vst [vmem:[#allocation51_spill] sm:$0xff] %v4692_v57  ;;  %6427 = vst [vmem:[#allocation52_spill] sm:$0xff] %v4694_v58  ;;  %v4704_v0 = vld [vmem:[#allocation11 + $0x60] ss:$16 sps:$4 sm:$0xff]  }
  0xa1   :  { %6430 = vst [vmem:[#allocation55_spill] sm:$0xff] %v4704_v0 }
  0xa3   :  { %926 = vmatpush1.bf16.msra.mxu0 %v4680_v35  ;;  %967 = vmatpush1.bf16.msra.mxu1 %v4682_v63  ;;  %v4706_v35 = vld [vmem:[#allocation11 + $0x68] ss:$16 sps:$4 sm:$0xff]   ;;  %v4710_v63 = vld [vmem:[#allocation11 + $0x84] ss:$16 sps:$4 sm:$0xff]  }
  0xa4   :  { %927 = vmatprep.subr.bf16.mxu0 %v4684_v62  ;;  %968 = vmatprep.subr.bf16.mxu1 %v4686_v55  ;;  %6431 = vst [vmem:[#allocation56_spill] sm:$0xff] %v4706_v35  ;;  %6432 = vst [vmem:[#allocation57_spill] sm:$0xff] %v4710_v63  ;;  %v4712_v62 = vld [vmem:[#allocation11 + $0x8c] ss:$16 sps:$4 sm:$0xff]   ;;  %v6078_v55 = vmov 0.0  }
  0xa5   :  { %6433 = vst [vmem:[#allocation58_spill] sm:$0xff] %v4712_v62  ;;  %101 = vst [vmem:[#allocation3] sm:$0x3] %v6078_v55 }
  0xa6   :  { %103 = vst [vmem:[#allocation5] sm:$0x3] %v6078_v55  ;;  %v4730_v55 = vld [vmem:[#allocation11 + $0xa0] ss:$16 sps:$4 sm:$0xff]  }
  0xa7   :  { %928 = vmatpush1.bf16.msra.mxu0 %v4692_v57  ;;  %969 = vmatpush1.bf16.msra.mxu1 %v4694_v58  ;;  %v4718_v58 = vld [vmem:[#allocation11 + $0x80] ss:$16 sps:$4 sm:$0xff]   ;;  %v4720_v57 = vld [vmem:[#allocation11 + $0x88] ss:$16 sps:$4 sm:$0xff]   ;;  %6438 = vst [vmem:[#allocation63_spill] sm:$0xff] %v4730_v55 }
  0xa8   :  { %929 = vmatprep.subr.bf16.mxu0 %v4698_v60  ;;  %970 = vmatprep.subr.bf16.mxu1 %v4700_v61  ;;  %6434 = vst [vmem:[#allocation59_spill] sm:$0xff] %v4718_v58  ;;  %6435 = vst [vmem:[#allocation60_spill] sm:$0xff] %v4720_v57  ;;  %v4724_v61 = vld [vmem:[#allocation11 + $0xa4] ss:$16 sps:$4 sm:$0xff]   ;;  %v4726_v60 = vld [vmem:[#allocation11 + $0xac] ss:$16 sps:$4 sm:$0xff]  }
  0xa9   :  { %6436 = vst [vmem:[#allocation61_spill] sm:$0xff] %v4724_v61  ;;  %6437 = vst [vmem:[#allocation62_spill] sm:$0xff] %v4726_v60 }
  0xab   :  { %930 = vmatpush1.bf16.msra.mxu0 %v4704_v0  ;;  %971 = vmatpush1.bf16.msra.mxu1 %v4706_v35  ;;  %v4732_v0 = vld [vmem:[#allocation11 + $0xa8] ss:$16 sps:$4 sm:$0xff]   ;;  %v4736_v35 = vld [vmem:[#allocation11 + $0xc4] ss:$16 sps:$4 sm:$0xff]  }
  0xac   :  { %931 = vmatprep.subr.bf16.mxu0 %v4710_v63  ;;  %972 = vmatprep.subr.bf16.mxu1 %v4712_v62  ;;  %6439 = vst [vmem:[#allocation64_spill] sm:$0xff] %v4732_v0  ;;  %6440 = vst [vmem:[#allocation65_spill] sm:$0xff] %v4736_v35  ;;  %v4738_v63 = vld [vmem:[#allocation11 + $0xcc] ss:$16 sps:$4 sm:$0xff]   ;;  %v4742_v62 = vld [vmem:[#allocation11 + $0xc0] ss:$16 sps:$4 sm:$0xff]  }
  0xad   :  { %6441 = vst [vmem:[#allocation66_spill] sm:$0xff] %v4738_v63  ;;  %6442 = vst [vmem:[#allocation67_spill] sm:$0xff] %v4742_v62 }
  0xaf   :  { %932 = vmatpush1.bf16.msra.mxu0 %v4718_v58  ;;  %973 = vmatpush1.bf16.msra.mxu1 %v4720_v57  ;;  %v4744_v58 = vld [vmem:[#allocation11 + $0xc8] ss:$16 sps:$4 sm:$0xff]   ;;  %v4748_v57 = vld [vmem:[#allocation11 + $0xe4] ss:$16 sps:$4 sm:$0xff]  }
  0xb0   :  { %933 = vmatprep.subr.bf16.mxu0 %v4724_v61  ;;  %974 = vmatprep.subr.bf16.mxu1 %v4726_v60  ;;  %6443 = vst [vmem:[#allocation68_spill] sm:$0xff] %v4744_v58  ;;  %6444 = vst [vmem:[#allocation69_spill] sm:$0xff] %v4748_v57  ;;  %v4750_v61 = vld [vmem:[#allocation11 + $0xec] ss:$16 sps:$4 sm:$0xff]   ;;  %v4754_v60 = vld [vmem:[#allocation11 + $0xe0] ss:$16 sps:$4 sm:$0xff]  }
  0xb1   :  { %6445 = vst [vmem:[#allocation70_spill] sm:$0xff] %v4750_v61  ;;  %6446 = vst [vmem:[#allocation71_spill] sm:$0xff] %v4754_v60 }
  0xb3   :  { %934 = vmatpush1.bf16.msra.mxu0 %v4730_v55  ;;  %975 = vmatpush1.bf16.msra.mxu1 %v4732_v0  ;;  %v4756_v55 = vld [vmem:[#allocation11 + $0xe8] ss:$16 sps:$4 sm:$0xff]  }
  0xb4   :  { %935 = vmatprep.subr.bf16.mxu0 %v4736_v35  ;;  %976 = vmatprep.subr.bf16.mxu1 %v4738_v63  ;;  %6447 = vst [vmem:[#allocation72_spill] sm:$0xff] %v4756_v55  ;;  %v106_v63 = vlaneseq }
  0xb7   :  { %936 = vmatpush1.bf16.msra.mxu0 %v4742_v62  ;;  %977 = vmatpush1.bf16.msra.mxu1 %v4744_v58  ;;  %v4352_v62 = vmov 1983009808   ;;  %v4764_v58 = vshrl.u32 %v106_v63, 7  ;;  %v130_v63 = vld [vmem:[#allocation6] sm:$0xff] }
  0xb8   :  { %937 = vmatprep.subr.bf16.mxu0 %v4748_v57  ;;  %978 = vmatprep.subr.bf16.mxu1 %v4750_v61  ;;  %v412_v35 = vunpack.c.l.s4 %v4352_v62 }
  0xb9   :  { %6448 = vst [vmem:[#allocation73_spill] sm:$0xff] %v4764_v58 }
  0xba   :  { %v413_v0 = vunpack.c.0.s8 %v412_v35 }
  0xbb   :  { %938 = vmatpush1.bf16.msra.mxu0 %v4754_v60  ;;  %979 = vmatpush1.bf16.msra.mxu1 %v4756_v55 }
  0xbc   :  { %1033 = vmatprep.subr.bf16.mxu0 %v4468_v1  ;;  %1074 = vmatprep.subr.bf16.mxu1 %v4470_v2  ;;  %v4767_v57 = vsub.s32 %v413_v0, %v4764_v58 }
 0x150   :  { %v357_v59 = vpop.f32.mrb[0].mxu0  ;;  %v398_v54 = vpop.f32.mrb[0].mxu1 }
 0x151   :  { %v359_v61 = vpop.f32.mrb[1].mxu0  ;;  %v400_v53 = vpop.f32.mrb[1].mxu1 }
 0x152   :  { %v409_v60 = vcombine.low %v357_v59, %v359_v61  ;;  %v410_v52 = vcombine.low %v398_v54, %v400_v53  ;;  %v361_v55 = vpop.f32.mrb[2].mxu0  ;;  %v402_v51 = vpop.f32.mrb[2].mxu1  ;;  %v127_v59 = vld [vmem:[#allocation3] sm:$0x3] }
 0x153   :  { %v362_v1 = vpop.f32.mrb[3].mxu0  ;;  %v403_v50 = vpop.f32.mrb[3].mxu1 }
 0x154   :  { %v417_v2 = vrot.slane %v409_v60, %v4767_v57  ;;  %v424_v62 = vrot.slane %v410_v52, %v4767_v57 }
 0x156   :  { %v425_v49 = vcombine.low %v417_v2, %v424_v62 }
 0x158   :  { %v427_v35 = vadd.f32 %v425_v49, %v130_v63 }
 0x15a   :  { %v428_v48 = vsub.f32 0.0, %v427_v35  ;;  %v434_v47 = vrot.slane %v427_v35, 2  ;;  %v444_v45 = vrot.slane %v427_v35, 6  ;;  %v441_v55 = vrot.slane %v427_v35, 4 }
 0x15c   :  { %v429_v46 = vmul.f32 1.442695, %v428_v48  ;;  %v436_v0 = vsub.f32 0.0, %v434_v47  ;;  %v446_v53 = vsub.f32 0.0, %v444_v45 }
 0x15e   :  { %3751 = vpow2.f32 %v429_v46  ;;  %v437_v58 = vmul.f32 1.442695, %v436_v0  ;;  %v447_v54 = vmul.f32 1.442695, %v446_v53 }
 0x160   :  { %3753 = vpow2.f32 %v437_v58 }
 0x161   :  { %3755 = vpow2.f32 %v447_v54 }
 0x168   :  { %v3752_v51 = vpop.eup %3751 }
 0x169   :  { %v431_v50 = vadd.f32 1.0, %v3752_v51 }
 0x16a   :  { %v3754_v61 = vpop.eup %3753 }
 0x16b   :  { %3757 = vrcp.f32 %v431_v50  ;;  %v439_v52 = vadd.f32 1.0, %v3754_v61  ;;  %v3756_v49 = vpop.eup %3755 }
 0x16c   :  { %3759 = vtanh.f32 %v441_v55  ;;  %v449_v46 = vadd.f32 1.0, %v3756_v49 }
 0x16d   :  { %3761 = vrcp.f32 %v439_v52 }
 0x16e   :  { %3763 = vrcp.f32 %v449_v46 }
 0x175   :  { %v3758_v60 = vpop.eup %3757 }
 0x176   :  { %v3760_v48 = vpop.eup %3759 }
 0x177   :  { %v3762_v47 = vpop.eup %3761  ;;  %v452_v2 = vmul.f32 %v3760_v48, %v3758_v60 }
 0x178   :  { %v451_v1 = vmul.f32 %v3762_v47, %v127_v59  ;;  %v3764_v45 = vpop.eup %3763 }
 0x17a   :  { %v4771_v58 = vadd.f32 %v452_v2, %v451_v1 }
 0x17c   :  { %3765 = vtanh.f32 %v4771_v58 }
 0x186   :  { %v3766_v62 = vpop.eup %3765 }
 0x187   :  { %v455_v63 = vmul.f32 %v3766_v62, %v3764_v45 }
 0x189   :  { %v456_v35 = vpack.c.bf16 %v455_v63, %v455_v63 }
 0x18b   :  { %956 = vmatmul.mubr.bf16.vlgmr.msra.gmra.mrb[8].mxu0 %v456_v35  ;;  %997 = vmatmul.mubr.bf16.vlgmr.msra.gmra.mrb[8].mxu1 %v456_v35 }
 0x18c   :  { %1034 = vmatpush1.bf16.msra.mxu0 %v4473_v3  ;;  %1075 = vmatpush1.bf16.msra.mxu1 %v4475_v4  ;;  %v6449_v3 = vld [vmem:[#allocation20_spill] sm:$0xff]  ;;  %v6450_v4 = vld [vmem:[#allocation21_spill] sm:$0xff] }
 0x18d   :  { %1035 = vmatprep.subr.bf16.mxu0 %v4478_v5  ;;  %1076 = vmatprep.subr.bf16.mxu1 %v4482_v6  ;;  %v6451_v5 = vld [vmem:[#allocation22_spill] sm:$0xff]  ;;  %v6452_v6 = vld [vmem:[#allocation23_spill] sm:$0xff] }
 0x18e   :  { %1065 = vmatprep.mubr.bf16.mxu0 %v6419_v56  ;;  %1106 = vmatprep.mubr.bf16.mxu1 %v6419_v56 }
 0x190   :  { %1036 = vmatpush1.bf16.msra.mxu0 %v4484_v7  ;;  %1077 = vmatpush1.bf16.msra.mxu1 %v4487_v8  ;;  %v6453_v7 = vld [vmem:[#allocation24_spill] sm:$0xff]  ;;  %v6454_v8 = vld [vmem:[#allocation25_spill] sm:$0xff] }
 0x191   :  { %1037 = vmatprep.subr.bf16.mxu0 %v4490_v9  ;;  %1078 = vmatprep.subr.bf16.mxu1 %v4492_v10  ;;  %v6455_v9 = vld [vmem:[#allocation26_spill] sm:$0xff]  ;;  %v715_v10 = vpop.f32.mrb[4].mxu0 }
 0x194   :  { %1038 = vmatpush1.bf16.msra.mxu0 %v4494_v11  ;;  %1079 = vmatpush1.bf16.msra.mxu1 %v4496_v12  ;;  %v756_v11 = vpop.f32.mrb[4].mxu1  ;;  %v6456_v12 = vld [vmem:[#allocation27_spill] sm:$0xff] }
 0x195   :  { %1039 = vmatprep.subr.bf16.mxu0 %v4500_v13  ;;  %1080 = vmatprep.subr.bf16.mxu1 %v4504_v14  ;;  %v6457_v13 = vld [vmem:[#allocation28_spill] sm:$0xff]  ;;  %v717_v14 = vpop.f32.mrb[5].mxu0 }
 0x198   :  { %1040 = vmatpush1.bf16.msra.mxu0 %v4506_v15  ;;  %1081 = vmatpush1.bf16.msra.mxu1 %v4510_v16  ;;  %v758_v15 = vpop.f32.mrb[5].mxu1  ;;  %v6458_v16 = vld [vmem:[#allocation29_spill] sm:$0xff] }
 0x199   :  { %1041 = vmatprep.subr.bf16.mxu0 %v4512_v17  ;;  %1082 = vmatprep.subr.bf16.mxu1 %v4516_v18  ;;  %v6459_v17 = vld [vmem:[#allocation30_spill] sm:$0xff]  ;;  %v719_v18 = vpop.f32.mrb[6].mxu0 }
 0x19c   :  { %1042 = vmatpush1.bf16.msra.mxu0 %v4518_v19  ;;  %1083 = vmatpush1.bf16.msra.mxu1 %v4520_v20  ;;  %v760_v19 = vpop.f32.mrb[6].mxu1  ;;  %v720_v20 = vpop.f32.mrb[7].mxu0 }
 0x19d   :  { %1043 = vmatprep.subr.bf16.mxu0 %v4524_v21  ;;  %1084 = vmatprep.subr.bf16.mxu1 %v4528_v22  ;;  %v761_v21 = vpop.f32.mrb[7].mxu1  ;;  %v6460_v22 = vld [vmem:[#allocation31_spill] sm:$0xff] }
 0x1a0   :  { %1044 = vmatpush1.bf16.msra.mxu0 %v4532_v23  ;;  %1085 = vmatpush1.bf16.msra.mxu1 %v4534_v24  ;;  %v6461_v23 = vld [vmem:[#allocation32_spill] sm:$0xff]  ;;  %v6462_v24 = vld [vmem:[#allocation33_spill] sm:$0xff] }
 0x1a1   :  { %1045 = vmatprep.subr.bf16.mxu0 %v4538_v25  ;;  %1086 = vmatprep.subr.bf16.mxu1 %v4540_v26  ;;  %v6463_v25 = vld [vmem:[#allocation34_spill] sm:$0xff]  ;;  %v6464_v26 = vld [vmem:[#allocation35_spill] sm:$0xff] }
 0x1a4   :  { %1046 = vmatpush1.bf16.msra.mxu0 %v4542_v27  ;;  %1087 = vmatpush1.bf16.msra.mxu1 %v4544_v28  ;;  %v6465_v27 = vld [vmem:[#allocation36_spill] sm:$0xff]  ;;  %v6466_v28 = vld [vmem:[#allocation37_spill] sm:$0xff] }
 0x1a5   :  { %1047 = vmatprep.subr.bf16.mxu0 %v4548_v29  ;;  %1088 = vmatprep.subr.bf16.mxu1 %v4552_v30  ;;  %v6467_v29 = vld [vmem:[#allocation38_spill] sm:$0xff]  ;;  %v6468_v30 = vld [vmem:[#allocation39_spill] sm:$0xff] }
 0x1a8   :  { %1048 = vmatpush1.bf16.msra.mxu0 %v4554_v31  ;;  %1089 = vmatpush1.bf16.msra.mxu1 %v4556_v32  ;;  %v6469_v31 = vld [vmem:[#allocation40_spill] sm:$0xff]  ;;  %v6470_v32 = vld [vmem:[#allocation41_spill] sm:$0xff] }
 0x1a9   :  { %1167 = vmatprep.subr.bf16.mxu0 %v4558_v33  ;;  %1208 = vmatprep.subr.bf16.mxu1 %v4560_v34  ;;  %v6471_v33 = vld [vmem:[#allocation42_spill] sm:$0xff]  ;;  %v6472_v34 = vld [vmem:[#allocation73_spill] sm:$0xff] }
 0x1aa   :  { %v120_v51 = vsub.s32 3, %v6472_v34 }
 0x1ab   :  { %1066 = vmatmul.mubr.bf16.vlgmr.msra.gmra.mrb[12].mxu0 %v456_v35  ;;  %1107 = vmatmul.mubr.bf16.vlgmr.msra.gmra.mrb[12].mxu1 %v456_v35 }
 0x1ac   :  { %1168 = vmatpush1.bf16.msra.mxu0 %v4566_v36  ;;  %1209 = vmatpush1.bf16.msra.mxu1 %v4568_v37  ;;  %v108_v36 = vsub.s32 0, %v6472_v34  ;;  %v104_v37 = vld [vmem:[%s6024_s4] sm:$0xf] }
 0x1ad   :  { %1169 = vmatprep.subr.bf16.mxu0 %v4570_v38  ;;  %1210 = vmatprep.subr.bf16.mxu1 %v4572_v39  ;;  %v112_v38 = vsub.s32 1, %v6472_v34  ;;  %v4854_v45 = vrot.slane %v104_v37, %v120_v51 }
 0x1ae   :  { %1199 = vmatprep.mubr.bf16.mxu0 %v6419_v56  ;;  %1240 = vmatprep.mubr.bf16.mxu1 %v6419_v56  ;;  %v4847_v39 = vrot.slane %v104_v37, %v108_v36 }
 0x1af   :  { %v4849_v54 = vrot.slane %v104_v37, %v112_v38 }
 0x1b0   :  { %1170 = vmatpush1.bf16.msra.mxu0 %v4578_v40  ;;  %1211 = vmatpush1.bf16.msra.mxu1 %v4580_v41 }
 0x1b1   :  { %1171 = vmatprep.subr.bf16.mxu0 %v4590_v42  ;;  %1212 = vmatprep.subr.bf16.mxu1 %v4592_v43 }
 0x1b4   :  { %1172 = vmatpush1.bf16.msra.mxu0 %v4596_v44  ;;  %1213 = vmatpush1.bf16.msra.mxu1 %v6449_v3 }
 0x1b5   :  { %1173 = vmatprep.subr.bf16.mxu0 %v6450_v4  ;;  %1214 = vmatprep.subr.bf16.mxu1 %v6451_v5 }
 0x1b8   :  { %1174 = vmatpush1.bf16.msra.mxu0 %v6452_v6  ;;  %1215 = vmatpush1.bf16.msra.mxu1 %v6453_v7 }
 0x1b9   :  { %1175 = vmatprep.subr.bf16.mxu0 %v6454_v8  ;;  %1216 = vmatprep.subr.bf16.mxu1 %v6455_v9 }
 0x1bc   :  { %1176 = vmatpush1.bf16.msra.mxu0 %v6456_v12  ;;  %1217 = vmatpush1.bf16.msra.mxu1 %v6457_v13 }
 0x1bd   :  { %1177 = vmatprep.subr.bf16.mxu0 %v6458_v16  ;;  %1218 = vmatprep.subr.bf16.mxu1 %v6459_v17 }
 0x1c0   :  { %1178 = vmatpush1.bf16.msra.mxu0 %v6460_v22  ;;  %1219 = vmatpush1.bf16.msra.mxu1 %v6461_v23 }
 0x1c1   :  { %1179 = vmatprep.subr.bf16.mxu0 %v6462_v24  ;;  %1220 = vmatprep.subr.bf16.mxu1 %v6463_v25 }
 0x1c4   :  { %1180 = vmatpush1.bf16.msra.mxu0 %v6464_v26  ;;  %1221 = vmatpush1.bf16.msra.mxu1 %v6465_v27 }
 0x1c5   :  { %1181 = vmatprep.subr.bf16.mxu0 %v6466_v28  ;;  %1222 = vmatprep.subr.bf16.mxu1 %v6467_v29 }
 0x1c8   :  { %1182 = vmatpush1.bf16.msra.mxu0 %v6468_v30  ;;  %1223 = vmatpush1.bf16.msra.mxu1 %v6469_v31 }
 0x1c9   :  { %1249 = vmatprep.subr.bf16.mxu0 %v6470_v32  ;;  %1290 = vmatprep.subr.bf16.mxu1 %v6471_v33 }
 0x25e   :  { %v957_v0 = vpop.f32.mrb[8].mxu0  ;;  %v998_v53 = vpop.f32.mrb[8].mxu1 }
 0x25f   :  { %v958_v55 = vadd.f32 %v957_v0, %v715_v10  ;;  %v999_v50 = vadd.f32 %v998_v53, %v756_v11  ;;  %v959_v61 = vpop.f32.mrb[9].mxu0  ;;  %v1000_v52 = vpop.f32.mrb[9].mxu1  ;;  %v116_v11 = vsub.s32 2, %v6472_v34 }
 0x260   :  { %v960_v49 = vadd.f32 %v959_v61, %v717_v14  ;;  %v1001_v60 = vadd.f32 %v1000_v52, %v758_v15  ;;  %v961_v59 = vpop.f32.mrb[10].mxu0  ;;  %v1002_v48 = vpop.f32.mrb[10].mxu1 }
 0x261   :  { %v1005_v47 = vadd.f32 %v958_v55, %v4847_v39  ;;  %v962_v46 = vpop.f32.mrb[11].mxu0  ;;  %v1003_v1 = vpop.f32.mrb[11].mxu1  ;;  %v4858_v15 = vrot.slane %v104_v37, %v116_v11  ;;  %v129_v55 = vld [vmem:[#allocation5] sm:$0x3]  ;;  %v1032_v11 = vld [vmem:[#allocation6 + $0x8] sm:$0xff] }
 0x262   :  { %v1006_v2 = vadd.f32 %v960_v49, %v4849_v54  ;;  %v1008_v10 = vadd.f32 %v1001_v60, %v4854_v45 }
 0x263   :  { %v1009_v62 = vsub.f32 0.0, %v1005_v47  ;;  %v1007_v20 = vadd.f32 %v999_v50, %v4858_v15 }
 0x264   :  { %v1014_v63 = vsub.f32 0.0, %v1006_v2  ;;  %v1020_v14 = vsub.f32 0.0, %v1008_v10 }
 0x265   :  { %v1010_v35 = vmul.f32 1.442695, %v1009_v62 }
 0x266   :  { %v1015_v18 = vmul.f32 1.442695, %v1014_v63  ;;  %v1021_v19 = vmul.f32 1.442695, %v1020_v14 }
 0x267   :  { %3767 = vpow2.f32 %v1010_v35 }
 0x268   :  { %3769 = vpow2.f32 %v1015_v18 }
 0x269   :  { %3771 = vpow2.f32 %v1021_v19 }
 0x26a   :  { %3773 = vtanh.f32 %v1007_v20 }
 0x271   :  { %v3768_v21 = vpop.eup %3767 }
 0x272   :  { %v3770_v36 = vpop.eup %3769  ;;  %v1012_v38 = vadd.f32 1.0, %v3768_v21 }
 0x273   :  { %v1017_v0 = vadd.f32 1.0, %v3770_v36  ;;  %v3772_v53 = vpop.eup %3771 }
 0x274   :  { %3775 = vrcp.f32 %v1012_v38  ;;  %v3774_v51 = vpop.eup %3773  ;;  %v1023_v60 = vadd.f32 1.0, %v3772_v53 }
 0x275   :  { %3777 = vrcp.f32 %v1017_v0 }
 0x276   :  { %3779 = vrcp.f32 %v1023_v60  ;;  %v6474_v60 = vld [vmem:[#allocation44_spill] sm:$0xff] }
 0x27e   :  { %v3776_v61 = vpop.eup %3775  ;;  %v1067_v34 = vpop.f32.mrb[12].mxu0 }
 0x27f   :  { %v1108_v52 = vpop.f32.mrb[12].mxu1  ;;  %v3778_v49 = vpop.eup %3777  ;;  %v1026_v37 = vmul.f32 %v3776_v61, %v3774_v51 }
 0x280   :  { %v1069_v59 = vpop.f32.mrb[13].mxu0  ;;  %v1110_v48 = vpop.f32.mrb[13].mxu1  ;;  %v1025_v50 = vmul.f32 %v3778_v49, %v129_v55 }
 0x281   :  { %v1119_v47 = vcombine.low %v1067_v34, %v1069_v59  ;;  %v1120_v46 = vcombine.low %v1108_v52, %v1110_v48  ;;  %v1071_v1 = vpop.f32.mrb[14].mxu0  ;;  %v1112_v2 = vpop.f32.mrb[14].mxu1  ;;  %v6475_v59 = vld [vmem:[#allocation45_spill] sm:$0xff]  ;;  %v6476_v48 = vld [vmem:[#allocation46_spill] sm:$0xff] }
 0x282   :  { %v1072_v62 = vpop.f32.mrb[15].mxu0  ;;  %v1113_v63 = vpop.f32.mrb[15].mxu1  ;;  %v4861_v35 = vadd.f32 %v1026_v37, %v1025_v50  ;;  %v6473_v37 = vld [vmem:[#allocation43_spill] sm:$0xff] }
 0x283   :  { %v1127_v18 = vrot.slane %v1119_v47, %v4767_v57  ;;  %v1134_v10 = vrot.slane %v1120_v46, %v4767_v57  ;;  %v3780_v51 = vpop.eup %3779  ;;  %v6477_v2 = vld [vmem:[#allocation47_spill] sm:$0xff]  ;;  %v6478_v62 = vld [vmem:[#allocation48_spill] sm:$0xff] }
 0x284   :  { %3781 = vtanh.f32 %v4861_v35 }
 0x285   :  { %v1135_v14 = vcombine.low %v1127_v18, %v1134_v10  ;;  %v6479_v18 = vld [vmem:[#allocation49_spill] sm:$0xff]  ;;  %v6480_v10 = vld [vmem:[#allocation50_spill] sm:$0xff] }
 0x287   :  { %v1137_v19 = vadd.f32 %v1135_v14, %v1032_v11  ;;  %v6481_v11 = vld [vmem:[#allocation51_spill] sm:$0xff]  ;;  %v6482_v14 = vld [vmem:[#allocation52_spill] sm:$0xff] }
 0x289   :  { %v1138_v20 = vsub.f32 0.0, %v1137_v19  ;;  %v1144_v21 = vrot.slane %v1137_v19, 2  ;;  %v1154_v53 = vrot.slane %v1137_v19, 6  ;;  %v1151_v47 = vrot.slane %v1137_v19, 4  ;;  %v6483_v19 = vld [vmem:[#allocation53_spill] sm:$0xff] }
 0x28b   :  { %v1139_v36 = vmul.f32 1.442695, %v1138_v20  ;;  %v1146_v38 = vsub.f32 0.0, %v1144_v21  ;;  %v1156_v34 = vsub.f32 0.0, %v1154_v53  ;;  %v6484_v20 = vld [vmem:[#allocation54_spill] sm:$0xff]  ;;  %v6485_v21 = vld [vmem:[#allocation55_spill] sm:$0xff] }
 0x28d   :  { %3783 = vpow2.f32 %v1139_v36  ;;  %v1147_v0 = vmul.f32 1.442695, %v1146_v38  ;;  %v1157_v49 = vmul.f32 1.442695, %v1156_v34  ;;  %v6486_v36 = vld [vmem:[#allocation56_spill] sm:$0xff]  ;;  %v6487_v38 = vld [vmem:[#allocation57_spill] sm:$0xff] }
 0x28e   :  { %v3782_v55 = vpop.eup %3781  ;;  %v6490_v34 = vld [vmem:[#allocation60_spill] sm:$0xff] }
 0x28f   :  { %3785 = vpow2.f32 %v1147_v0  ;;  %v1029_v61 = vmul.f32 %v3782_v55, %v3780_v51  ;;  %v6488_v0 = vld [vmem:[#allocation58_spill] sm:$0xff] }
 0x290   :  { %3787 = vpow2.f32 %v1157_v49 }
 0x291   :  { %v1030_v52 = vpack.c.bf16 %v1029_v61, %v1029_v61  ;;  %v6489_v61 = vld [vmem:[#allocation59_spill] sm:$0xff] }
 0x293   :  { %1200 = vmatmul.mubr.bf16.vlgmr.msra.gmra.mrb[16].mxu0 %v1030_v52  ;;  %1241 = vmatmul.mubr.bf16.vlgmr.msra.gmra.mrb[16].mxu1 %v1030_v52 }
 0x294   :  { %1250 = vmatpush1.bf16.msra.mxu0 %v6473_v37  ;;  %1291 = vmatpush1.bf16.msra.mxu1 %v6474_v60 }
 0x295   :  { %1251 = vmatprep.subr.bf16.mxu0 %v6475_v59  ;;  %1292 = vmatprep.subr.bf16.mxu1 %v6476_v48 }
 0x296   :  { %1281 = vmatprep.mubr.bf16.mxu0 %v6419_v56  ;;  %1322 = vmatprep.mubr.bf16.mxu1 %v6419_v56 }
 0x297   :  { %v3784_v50 = vpop.eup %3783 }
 0x298   :  { %v1141_v46 = vadd.f32 1.0, %v3784_v50  ;;  %1252 = vmatpush1.bf16.msra.mxu0 %v6477_v2  ;;  %1293 = vmatpush1.bf16.msra.mxu1 %v6478_v62  ;;  %v6491_v50 = vld [vmem:[#allocation61_spill] sm:$0xff] }
 0x299   :  { %v3786_v1 = vpop.eup %3785  ;;  %1253 = vmatprep.subr.bf16.mxu0 %v6479_v18  ;;  %1294 = vmatprep.subr.bf16.mxu1 %v6480_v10 }
 0x29a   :  { %3789 = vrcp.f32 %v1141_v46  ;;  %v1149_v63 = vadd.f32 1.0, %v3786_v1  ;;  %v3788_v53 = vpop.eup %3787 }
 0x29b   :  { %3791 = vtanh.f32 %v1151_v47  ;;  %v1159_v49 = vadd.f32 1.0, %v3788_v53  ;;  %v6492_v47 = vld [vmem:[#allocation62_spill] sm:$0xff]  ;;  %v6497_v53 = vld [vmem:[#allocation67_spill] sm:$0xff] }
 0x29c   :  { %3793 = vrcp.f32 %v1149_v63  ;;  %1254 = vmatpush1.bf16.msra.mxu0 %v6481_v11  ;;  %1295 = vmatpush1.bf16.msra.mxu1 %v6482_v14  ;;  %v6493_v63 = vld [vmem:[#allocation63_spill] sm:$0xff] }
 0x29d   :  { %1255 = vmatprep.subr.bf16.mxu0 %v6483_v19  ;;  %1296 = vmatprep.subr.bf16.mxu1 %v6484_v20  ;;  %3795 = vrcp.f32 %v1159_v49 }
 0x2a0   :  { %1256 = vmatpush1.bf16.msra.mxu0 %v6485_v21  ;;  %1297 = vmatpush1.bf16.msra.mxu1 %v6486_v36  ;;  %v6495_v36 = vld [vmem:[#allocation65_spill] sm:$0xff] }
 0x2a1   :  { %1257 = vmatprep.subr.bf16.mxu0 %v6487_v38  ;;  %1298 = vmatprep.subr.bf16.mxu1 %v6488_v0  ;;  %v6494_v38 = vld [vmem:[#allocation64_spill] sm:$0xff] }
 0x2a4   :  { %v3790_v51 = vpop.eup %3789  ;;  %1258 = vmatpush1.bf16.msra.mxu0 %v6489_v61  ;;  %1299 = vmatpush1.bf16.msra.mxu1 %v6490_v34  ;;  %v6496_v61 = vld [vmem:[#allocation66_spill] sm:$0xff] }
 0x2a5   :  { %v3792_v55 = vpop.eup %3791  ;;  %1259 = vmatprep.subr.bf16.mxu0 %v6491_v50  ;;  %1300 = vmatprep.subr.bf16.mxu1 %v6492_v47  ;;  %v6498_v50 = vld [vmem:[#allocation68_spill] sm:$0xff]  ;;  %v6499_v47 = vld [vmem:[#allocation69_spill] sm:$0xff] }
 0x2a6   :  { %v3794_v52 = vpop.eup %3793  ;;  %v1162_v1 = vmul.f32 %v3792_v55, %v3790_v51  ;;  %v6501_v51 = vld [vmem:[#allocation71_spill] sm:$0xff]  ;;  %v6502_v55 = vld [vmem:[#allocation72_spill] sm:$0xff] }
 0x2a7   :  { %v1161_v46 = vmul.f32 %v3794_v52, %v4771_v58  ;;  %v6500_v58 = vld [vmem:[#allocation70_spill] sm:$0xff]  ;;  %v3796_v49 = vpop.eup %3795 }
 0x2a8   :  { %1260 = vmatpush1.bf16.msra.mxu0 %v6493_v63  ;;  %1301 = vmatpush1.bf16.msra.mxu1 %v6494_v38  ;;  %v4902_v52 = vld [vmem:[#allocation9 + $0x4] ss:$16 sps:$4 sm:$0xff]  }
 0x2a9   :  { %v4891_v0 = vadd.f32 %v1162_v1, %v1161_v46  ;;  %1261 = vmatprep.subr.bf16.mxu0 %v6495_v36  ;;  %1302 = vmatprep.subr.bf16.mxu1 %v6496_v61  ;;  %6503 = vst [vmem:[#allocation20_spill] sm:$0xff] %v4902_v52  ;;  %v4905_v46 = vld [vmem:[#allocation9 + $0xc] ss:$16 sps:$4 sm:$0xff]  }
 0x2aa   :  { %6504 = vst [vmem:[#allocation21_spill] sm:$0xff] %v4905_v46 }
 0x2ab   :  { %3797 = vtanh.f32 %v4891_v0 }
 0x2ac   :  { %1262 = vmatpush1.bf16.msra.mxu0 %v6497_v53  ;;  %1303 = vmatpush1.bf16.msra.mxu1 %v6498_v50 }
 0x2ad   :  { %1263 = vmatprep.subr.bf16.mxu0 %v6499_v47  ;;  %1304 = vmatprep.subr.bf16.mxu1 %v6500_v58 }
 0x2b0   :  { %1264 = vmatpush1.bf16.msra.mxu0 %v6501_v51  ;;  %1305 = vmatpush1.bf16.msra.mxu1 %v6502_v55  ;;  %v4912_v51 = vld [vmem:[#allocation9] ss:$16 sps:$4 sm:$0xff]   ;;  %v4915_v55 = vld [vmem:[#allocation9 + $0x8] ss:$16 sps:$4 sm:$0xff]  }
 0x2b1   :  { %1359 = vmatprep.subr.bf16.mxu0 %v4902_v52  ;;  %1400 = vmatprep.subr.bf16.mxu1 %v4905_v46  ;;  %6505 = vst [vmem:[#allocation22_spill] sm:$0xff] %v4915_v55  ;;  %v4918_v52 = vld [vmem:[#allocation9 + $0x24] ss:$16 sps:$4 sm:$0xff]   ;;  %v4921_v46 = vld [vmem:[#allocation9 + $0x2c] ss:$16 sps:$4 sm:$0xff]  }
 0x2b2   :  { %6506 = vst [vmem:[#allocation23_spill] sm:$0xff] %v4918_v52  ;;  %6507 = vst [vmem:[#allocation24_spill] sm:$0xff] %v4921_v46 }
 0x2b5   :  { %v3798_v1 = vpop.eup %3797 }
 0x2b6   :  { %v1165_v53 = vmul.f32 %v3798_v1, %v3796_v49  ;;  %v4929_v49 = vld [vmem:[#allocation9 + $0x28] ss:$16 sps:$4 sm:$0xff]   ;;  %v4932_v1 = vld [vmem:[#allocation9 + $0x44] ss:$16 sps:$4 sm:$0xff]  }
 0x2b7   :  { %6509 = vst [vmem:[#allocation26_spill] sm:$0xff] %v4929_v49  ;;  %6510 = vst [vmem:[#allocation27_spill] sm:$0xff] %v4932_v1 }
 0x2b8   :  { %v4908_v50 = vpack.c.bf16 %v1165_v53, %v1165_v53  ;;  %v4926_v53 = vld [vmem:[#allocation9 + $0x20] ss:$16 sps:$4 sm:$0xff]  }
 0x2b9   :  { %6508 = vst [vmem:[#allocation25_spill] sm:$0xff] %v4926_v53 }
 0x2ba   :  { %1282 = vmatmul.mubr.bf16.vlgmr.msra.gmra.mrb[20].mxu0 %v4908_v50  ;;  %1323 = vmatmul.mubr.bf16.vlgmr.msra.gmra.mrb[20].mxu1 %v4908_v50 }
 0x2bb   :  { %1360 = vmatpush1.bf16.msra.mxu0 %v4912_v51  ;;  %1401 = vmatpush1.bf16.msra.mxu1 %v4915_v55  ;;  %v4941_v55 = vld [vmem:[#allocation9 + $0x48] ss:$16 sps:$4 sm:$0xff]  }
 0x2bc   :  { %1361 = vmatprep.subr.bf16.mxu0 %v4918_v52  ;;  %1402 = vmatprep.subr.bf16.mxu1 %v4921_v46  ;;  %v4935_v52 = vld [vmem:[#allocation9 + $0x4c] ss:$16 sps:$4 sm:$0xff]   ;;  %v4938_v46 = vld [vmem:[#allocation9 + $0x40] ss:$16 sps:$4 sm:$0xff]   ;;  %6513 = vst [vmem:[#allocation30_spill] sm:$0xff] %v4941_v55 }
 0x2bd   :  { %1391 = vmatprep.mubr.bf16.mxu0 %v6419_v56  ;;  %1432 = vmatprep.mubr.bf16.mxu1 %v6419_v56  ;;  %6511 = vst [vmem:[#allocation28_spill] sm:$0xff] %v4935_v52  ;;  %6512 = vst [vmem:[#allocation29_spill] sm:$0xff] %v4938_v46 }
 0x2bf   :  { %1362 = vmatpush1.bf16.msra.mxu0 %v4926_v53  ;;  %1403 = vmatpush1.bf16.msra.mxu1 %v4929_v49  ;;  %v4944_v53 = vld [vmem:[#allocation9 + $0x64] ss:$16 sps:$4 sm:$0xff]   ;;  %v4947_v49 = vld [vmem:[#allocation9 + $0x6c] ss:$16 sps:$4 sm:$0xff]  }
 0x2c0   :  { %1363 = vmatprep.subr.bf16.mxu0 %v4932_v1  ;;  %1404 = vmatprep.subr.bf16.mxu1 %v4935_v52  ;;  %6514 = vst [vmem:[#allocation31_spill] sm:$0xff] %v4944_v53  ;;  %6515 = vst [vmem:[#allocation32_spill] sm:$0xff] %v4947_v49  ;;  %v4950_v1 = vld [vmem:[#allocation9 + $0x60] ss:$16 sps:$4 sm:$0xff]   ;;  %v4953_v52 = vld [vmem:[#allocation9 + $0x68] ss:$16 sps:$4 sm:$0xff]  }
 0x2c1   :  { %6516 = vst [vmem:[#allocation33_spill] sm:$0xff] %v4950_v1  ;;  %6517 = vst [vmem:[#allocation34_spill] sm:$0xff] %v4953_v52 }
 0x2c3   :  { %1364 = vmatpush1.bf16.msra.mxu0 %v4938_v46  ;;  %1405 = vmatpush1.bf16.msra.mxu1 %v4941_v55  ;;  %v4956_v46 = vld [vmem:[#allocation9 + $0x84] ss:$16 sps:$4 sm:$0xff]   ;;  %v4959_v55 = vld [vmem:[#allocation9 + $0x8c] ss:$16 sps:$4 sm:$0xff]  }
 0x2c4   :  { %1365 = vmatprep.subr.bf16.mxu0 %v4944_v53  ;;  %1406 = vmatprep.subr.bf16.mxu1 %v4947_v49  ;;  %6518 = vst [vmem:[#allocation35_spill] sm:$0xff] %v4956_v46  ;;  %6519 = vst [vmem:[#allocation36_spill] sm:$0xff] %v4959_v55  ;;  %v4962_v53 = vld [vmem:[#allocation9 + $0x80] ss:$16 sps:$4 sm:$0xff]   ;;  %v4965_v49 = vld [vmem:[#allocation9 + $0x88] ss:$16 sps:$4 sm:$0xff]  }
 0x2c5   :  { %6520 = vst [vmem:[#allocation37_spill] sm:$0xff] %v4962_v53  ;;  %6521 = vst [vmem:[#allocation38_spill] sm:$0xff] %v4965_v49 }
 0x2c7   :  { %1366 = vmatpush1.bf16.msra.mxu0 %v4950_v1  ;;  %1407 = vmatpush1.bf16.msra.mxu1 %v4953_v52  ;;  %v4968_v1 = vld [vmem:[#allocation9 + $0xa4] ss:$16 sps:$4 sm:$0xff]   ;;  %v4971_v52 = vld [vmem:[#allocation9 + $0xac] ss:$16 sps:$4 sm:$0xff]  }
 0x2c8   :  { %1367 = vmatprep.subr.bf16.mxu0 %v4956_v46  ;;  %1408 = vmatprep.subr.bf16.mxu1 %v4959_v55  ;;  %6522 = vst [vmem:[#allocation39_spill] sm:$0xff] %v4968_v1  ;;  %6523 = vst [vmem:[#allocation40_spill] sm:$0xff] %v4971_v52  ;;  %v4974_v46 = vld [vmem:[#allocation9 + $0xa0] ss:$16 sps:$4 sm:$0xff]   ;;  %v4977_v55 = vld [vmem:[#allocation9 + $0xa8] ss:$16 sps:$4 sm:$0xff]  }
 0x2c9   :  { %6524 = vst [vmem:[#allocation41_spill] sm:$0xff] %v4974_v46  ;;  %6525 = vst [vmem:[#allocation42_spill] sm:$0xff] %v4977_v55 }
 0x2cb   :  { %1368 = vmatpush1.bf16.msra.mxu0 %v4962_v53  ;;  %1409 = vmatpush1.bf16.msra.mxu1 %v4965_v49  ;;  %v4980_v53 = vld [vmem:[#allocation9 + $0xc4] ss:$16 sps:$4 sm:$0xff]   ;;  %v4983_v49 = vld [vmem:[#allocation9 + $0xcc] ss:$16 sps:$4 sm:$0xff]  }
 0x2cc   :  { %1369 = vmatprep.subr.bf16.mxu0 %v4968_v1  ;;  %1410 = vmatprep.subr.bf16.mxu1 %v4971_v52  ;;  %6526 = vst [vmem:[#allocation73_spill] sm:$0xff] %v4980_v53  ;;  %6527 = vst [vmem:[#allocation43_spill] sm:$0xff] %v4983_v49  ;;  %v4986_v1 = vld [vmem:[#allocation9 + $0xc0] ss:$16 sps:$4 sm:$0xff]   ;;  %v4989_v52 = vld [vmem:[#allocation9 + $0xc8] ss:$16 sps:$4 sm:$0xff]  }
 0x2cd   :  { %6528 = vst [vmem:[#allocation44_spill] sm:$0xff] %v4986_v1  ;;  %6529 = vst [vmem:[#allocation45_spill] sm:$0xff] %v4989_v52 }
 0x2cf   :  { %1370 = vmatpush1.bf16.msra.mxu0 %v4974_v46  ;;  %1411 = vmatpush1.bf16.msra.mxu1 %v4977_v55  ;;  %v4992_v46 = vld [vmem:[#allocation9 + $0xe4] ss:$16 sps:$4 sm:$0xff]   ;;  %v4995_v55 = vld [vmem:[#allocation9 + $0xec] ss:$16 sps:$4 sm:$0xff]  }
 0x2d0   :  { %1371 = vmatprep.subr.bf16.mxu0 %v4980_v53  ;;  %1412 = vmatprep.subr.bf16.mxu1 %v4983_v49  ;;  %6530 = vst [vmem:[#allocation46_spill] sm:$0xff] %v4995_v55  ;;  %v4998_v53 = vld [vmem:[#allocation9 + $0xe0] ss:$16 sps:$4 sm:$0xff]   ;;  %v5001_v49 = vld [vmem:[#allocation9 + $0xe8] ss:$16 sps:$4 sm:$0xff]  }
 0x2d1   :  { %6531 = vst [vmem:[#allocation47_spill] sm:$0xff] %v4998_v53  ;;  %6532 = vst [vmem:[#allocation48_spill] sm:$0xff] %v5001_v49 }
 0x2d3   :  { %1372 = vmatpush1.bf16.msra.mxu0 %v4986_v1  ;;  %1413 = vmatpush1.bf16.msra.mxu1 %v4989_v52  ;;  %v5004_v1 = vld [vmem:[#allocation12 + $0x4] ss:$16 sps:$4 sm:$0xff]   ;;  %v5007_v52 = vld [vmem:[#allocation12 + $0xc] ss:$16 sps:$4 sm:$0xff]  }
 0x2d4   :  { %1373 = vmatprep.subr.bf16.mxu0 %v4992_v46  ;;  %1414 = vmatprep.subr.bf16.mxu1 %v4995_v55  ;;  %6533 = vst [vmem:[#allocation49_spill] sm:$0xff] %v5004_v1  ;;  %6534 = vst [vmem:[#allocation50_spill] sm:$0xff] %v5007_v52  ;;  %v5012_v55 = vld [vmem:[#allocation12] ss:$16 sps:$4 sm:$0xff]  }
 0x2d5   :  { %6535 = vst [vmem:[#allocation51_spill] sm:$0xff] %v5012_v55 }
 0x2d7   :  { %1374 = vmatpush1.bf16.msra.mxu0 %v4998_v53  ;;  %1415 = vmatpush1.bf16.msra.mxu1 %v5001_v49  ;;  %v5015_v53 = vld [vmem:[#allocation12 + $0x8] ss:$16 sps:$4 sm:$0xff]   ;;  %v5018_v49 = vld [vmem:[#allocation12 + $0x24] ss:$16 sps:$4 sm:$0xff]  }
 0x2d8   :  { %1493 = vmatprep.subr.bf16.mxu0 %v5004_v1  ;;  %1534 = vmatprep.subr.bf16.mxu1 %v5007_v52  ;;  %6536 = vst [vmem:[#allocation52_spill] sm:$0xff] %v5015_v53  ;;  %6537 = vst [vmem:[#allocation53_spill] sm:$0xff] %v5018_v49  ;;  %v5021_v1 = vld [vmem:[#allocation12 + $0x2c] ss:$16 sps:$4 sm:$0xff]  }
 0x2d9   :  { %6538 = vst [vmem:[#allocation54_spill] sm:$0xff] %v5021_v1 }
 0x2da   :  { %1392 = vmatmul.mubr.bf16.vlgmr.msra.gmra.mrb[24].mxu0 %v4908_v50  ;;  %1433 = vmatmul.mubr.bf16.vlgmr.msra.gmra.mrb[24].mxu1 %v4908_v50 }
 0x2db   :  { %1494 = vmatpush1.bf16.msra.mxu0 %v5012_v55  ;;  %1535 = vmatpush1.bf16.msra.mxu1 %v5015_v53 }
 0x2dc   :  { %1495 = vmatprep.subr.bf16.mxu0 %v5018_v49  ;;  %1536 = vmatprep.subr.bf16.mxu1 %v5021_v1 }
 0x2dd   :  { %1525 = vmatprep.mubr.bf16.mxu0 %v6419_v56  ;;  %1566 = vmatprep.mubr.bf16.mxu1 %v6419_v56 }
 0x2df   :  { %1496 = vmatpush1.bf16.msra.mxu0 %v4578_v40  ;;  %1537 = vmatpush1.bf16.msra.mxu1 %v4580_v41 }
 0x2e0   :  { %1497 = vmatprep.subr.bf16.mxu0 %v4590_v42  ;;  %1538 = vmatprep.subr.bf16.mxu1 %v4592_v43 }
 0x2e3   :  { %1498 = vmatpush1.bf16.msra.mxu0 %v4596_v44  ;;  %1539 = vmatpush1.bf16.msra.mxu1 %v6449_v3 }
 0x2e4   :  { %1499 = vmatprep.subr.bf16.mxu0 %v6450_v4  ;;  %1540 = vmatprep.subr.bf16.mxu1 %v6451_v5 }
 0x2e7   :  { %1500 = vmatpush1.bf16.msra.mxu0 %v6452_v6  ;;  %1541 = vmatpush1.bf16.msra.mxu1 %v6453_v7 }
 0x2e8   :  { %1501 = vmatprep.subr.bf16.mxu0 %v6454_v8  ;;  %1542 = vmatprep.subr.bf16.mxu1 %v6455_v9 }
 0x2eb   :  { %1502 = vmatpush1.bf16.msra.mxu0 %v6456_v12  ;;  %1543 = vmatpush1.bf16.msra.mxu1 %v6457_v13 }
 0x2ec   :  { %1503 = vmatprep.subr.bf16.mxu0 %v6458_v16  ;;  %1544 = vmatprep.subr.bf16.mxu1 %v6459_v17 }
 0x2ef   :  { %1504 = vmatpush1.bf16.msra.mxu0 %v6460_v22  ;;  %1545 = vmatpush1.bf16.msra.mxu1 %v6461_v23 }
 0x2f0   :  { %1505 = vmatprep.subr.bf16.mxu0 %v6462_v24  ;;  %1546 = vmatprep.subr.bf16.mxu1 %v6463_v25 }
 0x2f3   :  { %1506 = vmatpush1.bf16.msra.mxu0 %v6464_v26  ;;  %1547 = vmatpush1.bf16.msra.mxu1 %v6465_v27 }
 0x2f4   :  { %1507 = vmatprep.subr.bf16.mxu0 %v6466_v28  ;;  %1548 = vmatprep.subr.bf16.mxu1 %v6467_v29 }
 0x2f7   :  { %1508 = vmatpush1.bf16.msra.mxu0 %v6468_v30  ;;  %1549 = vmatpush1.bf16.msra.mxu1 %v6469_v31 }
 0x2f8   :  { %1575 = vmatprep.subr.bf16.mxu0 %v6470_v32  ;;  %1616 = vmatprep.subr.bf16.mxu1 %v6471_v33 }
 0x366   :  { %v1201_v40 = vpop.f32.mrb[16].mxu0  ;;  %v1242_v41 = vpop.f32.mrb[16].mxu1 }
 0x367   :  { %v1203_v42 = vpop.f32.mrb[17].mxu0  ;;  %v1244_v43 = vpop.f32.mrb[17].mxu1 }
 0x368   :  { %v1205_v44 = vpop.f32.mrb[18].mxu0  ;;  %v1246_v3 = vpop.f32.mrb[18].mxu1 }
 0x369   :  { %v1206_v4 = vpop.f32.mrb[19].mxu0  ;;  %v1247_v5 = vpop.f32.mrb[19].mxu1 }
 0x38d   :  { %v1283_v6 = vpop.f32.mrb[20].mxu0  ;;  %v1324_v7 = vpop.f32.mrb[20].mxu1 }
 0x38e   :  { %v1284_v8 = vadd.f32 %v1283_v6, %v1201_v40  ;;  %v1325_v9 = vadd.f32 %v1324_v7, %v1242_v41  ;;  %v1285_v12 = vpop.f32.mrb[21].mxu0  ;;  %v1326_v13 = vpop.f32.mrb[21].mxu1 }
 0x38f   :  { %v1286_v16 = vadd.f32 %v1285_v12, %v1203_v42  ;;  %v1327_v17 = vadd.f32 %v1326_v13, %v1244_v43  ;;  %v1287_v22 = vpop.f32.mrb[22].mxu0  ;;  %v1328_v23 = vpop.f32.mrb[22].mxu1 }
 0x390   :  { %v1331_v24 = vadd.f32 %v1284_v8, %v4847_v39  ;;  %v1288_v25 = vpop.f32.mrb[23].mxu0  ;;  %v1329_v26 = vpop.f32.mrb[23].mxu1  ;;  %v1333_v40 = vadd.f32 %v1325_v9, %v4858_v15 }
 0x391   :  { %v1332_v27 = vadd.f32 %v1286_v16, %v4849_v54  ;;  %v1334_v32 = vadd.f32 %v1327_v17, %v4854_v45 }
 0x392   :  { %v1335_v28 = vsub.f32 0.0, %v1331_v24 }
 0x393   :  { %v1340_v29 = vsub.f32 0.0, %v1332_v27  ;;  %v1346_v33 = vsub.f32 0.0, %v1334_v32 }
 0x394   :  { %v1336_v30 = vmul.f32 1.442695, %v1335_v28 }
 0x395   :  { %v1341_v31 = vmul.f32 1.442695, %v1340_v29  ;;  %v1347_v50 = vmul.f32 1.442695, %v1346_v33 }
 0x396   :  { %3799 = vpow2.f32 %v1336_v30 }
 0x397   :  { %3801 = vpow2.f32 %v1341_v31  ;;  %v1358_v31 = vld [vmem:[#allocation6 + $0x10] sm:$0xff] }
 0x398   :  { %3803 = vpow2.f32 %v1347_v50 }
 0x399   :  { %3805 = vtanh.f32 %v1333_v40 }
 0x3a0   :  { %v3800_v41 = vpop.eup %3799 }
 0x3a1   :  { %v3802_v42 = vpop.eup %3801  ;;  %v1338_v43 = vadd.f32 1.0, %v3800_v41 }
 0x3a2   :  { %v1343_v44 = vadd.f32 1.0, %v3802_v42  ;;  %v3804_v3 = vpop.eup %3803 }
 0x3a3   :  { %3807 = vrcp.f32 %v1338_v43  ;;  %v3806_v4 = vpop.eup %3805  ;;  %v1349_v13 = vadd.f32 1.0, %v3804_v3 }
 0x3a4   :  { %3809 = vrcp.f32 %v1343_v44 }
 0x3a5   :  { %3811 = vrcp.f32 %v1349_v13 }
 0x3ad   :  { %v3808_v5 = vpop.eup %3807  ;;  %v1393_v6 = vpop.f32.mrb[24].mxu0 }
 0x3ae   :  { %v1434_v7 = vpop.f32.mrb[24].mxu1  ;;  %v3810_v8 = vpop.eup %3809  ;;  %v1352_v12 = vmul.f32 %v3808_v5, %v3806_v4 }
 0x3af   :  { %v1395_v16 = vpop.f32.mrb[25].mxu0  ;;  %v1436_v17 = vpop.f32.mrb[25].mxu1  ;;  %v1351_v9 = vmul.f32 %v3810_v8, %v4861_v35 }
 0x3b0   :  { %v1445_v22 = vcombine.low %v1393_v6, %v1395_v16  ;;  %v1446_v23 = vcombine.low %v1434_v7, %v1436_v17  ;;  %v1397_v24 = vpop.f32.mrb[26].mxu0  ;;  %v1438_v25 = vpop.f32.mrb[26].mxu1 }
 0x3b1   :  { %v1398_v26 = vpop.f32.mrb[27].mxu0  ;;  %v1439_v27 = vpop.f32.mrb[27].mxu1  ;;  %v5059_v28 = vadd.f32 %v1352_v12, %v1351_v9 }
 0x3b2   :  { %v1453_v29 = vrot.slane %v1445_v22, %v4767_v57  ;;  %v1460_v30 = vrot.slane %v1446_v23, %v4767_v57  ;;  %v3812_v44 = vpop.eup %3811  ;;  %v6546_v22 = vld [vmem:[#allocation68_spill] sm:$0xff]  ;;  %v6551_v26 = vld [vmem:[#allocation22_spill] sm:$0xff]  ;;  %v6554_v27 = vld [vmem:[#allocation25_spill] sm:$0xff] }
 0x3b3   :  { %3813 = vtanh.f32 %v5059_v28 }
 0x3b4   :  { %v1461_v32 = vcombine.low %v1453_v29, %v1460_v30  ;;  %v6555_v29 = vld [vmem:[#allocation26_spill] sm:$0xff]  ;;  %v6556_v30 = vld [vmem:[#allocation27_spill] sm:$0xff] }
 0x3b6   :  { %v1463_v33 = vadd.f32 %v1461_v32, %v1358_v31  ;;  %v6557_v31 = vld [vmem:[#allocation28_spill] sm:$0xff]  ;;  %v6558_v32 = vld [vmem:[#allocation29_spill] sm:$0xff] }
 0x3b8   :  { %v1464_v50 = vsub.f32 0.0, %v1463_v33  ;;  %v1470_v35 = vrot.slane %v1463_v33, 2  ;;  %v1480_v43 = vrot.slane %v1463_v33, 6  ;;  %v1477_v12 = vrot.slane %v1463_v33, 4  ;;  %v6559_v33 = vld [vmem:[#allocation30_spill] sm:$0xff] }
 0x3ba   :  { %v1465_v40 = vmul.f32 1.442695, %v1464_v50  ;;  %v1472_v41 = vsub.f32 0.0, %v1470_v35  ;;  %v1482_v5 = vsub.f32 0.0, %v1480_v43  ;;  %v6560_v50 = vld [vmem:[#allocation31_spill] sm:$0xff]  ;;  %v6561_v35 = vld [vmem:[#allocation32_spill] sm:$0xff] }
 0x3bb   :  { %v6565_v43 = vld [vmem:[#allocation36_spill] sm:$0xff] }
 0x3bc   :  { %3815 = vpow2.f32 %v1465_v40  ;;  %v1473_v42 = vmul.f32 1.442695, %v1472_v41  ;;  %v1483_v7 = vmul.f32 1.442695, %v1482_v5  ;;  %v6562_v40 = vld [vmem:[#allocation33_spill] sm:$0xff]  ;;  %v6563_v41 = vld [vmem:[#allocation34_spill] sm:$0xff] }
 0x3bd   :  { %v3814_v3 = vpop.eup %3813  ;;  %v6569_v5 = vld [vmem:[#allocation40_spill] sm:$0xff] }
 0x3be   :  { %3817 = vpow2.f32 %v1473_v42  ;;  %v1355_v4 = vmul.f32 %v3814_v3, %v3812_v44  ;;  %v6564_v42 = vld [vmem:[#allocation35_spill] sm:$0xff]  ;;  %v6566_v44 = vld [vmem:[#allocation37_spill] sm:$0xff]  ;;  %v6567_v3 = vld [vmem:[#allocation38_spill] sm:$0xff] }
 0x3bf   :  { %3819 = vpow2.f32 %v1483_v7  ;;  %v6571_v7 = vld [vmem:[#allocation42_spill] sm:$0xff] }
 0x3c0   :  { %v1356_v6 = vpack.c.bf16 %v1355_v4, %v1355_v4  ;;  %v6568_v4 = vld [vmem:[#allocation39_spill] sm:$0xff] }
 0x3c2   :  { %1526 = vmatmul.mubr.bf16.vlgmr.msra.gmra.mrb[28].mxu0 %v1356_v6  ;;  %1567 = vmatmul.mubr.bf16.vlgmr.msra.gmra.mrb[28].mxu1 %v1356_v6  ;;  %v6570_v6 = vld [vmem:[#allocation41_spill] sm:$0xff] }
 0x3c3   :  { %1576 = vmatpush1.bf16.msra.mxu0 %v6473_v37  ;;  %1617 = vmatpush1.bf16.msra.mxu1 %v6474_v60  ;;  %v6539_v60 = vld [vmem:[#allocation56_spill] sm:$0xff] }
 0x3c4   :  { %1577 = vmatprep.subr.bf16.mxu0 %v6475_v59  ;;  %1618 = vmatprep.subr.bf16.mxu1 %v6476_v48  ;;  %v6540_v59 = vld [vmem:[#allocation57_spill] sm:$0xff]  ;;  %v6541_v48 = vld [vmem:[#allocation58_spill] sm:$0xff] }
 0x3c5   :  { %1607 = vmatprep.mubr.bf16.mxu0 %v6419_v56  ;;  %1648 = vmatprep.mubr.bf16.mxu1 %v6419_v56 }
 0x3c6   :  { %v3816_v8 = vpop.eup %3815 }
 0x3c7   :  { %v1467_v13 = vadd.f32 1.0, %v3816_v8  ;;  %1578 = vmatpush1.bf16.msra.mxu0 %v6477_v2  ;;  %1619 = vmatpush1.bf16.msra.mxu1 %v6478_v62  ;;  %v6572_v8 = vld [vmem:[#allocation73_spill] sm:$0xff] }
 0x3c8   :  { %v3818_v16 = vpop.eup %3817  ;;  %1579 = vmatprep.subr.bf16.mxu0 %v6479_v18  ;;  %1620 = vmatprep.subr.bf16.mxu1 %v6480_v10  ;;  %v6542_v10 = vld [vmem:[#allocation59_spill] sm:$0xff] }
 0x3c9   :  { %3821 = vrcp.f32 %v1467_v13  ;;  %v1475_v37 = vadd.f32 1.0, %v3818_v16  ;;  %v3820_v2 = vpop.eup %3819  ;;  %v6574_v13 = vld [vmem:[#allocation44_spill] sm:$0xff]  ;;  %v6575_v16 = vld [vmem:[#allocation45_spill] sm:$0xff] }
 0x3ca   :  { %3823 = vtanh.f32 %v1477_v12  ;;  %v6573_v12 = vld [vmem:[#allocation43_spill] sm:$0xff] }
 0x3cb   :  { %3825 = vrcp.f32 %v1475_v37  ;;  %1580 = vmatpush1.bf16.msra.mxu0 %v6481_v11  ;;  %1621 = vmatpush1.bf16.msra.mxu1 %v6482_v14  ;;  %v1485_v14 = vadd.f32 1.0, %v3820_v2  ;;  %v6576_v37 = vld [vmem:[#allocation46_spill] sm:$0xff] }
 0x3cc   :  { %1581 = vmatprep.subr.bf16.mxu0 %v6483_v19  ;;  %1622 = vmatprep.subr.bf16.mxu1 %v6484_v20  ;;  %v6543_v19 = vld [vmem:[#allocation61_spill] sm:$0xff]  ;;  %v6544_v20 = vld [vmem:[#allocation62_spill] sm:$0xff] }
 0x3cd   :  { %3827 = vrcp.f32 %v1485_v14  ;;  %v5142_v2 = vld [vmem:[#allocation12 + $0x20] ss:$16 sps:$4 sm:$0xff]   ;;  %v5157_v14 = vld [vmem:[#allocation12 + $0x48] ss:$16 sps:$4 sm:$0xff]  }
 0x3ce   :  { %6580 = vst [vmem:[#allocation55_spill] sm:$0xff] %v5142_v2  ;;  %6585 = vst [vmem:[#allocation66_spill] sm:$0xff] %v5157_v14 }
 0x3cf   :  { %1582 = vmatpush1.bf16.msra.mxu0 %v6485_v21  ;;  %1623 = vmatpush1.bf16.msra.mxu1 %v6539_v60  ;;  %v6577_v60 = vld [vmem:[#allocation47_spill] sm:$0xff] }
 0x3d0   :  { %1583 = vmatprep.subr.bf16.mxu0 %v6540_v59  ;;  %1624 = vmatprep.subr.bf16.mxu1 %v6541_v48  ;;  %v6578_v59 = vld [vmem:[#allocation48_spill] sm:$0xff]  ;;  %v6579_v48 = vld [vmem:[#allocation49_spill] sm:$0xff] }
 0x3d3   :  { %v3822_v62 = vpop.eup %3821  ;;  %1584 = vmatpush1.bf16.msra.mxu0 %v6542_v10  ;;  %1625 = vmatpush1.bf16.msra.mxu1 %v6490_v34  ;;  %v6545_v34 = vld [vmem:[#allocation67_spill] sm:$0xff] }
 0x3d4   :  { %v3824_v18 = vpop.eup %3823  ;;  %1585 = vmatprep.subr.bf16.mxu0 %v6543_v19  ;;  %1626 = vmatprep.subr.bf16.mxu1 %v6544_v20  ;;  %v5151_v10 = vld [vmem:[#allocation12 + $0x4c] ss:$16 sps:$4 sm:$0xff]   ;;  %v5160_v19 = vld [vmem:[#allocation12 + $0x64] ss:$16 sps:$4 sm:$0xff]  }
 0x3d5   :  { %v3826_v11 = vpop.eup %3825  ;;  %v1488_v17 = vmul.f32 %v3824_v18, %v3822_v62  ;;  %v5145_v62 = vld [vmem:[#allocation12 + $0x28] ss:$16 sps:$4 sm:$0xff]   ;;  %v5148_v18 = vld [vmem:[#allocation12 + $0x44] ss:$16 sps:$4 sm:$0xff]   ;;  %6583 = vst [vmem:[#allocation64_spill] sm:$0xff] %v5151_v10  ;;  %6586 = vst [vmem:[#allocation69_spill] sm:$0xff] %v5160_v19 }
 0x3d6   :  { %v1487_v21 = vmul.f32 %v3826_v11, %v4891_v0  ;;  %v6547_v0 = vld [vmem:[#allocation71_spill] sm:$0xff]  ;;  %6581 = vst [vmem:[#allocation60_spill] sm:$0xff] %v5145_v62  ;;  %6582 = vst [vmem:[#allocation63_spill] sm:$0xff] %v5148_v18 }
 0x3d7   :  { %1586 = vmatpush1.bf16.msra.mxu0 %v6493_v63  ;;  %1627 = vmatpush1.bf16.msra.mxu1 %v6494_v38  ;;  %v6548_v38 = vld [vmem:[#allocation72_spill] sm:$0xff]  ;;  %v5163_v20 = vld [vmem:[#allocation12 + $0x6c] ss:$16 sps:$4 sm:$0xff]  }
 0x3d8   :  { %v5089_v9 = vadd.f32 %v1488_v17, %v1487_v21  ;;  %1587 = vmatprep.subr.bf16.mxu0 %v6495_v36  ;;  %1628 = vmatprep.subr.bf16.mxu1 %v6496_v61  ;;  %v6549_v63 = vld [vmem:[#allocation20_spill] sm:$0xff]  ;;  %v6550_v36 = vld [vmem:[#allocation21_spill] sm:$0xff]  ;;  %v3828_v61 = vpop.eup %3827  ;;  %6587 = vst [vmem:[#allocation70_spill] sm:$0xff] %v5163_v20 }
 0x3d9   :  { %v5154_v11 = vld [vmem:[#allocation12 + $0x40] ss:$16 sps:$4 sm:$0xff]   ;;  %v5169_v17 = vld [vmem:[#allocation12 + $0x68] ss:$16 sps:$4 sm:$0xff]  }
 0x3da   :  { %3829 = vtanh.f32 %v5089_v9  ;;  %6584 = vst [vmem:[#allocation65_spill] sm:$0xff] %v5154_v11  ;;  %v5166_v21 = vld [vmem:[#allocation12 + $0x60] ss:$16 sps:$4 sm:$0xff]   ;;  %6589 = vst [vmem:[#allocation57_spill] sm:$0xff] %v5169_v17 }
 0x3db   :  { %1588 = vmatpush1.bf16.msra.mxu0 %v6545_v34  ;;  %1629 = vmatpush1.bf16.msra.mxu1 %v6546_v22  ;;  %6588 = vst [vmem:[#allocation56_spill] sm:$0xff] %v5166_v21  ;;  %v5172_v34 = vld [vmem:[#allocation12 + $0x84] ss:$16 sps:$4 sm:$0xff]   ;;  %v5175_v22 = vld [vmem:[#allocation12 + $0x8c] ss:$16 sps:$4 sm:$0xff]  }
 0x3dc   :  { %1589 = vmatprep.subr.bf16.mxu0 %v6499_v47  ;;  %1630 = vmatprep.subr.bf16.mxu1 %v6500_v58  ;;  %v6552_v47 = vld [vmem:[#allocation23_spill] sm:$0xff]  ;;  %v6553_v58 = vld [vmem:[#allocation24_spill] sm:$0xff]  ;;  %6590 = vst [vmem:[#allocation58_spill] sm:$0xff] %v5172_v34  ;;  %6591 = vst [vmem:[#allocation59_spill] sm:$0xff] %v5175_v22 }
 0x3df   :  { %1590 = vmatpush1.bf16.msra.mxu0 %v6547_v0  ;;  %1631 = vmatpush1.bf16.msra.mxu1 %v6548_v38  ;;  %v5178_v0 = vld [vmem:[#allocation12 + $0x80] ss:$16 sps:$4 sm:$0xff]   ;;  %v5181_v38 = vld [vmem:[#allocation12 + $0x88] ss:$16 sps:$4 sm:$0xff]  }
 0x3e0   :  { %1685 = vmatprep.subr.bf16.mxu0 %v6549_v63  ;;  %1726 = vmatprep.subr.bf16.mxu1 %v6550_v36  ;;  %6592 = vst [vmem:[#allocation61_spill] sm:$0xff] %v5178_v0  ;;  %6593 = vst [vmem:[#allocation62_spill] sm:$0xff] %v5181_v38 }
 0x3e4   :  { %v3830_v23 = vpop.eup %3829 }
 0x3e5   :  { %v1491_v24 = vmul.f32 %v3830_v23, %v3828_v61  ;;  %v5184_v61 = vld [vmem:[#allocation12 + $0xa4] ss:$16 sps:$4 sm:$0xff]   ;;  %v5187_v23 = vld [vmem:[#allocation12 + $0xac] ss:$16 sps:$4 sm:$0xff]  }
 0x3e6   :  { %6594 = vst [vmem:[#allocation67_spill] sm:$0xff] %v5184_v61  ;;  %6595 = vst [vmem:[#allocation68_spill] sm:$0xff] %v5187_v23 }
 0x3e7   :  { %v1492_v25 = vpack.c.bf16 %v1491_v24, %v1491_v24  ;;  %v5190_v24 = vld [vmem:[#allocation12 + $0xa0] ss:$16 sps:$4 sm:$0xff]  }
 0x3e8   :  { %6596 = vst [vmem:[#allocation71_spill] sm:$0xff] %v5190_v24 }
 0x3e9   :  { %1608 = vmatmul.mubr.bf16.vlgmr.msra.gmra.mrb[32].mxu0 %v1492_v25  ;;  %1649 = vmatmul.mubr.bf16.vlgmr.msra.gmra.mrb[32].mxu1 %v1492_v25 }
 0x3ea   :  { %1686 = vmatpush1.bf16.msra.mxu0 %v4912_v51  ;;  %1727 = vmatpush1.bf16.msra.mxu1 %v6551_v26 }
 0x3eb   :  { %1687 = vmatprep.subr.bf16.mxu0 %v6552_v47  ;;  %1728 = vmatprep.subr.bf16.mxu1 %v6553_v58 }
 0x3ec   :  { %1717 = vmatprep.mubr.bf16.mxu0 %v6419_v56  ;;  %1758 = vmatprep.mubr.bf16.mxu1 %v6419_v56 }
 0x3ee   :  { %1688 = vmatpush1.bf16.msra.mxu0 %v6554_v27  ;;  %1729 = vmatpush1.bf16.msra.mxu1 %v6555_v29 }
 0x3ef   :  { %1689 = vmatprep.subr.bf16.mxu0 %v6556_v30  ;;  %1730 = vmatprep.subr.bf16.mxu1 %v6557_v31 }
 0x3f2   :  { %1690 = vmatpush1.bf16.msra.mxu0 %v6558_v32  ;;  %1731 = vmatpush1.bf16.msra.mxu1 %v6559_v33 }
 0x3f3   :  { %1691 = vmatprep.subr.bf16.mxu0 %v6560_v50  ;;  %1732 = vmatprep.subr.bf16.mxu1 %v6561_v35 }
 0x3f6   :  { %1692 = vmatpush1.bf16.msra.mxu0 %v6562_v40  ;;  %1733 = vmatpush1.bf16.msra.mxu1 %v6563_v41 }
 0x3f7   :  { %1693 = vmatprep.subr.bf16.mxu0 %v6564_v42  ;;  %1734 = vmatprep.subr.bf16.mxu1 %v6565_v43 }
 0x3fa   :  { %1694 = vmatpush1.bf16.msra.mxu0 %v6566_v44  ;;  %1735 = vmatpush1.bf16.msra.mxu1 %v6567_v3 }
 0x3fb   :  { %1695 = vmatprep.subr.bf16.mxu0 %v6568_v4  ;;  %1736 = vmatprep.subr.bf16.mxu1 %v6569_v5 }
 0x3fe   :  { %1696 = vmatpush1.bf16.msra.mxu0 %v6570_v6  ;;  %1737 = vmatpush1.bf16.msra.mxu1 %v6571_v7 }
 0x3ff   :  { %1697 = vmatprep.subr.bf16.mxu0 %v6572_v8  ;;  %1738 = vmatprep.subr.bf16.mxu1 %v6573_v12 }
 0x402   :  { %1698 = vmatpush1.bf16.msra.mxu0 %v6574_v13  ;;  %1739 = vmatpush1.bf16.msra.mxu1 %v6575_v16 }
 0x403   :  { %1699 = vmatprep.subr.bf16.mxu0 %v4992_v46  ;;  %1740 = vmatprep.subr.bf16.mxu1 %v6576_v37 }
 0x406   :  { %1700 = vmatpush1.bf16.msra.mxu0 %v6577_v60  ;;  %1741 = vmatpush1.bf16.msra.mxu1 %v6578_v59 }
 0x407   :  { %1819 = vmatprep.subr.bf16.mxu0 %v6579_v48  ;;  %1860 = vmatprep.subr.bf16.mxu1 %v5007_v52 }
 0x409   :  { %1718 = vmatmul.mubr.bf16.vlgmr.msra.gmra.mrb[36].mxu0 %v1492_v25  ;;  %1759 = vmatmul.mubr.bf16.vlgmr.msra.gmra.mrb[36].mxu1 %v1492_v25  ;;  %v5193_v25 = vld [vmem:[#allocation12 + $0xa8] ss:$16 sps:$4 sm:$0xff]  }
 0x40a   :  { %1820 = vmatpush1.bf16.msra.mxu0 %v5012_v55  ;;  %1861 = vmatpush1.bf16.msra.mxu1 %v5015_v53  ;;  %6597 = vst [vmem:[#allocation72_spill] sm:$0xff] %v5193_v25 }
 0x40b   :  { %1821 = vmatprep.subr.bf16.mxu0 %v5018_v49  ;;  %1862 = vmatprep.subr.bf16.mxu1 %v5021_v1 }
 0x40c   :  { %1851 = vmatprep.mubr.bf16.mxu0 %v6419_v56  ;;  %1892 = vmatprep.mubr.bf16.mxu1 %v6419_v56 }
 0x40e   :  { %1822 = vmatpush1.bf16.msra.mxu0 %v5142_v2  ;;  %1863 = vmatpush1.bf16.msra.mxu1 %v5145_v62 }
 0x40f   :  { %1823 = vmatprep.subr.bf16.mxu0 %v5148_v18  ;;  %1864 = vmatprep.subr.bf16.mxu1 %v5151_v10 }
 0x412   :  { %1824 = vmatpush1.bf16.msra.mxu0 %v5154_v11  ;;  %1865 = vmatpush1.bf16.msra.mxu1 %v5157_v14 }
 0x413   :  { %1825 = vmatprep.subr.bf16.mxu0 %v5160_v19  ;;  %1866 = vmatprep.subr.bf16.mxu1 %v5163_v20 }
 0x416   :  { %1826 = vmatpush1.bf16.msra.mxu0 %v5166_v21  ;;  %1867 = vmatpush1.bf16.msra.mxu1 %v5169_v17 }
 0x417   :  { %1827 = vmatprep.subr.bf16.mxu0 %v5172_v34  ;;  %1868 = vmatprep.subr.bf16.mxu1 %v5175_v22 }
 0x41a   :  { %1828 = vmatpush1.bf16.msra.mxu0 %v5178_v0  ;;  %1869 = vmatpush1.bf16.msra.mxu1 %v5181_v38  ;;  %v5196_v0 = vld [vmem:[#allocation12 + $0xc4] ss:$16 sps:$4 sm:$0xff]   ;;  %v5199_v38 = vld [vmem:[#allocation12 + $0xcc] ss:$16 sps:$4 sm:$0xff]  }
 0x41b   :  { %1829 = vmatprep.subr.bf16.mxu0 %v5184_v61  ;;  %1870 = vmatprep.subr.bf16.mxu1 %v5187_v23  ;;  %6598 = vst [vmem:[#allocation20_spill] sm:$0xff] %v5196_v0  ;;  %6599 = vst [vmem:[#allocation21_spill] sm:$0xff] %v5199_v38  ;;  %v5202_v61 = vld [vmem:[#allocation12 + $0xc0] ss:$16 sps:$4 sm:$0xff]   ;;  %v5205_v23 = vld [vmem:[#allocation12 + $0xc8] ss:$16 sps:$4 sm:$0xff]  }
 0x41c   :  { %6600 = vst [vmem:[#allocation22_spill] sm:$0xff] %v5202_v61  ;;  %6601 = vst [vmem:[#allocation23_spill] sm:$0xff] %v5205_v23 }
 0x41e   :  { %1830 = vmatpush1.bf16.msra.mxu0 %v5190_v24  ;;  %1871 = vmatpush1.bf16.msra.mxu1 %v5193_v25  ;;  %v5208_v24 = vld [vmem:[#allocation12 + $0xe4] ss:$16 sps:$4 sm:$0xff]   ;;  %v5211_v25 = vld [vmem:[#allocation12 + $0xec] ss:$16 sps:$4 sm:$0xff]  }
 0x41f   :  { %1831 = vmatprep.subr.bf16.mxu0 %v5196_v0  ;;  %1872 = vmatprep.subr.bf16.mxu1 %v5199_v38  ;;  %6602 = vst [vmem:[#allocation24_spill] sm:$0xff] %v5208_v24  ;;  %6603 = vst [vmem:[#allocation25_spill] sm:$0xff] %v5211_v25  ;;  %v5214_v0 = vld [vmem:[#allocation12 + $0xe0] ss:$16 sps:$4 sm:$0xff]   ;;  %v5217_v38 = vld [vmem:[#allocation12 + $0xe8] ss:$16 sps:$4 sm:$0xff]  }
 0x420   :  { %6604 = vst [vmem:[#allocation26_spill] sm:$0xff] %v5214_v0  ;;  %6605 = vst [vmem:[#allocation27_spill] sm:$0xff] %v5217_v38 }
 0x422   :  { %1832 = vmatpush1.bf16.msra.mxu0 %v5202_v61  ;;  %1873 = vmatpush1.bf16.msra.mxu1 %v5205_v23  ;;  %v5220_v61 = vld [vmem:[#allocation11 + $0x4] ss:$16 sps:$4 sm:$0xff]   ;;  %v5223_v23 = vld [vmem:[#allocation11 + $0xc] ss:$16 sps:$4 sm:$0xff]  }
 0x423   :  { %1833 = vmatprep.subr.bf16.mxu0 %v5208_v24  ;;  %1874 = vmatprep.subr.bf16.mxu1 %v5211_v25  ;;  %6606 = vst [vmem:[#allocation28_spill] sm:$0xff] %v5220_v61  ;;  %6607 = vst [vmem:[#allocation29_spill] sm:$0xff] %v5223_v23 }
 0x426   :  { %1834 = vmatpush1.bf16.msra.mxu0 %v5214_v0  ;;  %1875 = vmatpush1.bf16.msra.mxu1 %v5217_v38 }
 0x427   :  { %1901 = vmatprep.subr.bf16.mxu0 %v5220_v61  ;;  %1942 = vmatprep.subr.bf16.mxu1 %v5223_v23 }
 0x495   :  { %v1527_v24 = vpop.f32.mrb[28].mxu0  ;;  %v1568_v22 = vpop.f32.mrb[28].mxu1 }
 0x496   :  { %v1529_v34 = vpop.f32.mrb[29].mxu0  ;;  %v1570_v25 = vpop.f32.mrb[29].mxu1 }
 0x497   :  { %v1531_v17 = vpop.f32.mrb[30].mxu0  ;;  %v1572_v21 = vpop.f32.mrb[30].mxu1 }
 0x498   :  { %v1532_v20 = vpop.f32.mrb[31].mxu0  ;;  %v1573_v0 = vpop.f32.mrb[31].mxu1 }
 0x4bc   :  { %v1609_v19 = vpop.f32.mrb[32].mxu0  ;;  %v1650_v14 = vpop.f32.mrb[32].mxu1 }
 0x4bd   :  { %v1610_v11 = vadd.f32 %v1609_v19, %v1527_v24  ;;  %v1651_v38 = vadd.f32 %v1650_v14, %v1568_v22  ;;  %v1611_v10 = vpop.f32.mrb[33].mxu0  ;;  %v1652_v18 = vpop.f32.mrb[33].mxu1 }
 0x4be   :  { %v1612_v62 = vadd.f32 %v1611_v10, %v1529_v34  ;;  %v1653_v61 = vadd.f32 %v1652_v18, %v1570_v25  ;;  %v1613_v2 = vpop.f32.mrb[34].mxu0  ;;  %v1654_v1 = vpop.f32.mrb[34].mxu1 }
 0x4bf   :  { %v1657_v23 = vadd.f32 %v1610_v11, %v4847_v39  ;;  %v1614_v49 = vpop.f32.mrb[35].mxu0  ;;  %v1655_v53 = vpop.f32.mrb[35].mxu1  ;;  %v1659_v18 = vadd.f32 %v1651_v38, %v4858_v15 }
 0x4c0   :  { %v1658_v55 = vadd.f32 %v1612_v62, %v4849_v54  ;;  %v1660_v52 = vadd.f32 %v1653_v61, %v4854_v45 }
 0x4c1   :  { %v1661_v17 = vsub.f32 0.0, %v1657_v23 }
 0x4c2   :  { %v1666_v21 = vsub.f32 0.0, %v1658_v55  ;;  %v1672_v14 = vsub.f32 0.0, %v1660_v52 }
 0x4c3   :  { %v1662_v20 = vmul.f32 1.442695, %v1661_v17 }
 0x4c4   :  { %v1667_v0 = vmul.f32 1.442695, %v1666_v21  ;;  %v1673_v19 = vmul.f32 1.442695, %v1672_v14 }
 0x4c5   :  { %3831 = vpow2.f32 %v1662_v20 }
 0x4c6   :  { %3833 = vpow2.f32 %v1667_v0 }
 0x4c7   :  { %3835 = vpow2.f32 %v1673_v19 }
 0x4c8   :  { %3837 = vtanh.f32 %v1659_v18 }
 0x4cf   :  { %v3832_v2 = vpop.eup %3831 }
 0x4d0   :  { %v3834_v1 = vpop.eup %3833  ;;  %v1664_v10 = vadd.f32 1.0, %v3832_v2 }
 0x4d1   :  { %v1669_v53 = vadd.f32 1.0, %v3834_v1  ;;  %v3836_v49 = vpop.eup %3835  ;;  %v1684_v1 = vld [vmem:[#allocation6 + $0x18] sm:$0xff] }
 0x4d2   :  { %3839 = vrcp.f32 %v1664_v10  ;;  %v3838_v55 = vpop.eup %3837  ;;  %v1675_v23 = vadd.f32 1.0, %v3836_v49 }
 0x4d3   :  { %3841 = vrcp.f32 %v1669_v53 }
 0x4d4   :  { %3843 = vrcp.f32 %v1675_v23 }
 0x4dc   :  { %v3840_v62 = vpop.eup %3839  ;;  %v1719_v11 = vpop.f32.mrb[36].mxu0 }
 0x4dd   :  { %v1760_v34 = vpop.f32.mrb[36].mxu1  ;;  %v3842_v22 = vpop.eup %3841  ;;  %v1678_v61 = vmul.f32 %v3840_v62, %v3838_v55 }
 0x4de   :  { %v1721_v52 = vpop.f32.mrb[37].mxu0  ;;  %v1762_v24 = vpop.f32.mrb[37].mxu1  ;;  %v1677_v38 = vmul.f32 %v3842_v22, %v5059_v28 }
 0x4df   :  { %v1771_v25 = vcombine.low %v1719_v11, %v1721_v52  ;;  %v1772_v17 = vcombine.low %v1760_v34, %v1762_v24  ;;  %v1723_v21 = vpop.f32.mrb[38].mxu0  ;;  %v1764_v20 = vpop.f32.mrb[38].mxu1 }
 0x4e0   :  { %v1724_v0 = vpop.f32.mrb[39].mxu0  ;;  %v1765_v14 = vpop.f32.mrb[39].mxu1  ;;  %v5231_v19 = vadd.f32 %v1678_v61, %v1677_v38  ;;  %v5242_v21 = vld [vmem:[#allocation11 + $0x24] ss:$16 sps:$4 sm:$0xff]   ;;  %v5245_v20 = vld [vmem:[#allocation11 + $0x2c] ss:$16 sps:$4 sm:$0xff]  }
 0x4e1   :  { %v1779_v18 = vrot.slane %v1771_v25, %v4767_v57  ;;  %v1786_v2 = vrot.slane %v1772_v17, %v4767_v57  ;;  %v3844_v22 = vpop.eup %3843  ;;  %v5236_v25 = vld [vmem:[#allocation11] ss:$16 sps:$4 sm:$0xff]   ;;  %v5239_v17 = vld [vmem:[#allocation11 + $0x8] ss:$16 sps:$4 sm:$0xff]  }
 0x4e2   :  { %3845 = vtanh.f32 %v5231_v19 }
 0x4e3   :  { %v1787_v10 = vcombine.low %v1779_v18, %v1786_v2 }
 0x4e5   :  { %v1789_v53 = vadd.f32 %v1787_v10, %v1684_v1  ;;  %v5250_v1 = vld [vmem:[#allocation11 + $0x20] ss:$16 sps:$4 sm:$0xff]   ;;  %v5253_v10 = vld [vmem:[#allocation11 + $0x28] ss:$16 sps:$4 sm:$0xff]  }
 0x4e7   :  { %v1790_v49 = vsub.f32 0.0, %v1789_v53  ;;  %v1796_v28 = vrot.slane %v1789_v53, 2  ;;  %v1806_v34 = vrot.slane %v1789_v53, 6  ;;  %v1803_v14 = vrot.slane %v1789_v53, 4  ;;  %v5259_v53 = vld [vmem:[#allocation11 + $0x4c] ss:$16 sps:$4 sm:$0xff]  }
 0x4e9   :  { %v1791_v55 = vmul.f32 1.442695, %v1790_v49  ;;  %v1798_v62 = vsub.f32 0.0, %v1796_v28  ;;  %v1808_v24 = vsub.f32 0.0, %v1806_v34  ;;  %v5256_v28 = vld [vmem:[#allocation11 + $0x44] ss:$16 sps:$4 sm:$0xff]  }
 0x4ea   :  { %v5271_v34 = vld [vmem:[#allocation11 + $0x6c] ss:$16 sps:$4 sm:$0xff]  }
 0x4eb   :  { %3847 = vpow2.f32 %v1791_v55  ;;  %v1799_v11 = vmul.f32 1.442695, %v1798_v62  ;;  %v1809_v23 = vmul.f32 1.442695, %v1808_v24  ;;  %v5262_v55 = vld [vmem:[#allocation11 + $0x40] ss:$16 sps:$4 sm:$0xff]  }
 0x4ec   :  { %v3846_v61 = vpop.eup %3845  ;;  %v5265_v62 = vld [vmem:[#allocation11 + $0x48] ss:$16 sps:$4 sm:$0xff]   ;;  %6608 = vst [vmem:[#allocation30_spill] sm:$0xff] %v5271_v34  ;;  %v5283_v24 = vld [vmem:[#allocation11 + $0x8c] ss:$16 sps:$4 sm:$0xff]  }
 0x4ed   :  { %3849 = vpow2.f32 %v1799_v11  ;;  %v1681_v52 = vmul.f32 %v3846_v61, %v3844_v22  ;;  %v5268_v11 = vld [vmem:[#allocation11 + $0x64] ss:$16 sps:$4 sm:$0xff]   ;;  %v5274_v22 = vld [vmem:[#allocation11 + $0x60] ss:$16 sps:$4 sm:$0xff]   ;;  %v5277_v61 = vld [vmem:[#allocation11 + $0x68] ss:$16 sps:$4 sm:$0xff]  }
 0x4ee   :  { %3851 = vpow2.f32 %v1809_v23  ;;  %6609 = vst [vmem:[#allocation31_spill] sm:$0xff] %v5274_v22  ;;  %6610 = vst [vmem:[#allocation32_spill] sm:$0xff] %v5277_v61 }
 0x4ef   :  { %v1682_v38 = vpack.c.bf16 %v1681_v52, %v1681_v52  ;;  %v5280_v52 = vld [vmem:[#allocation11 + $0x84] ss:$16 sps:$4 sm:$0xff]   ;;  %6612 = vst [vmem:[#allocation34_spill] sm:$0xff] %v5283_v24 }
 0x4f0   :  { %6611 = vst [vmem:[#allocation33_spill] sm:$0xff] %v5280_v52 }
 0x4f1   :  { %1852 = vmatmul.mubr.bf16.vlgmr.msra.gmra.mrb[40].mxu0 %v1682_v38  ;;  %1893 = vmatmul.mubr.bf16.vlgmr.msra.gmra.mrb[40].mxu1 %v1682_v38 }
 0x4f2   :  { %1902 = vmatpush1.bf16.msra.mxu0 %v5236_v25  ;;  %1943 = vmatpush1.bf16.msra.mxu1 %v5239_v17 }
 0x4f3   :  { %1903 = vmatprep.subr.bf16.mxu0 %v5242_v21  ;;  %1944 = vmatprep.subr.bf16.mxu1 %v5245_v20 }
 0x4f4   :  { %1933 = vmatprep.mubr.bf16.mxu0 %v6419_v56  ;;  %1974 = vmatprep.mubr.bf16.mxu1 %v6419_v56 }
 0x4f5   :  { %v3848_v0 = vpop.eup %3847 }
 0x4f6   :  { %v1793_v18 = vadd.f32 1.0, %v3848_v0  ;;  %1904 = vmatpush1.bf16.msra.mxu0 %v5250_v1  ;;  %1945 = vmatpush1.bf16.msra.mxu1 %v5253_v10 }
 0x4f7   :  { %v3850_v2 = vpop.eup %3849  ;;  %1905 = vmatprep.subr.bf16.mxu0 %v5256_v28  ;;  %1946 = vmatprep.subr.bf16.mxu1 %v5259_v53 }
 0x4f8   :  { %3853 = vrcp.f32 %v1793_v18  ;;  %v1801_v49 = vadd.f32 1.0, %v3850_v2  ;;  %v3852_v38 = vpop.eup %3851  ;;  %v5289_v18 = vld [vmem:[#allocation11 + $0x88] ss:$16 sps:$4 sm:$0xff]  }
 0x4f9   :  { %3855 = vtanh.f32 %v1803_v14  ;;  %v5286_v14 = vld [vmem:[#allocation11 + $0x80] ss:$16 sps:$4 sm:$0xff]   ;;  %6614 = vst [vmem:[#allocation36_spill] sm:$0xff] %v5289_v18 }
 0x4fa   :  { %3857 = vrcp.f32 %v1801_v49  ;;  %1906 = vmatpush1.bf16.msra.mxu0 %v5262_v55  ;;  %1947 = vmatpush1.bf16.msra.mxu1 %v5265_v62  ;;  %6613 = vst [vmem:[#allocation35_spill] sm:$0xff] %v5286_v14  ;;  %v1811_v49 = vadd.f32 1.0, %v3852_v38 }
 0x4fb   :  { %1907 = vmatprep.subr.bf16.mxu0 %v5268_v11  ;;  %1948 = vmatprep.subr.bf16.mxu1 %v5271_v34  ;;  %v5299_v34 = vld [vmem:[#allocation11 + $0xa0] ss:$16 sps:$4 sm:$0xff]  }
 0x4fc   :  { %3859 = vrcp.f32 %v1811_v49 }
 0x4fe   :  { %1908 = vmatpush1.bf16.msra.mxu0 %v5274_v22  ;;  %1949 = vmatpush1.bf16.msra.mxu1 %v5277_v61  ;;  %v5292_v61 = vld [vmem:[#allocation11 + $0xa4] ss:$16 sps:$4 sm:$0xff]  }
 0x4ff   :  { %1909 = vmatprep.subr.bf16.mxu0 %v5280_v52  ;;  %1950 = vmatprep.subr.bf16.mxu1 %v5283_v24  ;;  %6615 = vst [vmem:[#allocation37_spill] sm:$0xff] %v5292_v61  ;;  %v5295_v52 = vld [vmem:[#allocation11 + $0xac] ss:$16 sps:$4 sm:$0xff]  }
 0x502   :  { %v3854_v23 = vpop.eup %3853  ;;  %1910 = vmatpush1.bf16.msra.mxu0 %v5286_v14  ;;  %1951 = vmatpush1.bf16.msra.mxu1 %v5289_v18  ;;  %v5302_v14 = vld [vmem:[#allocation11 + $0xa8] ss:$16 sps:$4 sm:$0xff]   ;;  %v5307_v18 = vld [vmem:[#allocation11 + $0xc4] ss:$16 sps:$4 sm:$0xff]  }
 0x503   :  { %v3856_v0 = vpop.eup %3855  ;;  %1911 = vmatprep.subr.bf16.mxu0 %v5292_v61  ;;  %1952 = vmatprep.subr.bf16.mxu1 %v5295_v52  ;;  %v5310_v61 = vld [vmem:[#allocation11 + $0xcc] ss:$16 sps:$4 sm:$0xff]  }
 0x504   :  { %v3858_v2 = vpop.eup %3857  ;;  %v1814_v22 = vmul.f32 %v3856_v0, %v3854_v23  ;;  %v5317_v23 = vld [vmem:[#allocation11 + $0xc8] ss:$16 sps:$4 sm:$0xff]   ;;  %v5326_v0 = vld [vmem:[#allocation11 + $0xe0] ss:$16 sps:$4 sm:$0xff]  }
 0x505   :  { %v1813_v24 = vmul.f32 %v3858_v2, %v5089_v9  ;;  %v5314_v9 = vld [vmem:[#allocation11 + $0xc0] ss:$16 sps:$4 sm:$0xff]   ;;  %6617 = vst [vmem:[#allocation39_spill] sm:$0xff] %v5317_v23  ;;  %v5329_v2 = vld [vmem:[#allocation11 + $0xe8] ss:$16 sps:$4 sm:$0xff]  }
 0x506   :  { %1912 = vmatpush1.bf16.msra.mxu0 %v5299_v34  ;;  %1953 = vmatpush1.bf16.msra.mxu1 %v5302_v14  ;;  %6616 = vst [vmem:[#allocation38_spill] sm:$0xff] %v5314_v9  ;;  %v3860_v49 = vpop.eup %3859 }
 0x507   :  { %v5305_v38 = vadd.f32 %v1814_v22, %v1813_v24  ;;  %1913 = vmatprep.subr.bf16.mxu0 %v5307_v18  ;;  %1954 = vmatprep.subr.bf16.mxu1 %v5310_v61  ;;  %v5320_v22 = vld [vmem:[#allocation11 + $0xe4] ss:$16 sps:$4 sm:$0xff]   ;;  %v5323_v24 = vld [vmem:[#allocation11 + $0xec] ss:$16 sps:$4 sm:$0xff]  }
 0x508   :  { %6618 = vst [vmem:[#allocation40_spill] sm:$0xff] %v5320_v22 }
 0x509   :  { %3861 = vtanh.f32 %v5305_v38 }
 0x50a   :  { %1914 = vmatpush1.bf16.msra.mxu0 %v5314_v9  ;;  %1955 = vmatpush1.bf16.msra.mxu1 %v5317_v23 }
 0x50b   :  { %1915 = vmatprep.subr.bf16.mxu0 %v5320_v22  ;;  %1956 = vmatprep.subr.bf16.mxu1 %v5323_v24 }
 0x50e   :  { %1916 = vmatpush1.bf16.msra.mxu0 %v5326_v0  ;;  %1957 = vmatpush1.bf16.msra.mxu1 %v5329_v2 }
 0x50f   :  { %2011 = vmatprep.subr.bf16.mxu0 %v6549_v63  ;;  %2052 = vmatprep.subr.bf16.mxu1 %v6550_v36  ;;  %v6620_v63 = vld [vmem:[#allocation51_spill] sm:$0xff]  ;;  %v6621_v36 = vld [vmem:[#allocation52_spill] sm:$0xff] }
 0x513   :  { %v3862_v23 = vpop.eup %3861 }
 0x514   :  { %v1817_v9 = vmul.f32 %v3862_v23, %v3860_v49 }
 0x516   :  { %v1818_v22 = vpack.c.bf16 %v1817_v9, %v1817_v9 }
 0x518   :  { %1934 = vmatmul.mubr.bf16.vlgmr.msra.gmra.mrb[44].mxu0 %v1818_v22  ;;  %1975 = vmatmul.mubr.bf16.vlgmr.msra.gmra.mrb[44].mxu1 %v1818_v22 }
 0x519   :  { %2012 = vmatpush1.bf16.msra.mxu0 %v4912_v51  ;;  %2053 = vmatpush1.bf16.msra.mxu1 %v6551_v26  ;;  %v6619_v51 = vld [vmem:[#allocation50_spill] sm:$0xff]  ;;  %v6622_v26 = vld [vmem:[#allocation53_spill] sm:$0xff] }
 0x51a   :  { %2013 = vmatprep.subr.bf16.mxu0 %v6552_v47  ;;  %2054 = vmatprep.subr.bf16.mxu1 %v6553_v58  ;;  %v6623_v47 = vld [vmem:[#allocation54_spill] sm:$0xff]  ;;  %v6625_v58 = vld [vmem:[#allocation60_spill] sm:$0xff] }
 0x51b   :  { %2043 = vmatprep.mubr.bf16.mxu0 %v6419_v56  ;;  %2084 = vmatprep.mubr.bf16.mxu1 %v6419_v56 }
 0x51d   :  { %2014 = vmatpush1.bf16.msra.mxu0 %v6554_v27  ;;  %2055 = vmatpush1.bf16.msra.mxu1 %v6555_v29  ;;  %v6626_v27 = vld [vmem:[#allocation63_spill] sm:$0xff]  ;;  %v6627_v29 = vld [vmem:[#allocation64_spill] sm:$0xff] }
 0x51e   :  { %2015 = vmatprep.subr.bf16.mxu0 %v6556_v30  ;;  %2056 = vmatprep.subr.bf16.mxu1 %v6557_v31  ;;  %v6628_v30 = vld [vmem:[#allocation65_spill] sm:$0xff]  ;;  %v6629_v31 = vld [vmem:[#allocation66_spill] sm:$0xff] }
 0x521   :  { %2016 = vmatpush1.bf16.msra.mxu0 %v6558_v32  ;;  %2057 = vmatpush1.bf16.msra.mxu1 %v6559_v33  ;;  %v6630_v32 = vld [vmem:[#allocation69_spill] sm:$0xff]  ;;  %v6631_v33 = vld [vmem:[#allocation70_spill] sm:$0xff] }
 0x522   :  { %2017 = vmatprep.subr.bf16.mxu0 %v6560_v50  ;;  %2058 = vmatprep.subr.bf16.mxu1 %v6561_v35  ;;  %v6632_v50 = vld [vmem:[#allocation56_spill] sm:$0xff]  ;;  %v6633_v35 = vld [vmem:[#allocation57_spill] sm:$0xff] }
 0x525   :  { %2018 = vmatpush1.bf16.msra.mxu0 %v6562_v40  ;;  %2059 = vmatpush1.bf16.msra.mxu1 %v6563_v41  ;;  %v6634_v40 = vld [vmem:[#allocation58_spill] sm:$0xff]  ;;  %v6635_v41 = vld [vmem:[#allocation59_spill] sm:$0xff] }
 0x526   :  { %2019 = vmatprep.subr.bf16.mxu0 %v6564_v42  ;;  %2060 = vmatprep.subr.bf16.mxu1 %v6565_v43  ;;  %v6636_v42 = vld [vmem:[#allocation61_spill] sm:$0xff]  ;;  %v6637_v43 = vld [vmem:[#allocation62_spill] sm:$0xff] }
 0x529   :  { %2020 = vmatpush1.bf16.msra.mxu0 %v6566_v44  ;;  %2061 = vmatpush1.bf16.msra.mxu1 %v6567_v3  ;;  %v6638_v44 = vld [vmem:[#allocation67_spill] sm:$0xff]  ;;  %v6639_v3 = vld [vmem:[#allocation68_spill] sm:$0xff] }
 0x52a   :  { %2021 = vmatprep.subr.bf16.mxu0 %v6568_v4  ;;  %2062 = vmatprep.subr.bf16.mxu1 %v6569_v5  ;;  %v6640_v4 = vld [vmem:[#allocation71_spill] sm:$0xff]  ;;  %v6641_v5 = vld [vmem:[#allocation72_spill] sm:$0xff] }
 0x52d   :  { %2022 = vmatpush1.bf16.msra.mxu0 %v6570_v6  ;;  %2063 = vmatpush1.bf16.msra.mxu1 %v6571_v7  ;;  %v6642_v6 = vld [vmem:[#allocation20_spill] sm:$0xff]  ;;  %v6643_v7 = vld [vmem:[#allocation21_spill] sm:$0xff] }
 0x52e   :  { %2023 = vmatprep.subr.bf16.mxu0 %v6572_v8  ;;  %2064 = vmatprep.subr.bf16.mxu1 %v6573_v12  ;;  %v6644_v8 = vld [vmem:[#allocation22_spill] sm:$0xff]  ;;  %v6645_v12 = vld [vmem:[#allocation23_spill] sm:$0xff] }
 0x531   :  { %2024 = vmatpush1.bf16.msra.mxu0 %v6574_v13  ;;  %2065 = vmatpush1.bf16.msra.mxu1 %v6575_v16  ;;  %v6646_v13 = vld [vmem:[#allocation24_spill] sm:$0xff]  ;;  %v6647_v16 = vld [vmem:[#allocation25_spill] sm:$0xff] }
 0x532   :  { %2025 = vmatprep.subr.bf16.mxu0 %v4992_v46  ;;  %2066 = vmatprep.subr.bf16.mxu1 %v6576_v37  ;;  %v6624_v46 = vld [vmem:[#allocation55_spill] sm:$0xff]  ;;  %v6648_v37 = vld [vmem:[#allocation26_spill] sm:$0xff] }
 0x535   :  { %2026 = vmatpush1.bf16.msra.mxu0 %v6577_v60  ;;  %2067 = vmatpush1.bf16.msra.mxu1 %v6578_v59  ;;  %v6649_v60 = vld [vmem:[#allocation27_spill] sm:$0xff]  ;;  %v6650_v59 = vld [vmem:[#allocation28_spill] sm:$0xff] }
 0x536   :  { %2145 = vmatprep.subr.bf16.mxu0 %v6579_v48  ;;  %2186 = vmatprep.subr.bf16.mxu1 %v6619_v51  ;;  %v6651_v48 = vld [vmem:[#allocation29_spill] sm:$0xff] }
 0x538   :  { %2044 = vmatmul.mubr.bf16.vlgmr.msra.gmra.mrb[48].mxu0 %v1818_v22  ;;  %2085 = vmatmul.mubr.bf16.vlgmr.msra.gmra.mrb[48].mxu1 %v1818_v22 }
 0x539   :  { %2146 = vmatpush1.bf16.msra.mxu0 %v6620_v63  ;;  %2187 = vmatpush1.bf16.msra.mxu1 %v6621_v36 }
 0x53a   :  { %2147 = vmatprep.subr.bf16.mxu0 %v6622_v26  ;;  %2188 = vmatprep.subr.bf16.mxu1 %v6623_v47 }
 0x53b   :  { %2177 = vmatprep.mubr.bf16.mxu0 %v6419_v56  ;;  %2218 = vmatprep.mubr.bf16.mxu1 %v6419_v56 }
 0x53d   :  { %2148 = vmatpush1.bf16.msra.mxu0 %v6624_v46  ;;  %2189 = vmatpush1.bf16.msra.mxu1 %v6625_v58 }
 0x53e   :  { %2149 = vmatprep.subr.bf16.mxu0 %v6626_v27  ;;  %2190 = vmatprep.subr.bf16.mxu1 %v6627_v29 }
 0x541   :  { %2150 = vmatpush1.bf16.msra.mxu0 %v6628_v30  ;;  %2191 = vmatpush1.bf16.msra.mxu1 %v6629_v31 }
 0x542   :  { %2151 = vmatprep.subr.bf16.mxu0 %v6630_v32  ;;  %2192 = vmatprep.subr.bf16.mxu1 %v6631_v33 }
 0x545   :  { %2152 = vmatpush1.bf16.msra.mxu0 %v6632_v50  ;;  %2193 = vmatpush1.bf16.msra.mxu1 %v6633_v35 }
 0x546   :  { %2153 = vmatprep.subr.bf16.mxu0 %v6634_v40  ;;  %2194 = vmatprep.subr.bf16.mxu1 %v6635_v41 }
 0x549   :  { %2154 = vmatpush1.bf16.msra.mxu0 %v6636_v42  ;;  %2195 = vmatpush1.bf16.msra.mxu1 %v6637_v43 }
 0x54a   :  { %2155 = vmatprep.subr.bf16.mxu0 %v6638_v44  ;;  %2196 = vmatprep.subr.bf16.mxu1 %v6639_v3 }
 0x54d   :  { %2156 = vmatpush1.bf16.msra.mxu0 %v6640_v4  ;;  %2197 = vmatpush1.bf16.msra.mxu1 %v6641_v5 }
 0x54e   :  { %2157 = vmatprep.subr.bf16.mxu0 %v6642_v6  ;;  %2198 = vmatprep.subr.bf16.mxu1 %v6643_v7 }
 0x551   :  { %2158 = vmatpush1.bf16.msra.mxu0 %v6644_v8  ;;  %2199 = vmatpush1.bf16.msra.mxu1 %v6645_v12 }
 0x552   :  { %2159 = vmatprep.subr.bf16.mxu0 %v6646_v13  ;;  %2200 = vmatprep.subr.bf16.mxu1 %v6647_v16 }
 0x555   :  { %2160 = vmatpush1.bf16.msra.mxu0 %v6648_v37  ;;  %2201 = vmatpush1.bf16.msra.mxu1 %v6649_v60 }
 0x556   :  { %2227 = vmatprep.subr.bf16.mxu0 %v6650_v59  ;;  %2268 = vmatprep.subr.bf16.mxu1 %v6651_v48 }
 0x5c4   :  { %v1853_v9 = vpop.f32.mrb[40].mxu0  ;;  %v1894_v23 = vpop.f32.mrb[40].mxu1 }
 0x5c5   :  { %v1855_v22 = vpop.f32.mrb[41].mxu0  ;;  %v1896_v49 = vpop.f32.mrb[41].mxu1 }
 0x5c6   :  { %v1857_v51 = vpop.f32.mrb[42].mxu0  ;;  %v1898_v63 = vpop.f32.mrb[42].mxu1 }
 0x5c7   :  { %v1858_v36 = vpop.f32.mrb[43].mxu0  ;;  %v1899_v26 = vpop.f32.mrb[43].mxu1 }
 0x5eb   :  { %v1935_v47 = vpop.f32.mrb[44].mxu0  ;;  %v1976_v13 = vpop.f32.mrb[44].mxu1 }
 0x5ec   :  { %v1936_v12 = vadd.f32 %v1935_v47, %v1853_v9  ;;  %v1977_v16 = vadd.f32 %v1976_v13, %v1894_v23  ;;  %v1937_v8 = vpop.f32.mrb[45].mxu0  ;;  %v1978_v37 = vpop.f32.mrb[45].mxu1 }
 0x5ed   :  { %v1938_v7 = vadd.f32 %v1937_v8, %v1855_v22  ;;  %v1979_v60 = vadd.f32 %v1978_v37, %v1896_v49  ;;  %v1939_v6 = vpop.f32.mrb[46].mxu0  ;;  %v1980_v59 = vpop.f32.mrb[46].mxu1 }
 0x5ee   :  { %v1983_v48 = vadd.f32 %v1936_v12, %v4847_v39  ;;  %v1940_v5 = vpop.f32.mrb[47].mxu0  ;;  %v1981_v4 = vpop.f32.mrb[47].mxu1  ;;  %v1985_v8 = vadd.f32 %v1977_v16, %v4858_v15 }
 0x5ef   :  { %v1984_v3 = vadd.f32 %v1938_v7, %v4849_v54  ;;  %v1986_v44 = vadd.f32 %v1979_v60, %v4854_v45 }
 0x5f0   :  { %v1987_v51 = vsub.f32 0.0, %v1983_v48 }
 0x5f1   :  { %v1992_v63 = vsub.f32 0.0, %v1984_v3  ;;  %v1998_v13 = vsub.f32 0.0, %v1986_v44 }
 0x5f2   :  { %v1988_v36 = vmul.f32 1.442695, %v1987_v51 }
 0x5f3   :  { %v1993_v26 = vmul.f32 1.442695, %v1992_v63  ;;  %v1999_v9 = vmul.f32 1.442695, %v1998_v13 }
 0x5f4   :  { %3863 = vpow2.f32 %v1988_v36 }
 0x5f5   :  { %3865 = vpow2.f32 %v1993_v26 }
 0x5f6   :  { %3867 = vpow2.f32 %v1999_v9 }
 0x5f7   :  { %3869 = vtanh.f32 %v1985_v8 }
 0x5fe   :  { %v3864_v6 = vpop.eup %3863 }
 0x5ff   :  { %v3866_v37 = vpop.eup %3865  ;;  %v1990_v59 = vadd.f32 1.0, %v3864_v6 }
 0x600   :  { %v1995_v4 = vadd.f32 1.0, %v3866_v37  ;;  %v3868_v5 = vpop.eup %3867  ;;  %v2010_v37 = vld [vmem:[#allocation6 + $0x20] sm:$0xff] }
 0x601   :  { %3871 = vrcp.f32 %v1990_v59  ;;  %v3870_v3 = vpop.eup %3869  ;;  %v2001_v22 = vadd.f32 1.0, %v3868_v5 }
 0x602   :  { %3873 = vrcp.f32 %v1995_v4 }
 0x603   :  { %3875 = vrcp.f32 %v2001_v22 }
 0x60b   :  { %v3872_v7 = vpop.eup %3871  ;;  %v2045_v12 = vpop.f32.mrb[48].mxu0 }
 0x60c   :  { %v2086_v48 = vpop.f32.mrb[48].mxu1  ;;  %v3874_v60 = vpop.eup %3873  ;;  %v2004_v23 = vmul.f32 %v3872_v7, %v3870_v3 }
 0x60d   :  { %v2047_v44 = vpop.f32.mrb[49].mxu0  ;;  %v2088_v49 = vpop.f32.mrb[49].mxu1  ;;  %v2003_v16 = vmul.f32 %v3874_v60, %v5231_v19 }
 0x60e   :  { %v2097_v47 = vcombine.low %v2045_v12, %v2047_v44  ;;  %v2098_v51 = vcombine.low %v2086_v48, %v2088_v49  ;;  %v2049_v63 = vpop.f32.mrb[50].mxu0  ;;  %v2090_v36 = vpop.f32.mrb[50].mxu1 }
 0x60f   :  { %v2050_v26 = vpop.f32.mrb[51].mxu0  ;;  %v2091_v13 = vpop.f32.mrb[51].mxu1  ;;  %v5407_v9 = vadd.f32 %v2004_v23, %v2003_v16 }
 0x610   :  { %v2105_v8 = vrot.slane %v2097_v47, %v4767_v57  ;;  %v2112_v6 = vrot.slane %v2098_v51, %v4767_v57  ;;  %v3876_v60 = vpop.eup %3875  ;;  %v6652_v13 = vld [vmem:[#allocation30_spill] sm:$0xff] }
 0x611   :  { %3877 = vtanh.f32 %v5407_v9 }
 0x612   :  { %v2113_v59 = vcombine.low %v2105_v8, %v2112_v6  ;;  %v6653_v8 = vld [vmem:[#allocation31_spill] sm:$0xff]  ;;  %v6654_v6 = vld [vmem:[#allocation32_spill] sm:$0xff] }
 0x614   :  { %v2115_v4 = vadd.f32 %v2113_v59, %v2010_v37  ;;  %v6655_v37 = vld [vmem:[#allocation33_spill] sm:$0xff]  ;;  %v6656_v59 = vld [vmem:[#allocation34_spill] sm:$0xff] }
 0x616   :  { %v2116_v5 = vsub.f32 0.0, %v2115_v4  ;;  %v2122_v19 = vrot.slane %v2115_v4, 2  ;;  %v2132_v48 = vrot.slane %v2115_v4, 6  ;;  %v2129_v51 = vrot.slane %v2115_v4, 4 }
 0x618   :  { %v2117_v3 = vmul.f32 1.442695, %v2116_v5  ;;  %v2124_v7 = vsub.f32 0.0, %v2122_v19  ;;  %v2134_v49 = vsub.f32 0.0, %v2132_v48 }
 0x61a   :  { %3879 = vpow2.f32 %v2117_v3  ;;  %v2125_v12 = vmul.f32 1.442695, %v2124_v7  ;;  %v2135_v22 = vmul.f32 1.442695, %v2134_v49  ;;  %v6657_v3 = vld [vmem:[#allocation35_spill] sm:$0xff]  ;;  %v6658_v7 = vld [vmem:[#allocation36_spill] sm:$0xff] }
 0x61b   :  { %v3878_v23 = vpop.eup %3877 }
 0x61c   :  { %3881 = vpow2.f32 %v2125_v12  ;;  %v2007_v44 = vmul.f32 %v3878_v23, %v3876_v60  ;;  %v6659_v60 = vld [vmem:[#allocation37_spill] sm:$0xff] }
 0x61d   :  { %3883 = vpow2.f32 %v2135_v22  ;;  %v6661_v22 = vld [vmem:[#allocation39_spill] sm:$0xff] }
 0x61e   :  { %v2008_v16 = vpack.c.bf16 %v2007_v44, %v2007_v44 }
 0x620   :  { %2178 = vmatmul.mubr.bf16.vlgmr.msra.gmra.mrb[52].mxu0 %v2008_v16  ;;  %2219 = vmatmul.mubr.bf16.vlgmr.msra.gmra.mrb[52].mxu1 %v2008_v16  ;;  %v6660_v16 = vld [vmem:[#allocation38_spill] sm:$0xff] }
 0x621   :  { %2228 = vmatpush1.bf16.msra.mxu0 %v5236_v25  ;;  %2269 = vmatpush1.bf16.msra.mxu1 %v5239_v17 }
 0x622   :  { %2229 = vmatprep.subr.bf16.mxu0 %v5242_v21  ;;  %2270 = vmatprep.subr.bf16.mxu1 %v5245_v20 }
 0x623   :  { %2259 = vmatprep.mubr.bf16.mxu0 %v6419_v56  ;;  %2300 = vmatprep.mubr.bf16.mxu1 %v6419_v56 }
 0x624   :  { %v3880_v47 = vpop.eup %3879 }
 0x625   :  { %v2119_v63 = vadd.f32 1.0, %v3880_v47  ;;  %2230 = vmatpush1.bf16.msra.mxu0 %v5250_v1  ;;  %2271 = vmatpush1.bf16.msra.mxu1 %v5253_v10  ;;  %v6662_v47 = vld [vmem:[#allocation40_spill] sm:$0xff] }
 0x626   :  { %v3882_v36 = vpop.eup %3881  ;;  %2231 = vmatprep.subr.bf16.mxu0 %v5256_v28  ;;  %2272 = vmatprep.subr.bf16.mxu1 %v5259_v53 }
 0x627   :  { %3885 = vrcp.f32 %v2119_v63  ;;  %v2127_v26 = vadd.f32 1.0, %v3882_v36  ;;  %v3884_v4 = vpop.eup %3883 }
 0x628   :  { %3887 = vtanh.f32 %v2129_v51  ;;  %v2137_v48 = vadd.f32 1.0, %v3884_v4  ;;  %v5451_v51 = vld [vmem:[#allocation9 + $0xc] ss:$16 sps:$4 sm:$0xff]  }
 0x629   :  { %3889 = vrcp.f32 %v2127_v26  ;;  %2232 = vmatpush1.bf16.msra.mxu0 %v5262_v55  ;;  %2273 = vmatpush1.bf16.msra.mxu1 %v5265_v62 }
 0x62a   :  { %2233 = vmatprep.subr.bf16.mxu0 %v5268_v11  ;;  %2274 = vmatprep.subr.bf16.mxu1 %v6652_v13  ;;  %3891 = vrcp.f32 %v2137_v48  ;;  %v5467_v48 = vld [vmem:[#allocation9 + $0x2c] ss:$16 sps:$4 sm:$0xff]  }
 0x62b   :  { %6665 = vst [vmem:[#allocation73_spill] sm:$0xff] %v5467_v48 }
 0x62d   :  { %2234 = vmatpush1.bf16.msra.mxu0 %v6653_v8  ;;  %2275 = vmatpush1.bf16.msra.mxu1 %v6654_v6 }
 0x62e   :  { %2235 = vmatprep.subr.bf16.mxu0 %v6655_v37  ;;  %2276 = vmatprep.subr.bf16.mxu1 %v6656_v59 }
 0x631   :  { %v3886_v5 = vpop.eup %3885  ;;  %2236 = vmatpush1.bf16.msra.mxu0 %v6657_v3  ;;  %2277 = vmatpush1.bf16.msra.mxu1 %v6658_v7 }
 0x632   :  { %v3888_v19 = vpop.eup %3887  ;;  %2237 = vmatprep.subr.bf16.mxu0 %v6659_v60  ;;  %2278 = vmatprep.subr.bf16.mxu1 %v5295_v52 }
 0x633   :  { %v3890_v12 = vpop.eup %3889  ;;  %v2140_v44 = vmul.f32 %v3888_v19, %v3886_v5  ;;  %v5458_v5 = vld [vmem:[#allocation9] ss:$16 sps:$4 sm:$0xff]   ;;  %v5461_v19 = vld [vmem:[#allocation9 + $0x8] ss:$16 sps:$4 sm:$0xff]  }
 0x634   :  { %v2139_v23 = vmul.f32 %v3890_v12, %v5305_v38  ;;  %v5448_v38 = vld [vmem:[#allocation9 + $0x4] ss:$16 sps:$4 sm:$0xff]   ;;  %v3892_v63 = vpop.eup %3891  ;;  %6663 = vst [vmem:[#allocation41_spill] sm:$0xff] %v5461_v19 }
 0x635   :  { %2238 = vmatpush1.bf16.msra.mxu0 %v5299_v34  ;;  %2279 = vmatpush1.bf16.msra.mxu1 %v5302_v14  ;;  %v5464_v12 = vld [vmem:[#allocation9 + $0x24] ss:$16 sps:$4 sm:$0xff]  }
 0x636   :  { %v5437_v49 = vadd.f32 %v2140_v44, %v2139_v23  ;;  %2239 = vmatprep.subr.bf16.mxu0 %v5307_v18  ;;  %2280 = vmatprep.subr.bf16.mxu1 %v5310_v61  ;;  %6664 = vst [vmem:[#allocation42_spill] sm:$0xff] %v5464_v12  ;;  %v5472_v23 = vld [vmem:[#allocation9 + $0x20] ss:$16 sps:$4 sm:$0xff]   ;;  %v5475_v44 = vld [vmem:[#allocation9 + $0x28] ss:$16 sps:$4 sm:$0xff]  }
 0x637   :  { %6666 = vst [vmem:[#allocation43_spill] sm:$0xff] %v5472_v23  ;;  %6667 = vst [vmem:[#allocation44_spill] sm:$0xff] %v5475_v44 }
 0x638   :  { %3893 = vtanh.f32 %v5437_v49 }
 0x639   :  { %2240 = vmatpush1.bf16.msra.mxu0 %v6660_v16  ;;  %2281 = vmatpush1.bf16.msra.mxu1 %v6661_v22 }
 0x63a   :  { %2241 = vmatprep.subr.bf16.mxu0 %v6662_v47  ;;  %2282 = vmatprep.subr.bf16.mxu1 %v5323_v24 }
 0x63d   :  { %2242 = vmatpush1.bf16.msra.mxu0 %v5326_v0  ;;  %2283 = vmatpush1.bf16.msra.mxu1 %v5329_v2 }
 0x63e   :  { %2337 = vmatprep.subr.bf16.mxu0 %v5448_v38  ;;  %2378 = vmatprep.subr.bf16.mxu1 %v5451_v51 }
 0x642   :  { %v3894_v36 = vpop.eup %3893 }
 0x643   :  { %v2143_v26 = vmul.f32 %v3894_v36, %v3892_v63  ;;  %v5478_v63 = vld [vmem:[#allocation9 + $0x44] ss:$16 sps:$4 sm:$0xff]   ;;  %v5481_v36 = vld [vmem:[#allocation9 + $0x4c] ss:$16 sps:$4 sm:$0xff]  }
 0x644   :  { %6668 = vst [vmem:[#allocation45_spill] sm:$0xff] %v5478_v63  ;;  %6669 = vst [vmem:[#allocation46_spill] sm:$0xff] %v5481_v36 }
 0x645   :  { %v5454_v4 = vpack.c.bf16 %v2143_v26, %v2143_v26  ;;  %v5484_v26 = vld [vmem:[#allocation9 + $0x40] ss:$16 sps:$4 sm:$0xff]  }
 0x646   :  { %6670 = vst [vmem:[#allocation47_spill] sm:$0xff] %v5484_v26 }
 0x647   :  { %2260 = vmatmul.mubr.bf16.vlgmr.msra.gmra.mrb[56].mxu0 %v5454_v4  ;;  %2301 = vmatmul.mubr.bf16.vlgmr.msra.gmra.mrb[56].mxu1 %v5454_v4 }
 0x648   :  { %2338 = vmatpush1.bf16.msra.mxu0 %v5458_v5  ;;  %2379 = vmatpush1.bf16.msra.mxu1 %v5461_v19 }
 0x649   :  { %2339 = vmatprep.subr.bf16.mxu0 %v5464_v12  ;;  %2380 = vmatprep.subr.bf16.mxu1 %v5467_v48  ;;  %v5487_v48 = vld [vmem:[#allocation9 + $0x48] ss:$16 sps:$4 sm:$0xff]  }
 0x64a   :  { %2369 = vmatprep.mubr.bf16.mxu0 %v6419_v56  ;;  %2410 = vmatprep.mubr.bf16.mxu1 %v6419_v56  ;;  %6671 = vst [vmem:[#allocation48_spill] sm:$0xff] %v5487_v48 }
 0x64c   :  { %2340 = vmatpush1.bf16.msra.mxu0 %v5472_v23  ;;  %2381 = vmatpush1.bf16.msra.mxu1 %v5475_v44  ;;  %v5490_v23 = vld [vmem:[#allocation9 + $0x64] ss:$16 sps:$4 sm:$0xff]   ;;  %v5493_v44 = vld [vmem:[#allocation9 + $0x6c] ss:$16 sps:$4 sm:$0xff]  }
 0x64d   :  { %2341 = vmatprep.subr.bf16.mxu0 %v5478_v63  ;;  %2382 = vmatprep.subr.bf16.mxu1 %v5481_v36  ;;  %6672 = vst [vmem:[#allocation49_spill] sm:$0xff] %v5490_v23  ;;  %6673 = vst [vmem:[#allocation50_spill] sm:$0xff] %v5493_v44  ;;  %v5496_v63 = vld [vmem:[#allocation9 + $0x60] ss:$16 sps:$4 sm:$0xff]   ;;  %v5499_v36 = vld [vmem:[#allocation9 + $0x68] ss:$16 sps:$4 sm:$0xff]  }
 0x64e   :  { %6674 = vst [vmem:[#allocation51_spill] sm:$0xff] %v5496_v63  ;;  %6675 = vst [vmem:[#allocation52_spill] sm:$0xff] %v5499_v36 }
 0x650   :  { %2342 = vmatpush1.bf16.msra.mxu0 %v5484_v26  ;;  %2383 = vmatpush1.bf16.msra.mxu1 %v5487_v48  ;;  %v5502_v26 = vld [vmem:[#allocation9 + $0x84] ss:$16 sps:$4 sm:$0xff]   ;;  %v5505_v48 = vld [vmem:[#allocation9 + $0x8c] ss:$16 sps:$4 sm:$0xff]  }
 0x651   :  { %2343 = vmatprep.subr.bf16.mxu0 %v5490_v23  ;;  %2384 = vmatprep.subr.bf16.mxu1 %v5493_v44  ;;  %6676 = vst [vmem:[#allocation53_spill] sm:$0xff] %v5502_v26  ;;  %6677 = vst [vmem:[#allocation54_spill] sm:$0xff] %v5505_v48  ;;  %v5508_v23 = vld [vmem:[#allocation9 + $0x80] ss:$16 sps:$4 sm:$0xff]   ;;  %v5511_v44 = vld [vmem:[#allocation9 + $0x88] ss:$16 sps:$4 sm:$0xff]  }
 0x652   :  { %6678 = vst [vmem:[#allocation55_spill] sm:$0xff] %v5508_v23  ;;  %6679 = vst [vmem:[#allocation60_spill] sm:$0xff] %v5511_v44 }
 0x654   :  { %2344 = vmatpush1.bf16.msra.mxu0 %v5496_v63  ;;  %2385 = vmatpush1.bf16.msra.mxu1 %v5499_v36  ;;  %v5514_v63 = vld [vmem:[#allocation9 + $0xa4] ss:$16 sps:$4 sm:$0xff]   ;;  %v5517_v36 = vld [vmem:[#allocation9 + $0xac] ss:$16 sps:$4 sm:$0xff]  }
 0x655   :  { %2345 = vmatprep.subr.bf16.mxu0 %v5502_v26  ;;  %2386 = vmatprep.subr.bf16.mxu1 %v5505_v48  ;;  %6680 = vst [vmem:[#allocation63_spill] sm:$0xff] %v5514_v63  ;;  %6681 = vst [vmem:[#allocation64_spill] sm:$0xff] %v5517_v36  ;;  %v5520_v26 = vld [vmem:[#allocation9 + $0xa0] ss:$16 sps:$4 sm:$0xff]   ;;  %v5523_v48 = vld [vmem:[#allocation9 + $0xa8] ss:$16 sps:$4 sm:$0xff]  }
 0x656   :  { %6682 = vst [vmem:[#allocation65_spill] sm:$0xff] %v5520_v26  ;;  %6683 = vst [vmem:[#allocation66_spill] sm:$0xff] %v5523_v48 }
 0x658   :  { %2346 = vmatpush1.bf16.msra.mxu0 %v5508_v23  ;;  %2387 = vmatpush1.bf16.msra.mxu1 %v5511_v44  ;;  %v5526_v23 = vld [vmem:[#allocation9 + $0xc4] ss:$16 sps:$4 sm:$0xff]   ;;  %v5529_v44 = vld [vmem:[#allocation9 + $0xcc] ss:$16 sps:$4 sm:$0xff]  }
 0x659   :  { %2347 = vmatprep.subr.bf16.mxu0 %v5514_v63  ;;  %2388 = vmatprep.subr.bf16.mxu1 %v5517_v36  ;;  %6684 = vst [vmem:[#allocation69_spill] sm:$0xff] %v5526_v23  ;;  %6685 = vst [vmem:[#allocation70_spill] sm:$0xff] %v5529_v44  ;;  %v5532_v63 = vld [vmem:[#allocation9 + $0xc0] ss:$16 sps:$4 sm:$0xff]   ;;  %v5535_v36 = vld [vmem:[#allocation9 + $0xc8] ss:$16 sps:$4 sm:$0xff]  }
 0x65a   :  { %6686 = vst [vmem:[#allocation56_spill] sm:$0xff] %v5532_v63  ;;  %6687 = vst [vmem:[#allocation57_spill] sm:$0xff] %v5535_v36 }
 0x65c   :  { %2348 = vmatpush1.bf16.msra.mxu0 %v5520_v26  ;;  %2389 = vmatpush1.bf16.msra.mxu1 %v5523_v48  ;;  %v5538_v26 = vld [vmem:[#allocation9 + $0xe4] ss:$16 sps:$4 sm:$0xff]   ;;  %v5541_v48 = vld [vmem:[#allocation9 + $0xec] ss:$16 sps:$4 sm:$0xff]  }
 0x65d   :  { %2349 = vmatprep.subr.bf16.mxu0 %v5526_v23  ;;  %2390 = vmatprep.subr.bf16.mxu1 %v5529_v44  ;;  %6688 = vst [vmem:[#allocation58_spill] sm:$0xff] %v5538_v26  ;;  %6689 = vst [vmem:[#allocation59_spill] sm:$0xff] %v5541_v48  ;;  %v5544_v23 = vld [vmem:[#allocation9 + $0xe0] ss:$16 sps:$4 sm:$0xff]   ;;  %v5547_v44 = vld [vmem:[#allocation9 + $0xe8] ss:$16 sps:$4 sm:$0xff]  }
 0x65e   :  { %6690 = vst [vmem:[#allocation61_spill] sm:$0xff] %v5544_v23  ;;  %6691 = vst [vmem:[#allocation62_spill] sm:$0xff] %v5547_v44 }
 0x660   :  { %2350 = vmatpush1.bf16.msra.mxu0 %v5532_v63  ;;  %2391 = vmatpush1.bf16.msra.mxu1 %v5535_v36  ;;  %v5550_v63 = vld [vmem:[#allocation12 + $0x4] ss:$16 sps:$4 sm:$0xff]   ;;  %v5553_v36 = vld [vmem:[#allocation12 + $0xc] ss:$16 sps:$4 sm:$0xff]  }
 0x661   :  { %2351 = vmatprep.subr.bf16.mxu0 %v5538_v26  ;;  %2392 = vmatprep.subr.bf16.mxu1 %v5541_v48  ;;  %6692 = vst [vmem:[#allocation30_spill] sm:$0xff] %v5550_v63  ;;  %6693 = vst [vmem:[#allocation31_spill] sm:$0xff] %v5553_v36  ;;  %v5558_v48 = vld [vmem:[#allocation12] ss:$16 sps:$4 sm:$0xff]  }
 0x662   :  { %6694 = vst [vmem:[#allocation32_spill] sm:$0xff] %v5558_v48 }
 0x664   :  { %2352 = vmatpush1.bf16.msra.mxu0 %v5544_v23  ;;  %2393 = vmatpush1.bf16.msra.mxu1 %v5547_v44  ;;  %v5561_v23 = vld [vmem:[#allocation12 + $0x8] ss:$16 sps:$4 sm:$0xff]   ;;  %v5564_v44 = vld [vmem:[#allocation12 + $0x24] ss:$16 sps:$4 sm:$0xff]  }
 0x665   :  { %2471 = vmatprep.subr.bf16.mxu0 %v5550_v63  ;;  %2512 = vmatprep.subr.bf16.mxu1 %v5553_v36  ;;  %6695 = vst [vmem:[#allocation33_spill] sm:$0xff] %v5561_v23  ;;  %6696 = vst [vmem:[#allocation34_spill] sm:$0xff] %v5564_v44  ;;  %v5567_v63 = vld [vmem:[#allocation12 + $0x2c] ss:$16 sps:$4 sm:$0xff]  }
 0x666   :  { %6697 = vst [vmem:[#allocation35_spill] sm:$0xff] %v5567_v63 }
 0x667   :  { %2370 = vmatmul.mubr.bf16.vlgmr.msra.gmra.mrb[60].mxu0 %v5454_v4  ;;  %2411 = vmatmul.mubr.bf16.vlgmr.msra.gmra.mrb[60].mxu1 %v5454_v4 }
 0x668   :  { %2472 = vmatpush1.bf16.msra.mxu0 %v5558_v48  ;;  %2513 = vmatpush1.bf16.msra.mxu1 %v5561_v23 }
 0x669   :  { %2473 = vmatprep.subr.bf16.mxu0 %v5564_v44  ;;  %2514 = vmatprep.subr.bf16.mxu1 %v5567_v63 }
 0x66a   :  { %2503 = vmatprep.mubr.bf16.mxu0 %v6419_v56  ;;  %2544 = vmatprep.mubr.bf16.mxu1 %v6419_v56 }
 0x66c   :  { %2474 = vmatpush1.bf16.msra.mxu0 %v6624_v46  ;;  %2515 = vmatpush1.bf16.msra.mxu1 %v6625_v58  ;;  %v6698_v46 = vld [vmem:[#allocation67_spill] sm:$0xff]  ;;  %v6699_v58 = vld [vmem:[#allocation68_spill] sm:$0xff] }
 0x66d   :  { %2475 = vmatprep.subr.bf16.mxu0 %v6626_v27  ;;  %2516 = vmatprep.subr.bf16.mxu1 %v6627_v29  ;;  %v6700_v27 = vld [vmem:[#allocation71_spill] sm:$0xff]  ;;  %v6701_v29 = vld [vmem:[#allocation72_spill] sm:$0xff] }
 0x670   :  { %2476 = vmatpush1.bf16.msra.mxu0 %v6628_v30  ;;  %2517 = vmatpush1.bf16.msra.mxu1 %v6629_v31  ;;  %v6702_v30 = vld [vmem:[#allocation20_spill] sm:$0xff]  ;;  %v6703_v31 = vld [vmem:[#allocation21_spill] sm:$0xff] }
 0x671   :  { %2477 = vmatprep.subr.bf16.mxu0 %v6630_v32  ;;  %2518 = vmatprep.subr.bf16.mxu1 %v6631_v33  ;;  %v6704_v32 = vld [vmem:[#allocation22_spill] sm:$0xff]  ;;  %v6705_v33 = vld [vmem:[#allocation23_spill] sm:$0xff] }
 0x674   :  { %2478 = vmatpush1.bf16.msra.mxu0 %v6632_v50  ;;  %2519 = vmatpush1.bf16.msra.mxu1 %v6633_v35  ;;  %v6706_v50 = vld [vmem:[#allocation24_spill] sm:$0xff]  ;;  %v6707_v35 = vld [vmem:[#allocation25_spill] sm:$0xff] }
 0x675   :  { %2479 = vmatprep.subr.bf16.mxu0 %v6634_v40  ;;  %2520 = vmatprep.subr.bf16.mxu1 %v6635_v41  ;;  %v6708_v40 = vld [vmem:[#allocation26_spill] sm:$0xff]  ;;  %v6709_v41 = vld [vmem:[#allocation27_spill] sm:$0xff] }
 0x678   :  { %2480 = vmatpush1.bf16.msra.mxu0 %v6636_v42  ;;  %2521 = vmatpush1.bf16.msra.mxu1 %v6637_v43  ;;  %v6710_v42 = vld [vmem:[#allocation28_spill] sm:$0xff]  ;;  %v6711_v43 = vld [vmem:[#allocation29_spill] sm:$0xff] }
 0x679   :  { %2481 = vmatprep.subr.bf16.mxu0 %v6698_v46  ;;  %2522 = vmatprep.subr.bf16.mxu1 %v6699_v58 }
 0x67c   :  { %2482 = vmatpush1.bf16.msra.mxu0 %v6700_v27  ;;  %2523 = vmatpush1.bf16.msra.mxu1 %v6701_v29 }
 0x67d   :  { %2483 = vmatprep.subr.bf16.mxu0 %v6702_v30  ;;  %2524 = vmatprep.subr.bf16.mxu1 %v6703_v31 }
 0x680   :  { %2484 = vmatpush1.bf16.msra.mxu0 %v6704_v32  ;;  %2525 = vmatpush1.bf16.msra.mxu1 %v6705_v33 }
 0x681   :  { %2485 = vmatprep.subr.bf16.mxu0 %v6706_v50  ;;  %2526 = vmatprep.subr.bf16.mxu1 %v6707_v35 }
 0x684   :  { %2486 = vmatpush1.bf16.msra.mxu0 %v6708_v40  ;;  %2527 = vmatpush1.bf16.msra.mxu1 %v6709_v41 }
 0x685   :  { %2553 = vmatprep.subr.bf16.mxu0 %v6710_v42  ;;  %2594 = vmatprep.subr.bf16.mxu1 %v6711_v43 }
 0x6f3   :  { %v2179_v4 = vpop.f32.mrb[52].mxu0  ;;  %v2220_v46 = vpop.f32.mrb[52].mxu1 }
 0x6f4   :  { %v2181_v58 = vpop.f32.mrb[53].mxu0  ;;  %v2222_v27 = vpop.f32.mrb[53].mxu1 }
 0x6f5   :  { %v2183_v29 = vpop.f32.mrb[54].mxu0  ;;  %v2224_v30 = vpop.f32.mrb[54].mxu1 }
 0x6f6   :  { %v2184_v31 = vpop.f32.mrb[55].mxu0  ;;  %v2225_v32 = vpop.f32.mrb[55].mxu1 }
 0x71a   :  { %v2261_v33 = vpop.f32.mrb[56].mxu0  ;;  %v2302_v50 = vpop.f32.mrb[56].mxu1 }
 0x71b   :  { %v2262_v63 = vadd.f32 %v2261_v33, %v2179_v4  ;;  %v2303_v35 = vadd.f32 %v2302_v50, %v2220_v46  ;;  %v2263_v44 = vpop.f32.mrb[57].mxu0  ;;  %v2304_v40 = vpop.f32.mrb[57].mxu1 }
 0x71c   :  { %v2264_v23 = vadd.f32 %v2263_v44, %v2181_v58  ;;  %v2305_v41 = vadd.f32 %v2304_v40, %v2222_v27  ;;  %v2265_v48 = vpop.f32.mrb[58].mxu0  ;;  %v2306_v42 = vpop.f32.mrb[58].mxu1 }
 0x71d   :  { %v2309_v43 = vadd.f32 %v2262_v63, %v4847_v39  ;;  %v2266_v36 = vpop.f32.mrb[59].mxu0  ;;  %v2307_v26 = vpop.f32.mrb[59].mxu1  ;;  %v2311_v44 = vadd.f32 %v2303_v35, %v4858_v15 }
 0x71e   :  { %v2310_v12 = vadd.f32 %v2264_v23, %v4849_v54  ;;  %v2312_v19 = vadd.f32 %v2305_v41, %v4854_v45 }
 0x71f   :  { %v2313_v29 = vsub.f32 0.0, %v2309_v43 }
 0x720   :  { %v2318_v30 = vsub.f32 0.0, %v2310_v12  ;;  %v2324_v4 = vsub.f32 0.0, %v2312_v19 }
 0x721   :  { %v2314_v31 = vmul.f32 1.442695, %v2313_v29 }
 0x722   :  { %v2319_v32 = vmul.f32 1.442695, %v2318_v30  ;;  %v2325_v46 = vmul.f32 1.442695, %v2324_v4 }
 0x723   :  { %3895 = vpow2.f32 %v2314_v31 }
 0x724   :  { %3897 = vpow2.f32 %v2319_v32 }
 0x725   :  { %3899 = vpow2.f32 %v2325_v46 }
 0x726   :  { %3901 = vtanh.f32 %v2311_v44 }
 0x72d   :  { %v3896_v48 = vpop.eup %3895 }
 0x72e   :  { %v3898_v58 = vpop.eup %3897  ;;  %v2316_v27 = vadd.f32 1.0, %v3896_v48 }
 0x72f   :  { %v2321_v63 = vadd.f32 1.0, %v3898_v58  ;;  %v3900_v23 = vpop.eup %3899  ;;  %v2336_v58 = vld [vmem:[#allocation6 + $0x28] sm:$0xff] }
 0x730   :  { %3903 = vrcp.f32 %v2316_v27  ;;  %v3902_v12 = vpop.eup %3901  ;;  %v2327_v41 = vadd.f32 1.0, %v3900_v23 }
 0x731   :  { %3905 = vrcp.f32 %v2321_v63 }
 0x732   :  { %3907 = vrcp.f32 %v2327_v41 }
 0x73a   :  { %v3904_v36 = vpop.eup %3903  ;;  %v2371_v26 = vpop.f32.mrb[60].mxu0 }
 0x73b   :  { %v2412_v33 = vpop.f32.mrb[60].mxu1  ;;  %v3906_v50 = vpop.eup %3905  ;;  %v2330_v40 = vmul.f32 %v3904_v36, %v3902_v12 }
 0x73c   :  { %v2373_v19 = vpop.f32.mrb[61].mxu0  ;;  %v2414_v42 = vpop.f32.mrb[61].mxu1  ;;  %v2329_v35 = vmul.f32 %v3906_v50, %v5407_v9 }
 0x73d   :  { %v2423_v43 = vcombine.low %v2371_v26, %v2373_v19  ;;  %v2424_v29 = vcombine.low %v2412_v33, %v2414_v42  ;;  %v2375_v30 = vpop.f32.mrb[62].mxu0  ;;  %v2416_v31 = vpop.f32.mrb[62].mxu1 }
 0x73e   :  { %v2376_v32 = vpop.f32.mrb[63].mxu0  ;;  %v2417_v4 = vpop.f32.mrb[63].mxu1  ;;  %v5605_v46 = vadd.f32 %v2330_v40, %v2329_v35 }
 0x73f   :  { %v2431_v44 = vrot.slane %v2423_v43, %v4767_v57  ;;  %v2438_v48 = vrot.slane %v2424_v29, %v4767_v57  ;;  %v3908_v50 = vpop.eup %3907  ;;  %v6730_v32 = vld [vmem:[#allocation64_spill] sm:$0xff]  ;;  %v6731_v4 = vld [vmem:[#allocation65_spill] sm:$0xff] }
 0x740   :  { %3909 = vtanh.f32 %v5605_v46 }
 0x741   :  { %v2439_v27 = vcombine.low %v2431_v44, %v2438_v48  ;;  %v6732_v44 = vld [vmem:[#allocation66_spill] sm:$0xff]  ;;  %v6733_v48 = vld [vmem:[#allocation69_spill] sm:$0xff] }
 0x743   :  { %v2441_v63 = vadd.f32 %v2439_v27, %v2336_v58  ;;  %v6734_v58 = vld [vmem:[#allocation70_spill] sm:$0xff]  ;;  %v6735_v27 = vld [vmem:[#allocation56_spill] sm:$0xff] }
 0x745   :  { %v2442_v23 = vsub.f32 0.0, %v2441_v63  ;;  %v2448_v9 = vrot.slane %v2441_v63, 2  ;;  %v2458_v33 = vrot.slane %v2441_v63, 6  ;;  %v2455_v29 = vrot.slane %v2441_v63, 4  ;;  %v6736_v63 = vld [vmem:[#allocation57_spill] sm:$0xff] }
 0x747   :  { %v2443_v12 = vmul.f32 1.442695, %v2442_v23  ;;  %v2450_v36 = vsub.f32 0.0, %v2448_v9  ;;  %v2460_v42 = vsub.f32 0.0, %v2458_v33  ;;  %v6737_v23 = vld [vmem:[#allocation58_spill] sm:$0xff]  ;;  %v6738_v9 = vld [vmem:[#allocation59_spill] sm:$0xff] }
 0x748   :  { %v6742_v33 = vld [vmem:[#allocation31_spill] sm:$0xff] }
 0x749   :  { %3911 = vpow2.f32 %v2443_v12  ;;  %v2451_v26 = vmul.f32 1.442695, %v2450_v36  ;;  %v2461_v41 = vmul.f32 1.442695, %v2460_v42  ;;  %v6739_v12 = vld [vmem:[#allocation61_spill] sm:$0xff]  ;;  %v6740_v36 = vld [vmem:[#allocation62_spill] sm:$0xff] }
 0x74a   :  { %v3910_v40 = vpop.eup %3909  ;;  %v6746_v42 = vld [vmem:[#allocation35_spill] sm:$0xff] }
 0x74b   :  { %3913 = vpow2.f32 %v2451_v26  ;;  %v2333_v19 = vmul.f32 %v3910_v40, %v3908_v50  ;;  %v6741_v26 = vld [vmem:[#allocation30_spill] sm:$0xff]  ;;  %v6743_v50 = vld [vmem:[#allocation32_spill] sm:$0xff]  ;;  %v6744_v40 = vld [vmem:[#allocation33_spill] sm:$0xff] }
 0x74c   :  { %3915 = vpow2.f32 %v2461_v41  ;;  %v5691_v41 = vld [vmem:[#allocation12 + $0x28] ss:$16 sps:$4 sm:$0xff]  }
 0x74d   :  { %v2334_v35 = vpack.c.bf16 %v2333_v19, %v2333_v19  ;;  %v6745_v19 = vld [vmem:[#allocation34_spill] sm:$0xff]  ;;  %6748 = vst [vmem:[#allocation37_spill] sm:$0xff] %v5691_v41 }
 0x74f   :  { %2504 = vmatmul.mubr.bf16.vlgmr.msra.gmra.mrb[64].mxu0 %v2334_v35  ;;  %2545 = vmatmul.mubr.bf16.vlgmr.msra.gmra.mrb[64].mxu1 %v2334_v35  ;;  %v5688_v35 = vld [vmem:[#allocation12 + $0x20] ss:$16 sps:$4 sm:$0xff]  }
 0x750   :  { %2554 = vmatpush1.bf16.msra.mxu0 %v5236_v25  ;;  %2595 = vmatpush1.bf16.msra.mxu1 %v5239_v17  ;;  %6747 = vst [vmem:[#allocation36_spill] sm:$0xff] %v5688_v35 }
 0x751   :  { %2555 = vmatprep.subr.bf16.mxu0 %v5242_v21  ;;  %2596 = vmatprep.subr.bf16.mxu1 %v5245_v20 }
 0x752   :  { %2585 = vmatprep.mubr.bf16.mxu0 %v6419_v56  ;;  %2626 = vmatprep.mubr.bf16.mxu1 %v6419_v56 }
 0x753   :  { %v3912_v43 = vpop.eup %3911 }
 0x754   :  { %v2445_v30 = vadd.f32 1.0, %v3912_v43  ;;  %2556 = vmatpush1.bf16.msra.mxu0 %v5250_v1  ;;  %2597 = vmatpush1.bf16.msra.mxu1 %v5253_v10  ;;  %v5694_v43 = vld [vmem:[#allocation12 + $0x44] ss:$16 sps:$4 sm:$0xff]  }
 0x755   :  { %v3914_v31 = vpop.eup %3913  ;;  %2557 = vmatprep.subr.bf16.mxu0 %v5256_v28  ;;  %2598 = vmatprep.subr.bf16.mxu1 %v5259_v53  ;;  %6749 = vst [vmem:[#allocation38_spill] sm:$0xff] %v5694_v43 }
 0x756   :  { %3917 = vrcp.f32 %v2445_v30  ;;  %v2453_v25 = vadd.f32 1.0, %v3914_v31  ;;  %v3916_v17 = vpop.eup %3915  ;;  %v5700_v30 = vld [vmem:[#allocation12 + $0x40] ss:$16 sps:$4 sm:$0xff]   ;;  %v5703_v31 = vld [vmem:[#allocation12 + $0x48] ss:$16 sps:$4 sm:$0xff]  }
 0x757   :  { %3919 = vtanh.f32 %v2455_v29  ;;  %v2463_v10 = vadd.f32 1.0, %v3916_v17  ;;  %v5697_v29 = vld [vmem:[#allocation12 + $0x4c] ss:$16 sps:$4 sm:$0xff]   ;;  %6751 = vst [vmem:[#allocation40_spill] sm:$0xff] %v5700_v30  ;;  %6752 = vst [vmem:[#allocation67_spill] sm:$0xff] %v5703_v31 }
 0x758   :  { %3921 = vrcp.f32 %v2453_v25  ;;  %2558 = vmatpush1.bf16.msra.mxu0 %v5262_v55  ;;  %2599 = vmatpush1.bf16.msra.mxu1 %v5265_v62  ;;  %6750 = vst [vmem:[#allocation39_spill] sm:$0xff] %v5697_v29  ;;  %v5706_v25 = vld [vmem:[#allocation12 + $0x64] ss:$16 sps:$4 sm:$0xff]   ;;  %v5709_v17 = vld [vmem:[#allocation12 + $0x6c] ss:$16 sps:$4 sm:$0xff]  }
 0x759   :  { %2559 = vmatprep.subr.bf16.mxu0 %v5268_v11  ;;  %2600 = vmatprep.subr.bf16.mxu1 %v6652_v13  ;;  %3923 = vrcp.f32 %v2463_v10  ;;  %v6718_v13 = vld [vmem:[#allocation46_spill] sm:$0xff]  ;;  %6753 = vst [vmem:[#allocation68_spill] sm:$0xff] %v5706_v25  ;;  %6754 = vst [vmem:[#allocation71_spill] sm:$0xff] %v5709_v17  ;;  %v5721_v10 = vld [vmem:[#allocation12 + $0x8c] ss:$16 sps:$4 sm:$0xff]  }
 0x75a   :  { %6758 = vst [vmem:[#allocation22_spill] sm:$0xff] %v5721_v10 }
 0x75c   :  { %2560 = vmatpush1.bf16.msra.mxu0 %v6653_v8  ;;  %2601 = vmatpush1.bf16.msra.mxu1 %v6654_v6  ;;  %v6719_v8 = vld [vmem:[#allocation47_spill] sm:$0xff]  ;;  %v6720_v6 = vld [vmem:[#allocation48_spill] sm:$0xff] }
 0x75d   :  { %2561 = vmatprep.subr.bf16.mxu0 %v6655_v37  ;;  %2602 = vmatprep.subr.bf16.mxu1 %v6656_v59  ;;  %v6721_v37 = vld [vmem:[#allocation49_spill] sm:$0xff]  ;;  %v6722_v59 = vld [vmem:[#allocation50_spill] sm:$0xff] }
 0x760   :  { %v3918_v21 = vpop.eup %3917  ;;  %2562 = vmatpush1.bf16.msra.mxu0 %v6657_v3  ;;  %2603 = vmatpush1.bf16.msra.mxu1 %v6658_v7  ;;  %v6723_v3 = vld [vmem:[#allocation51_spill] sm:$0xff]  ;;  %v6724_v7 = vld [vmem:[#allocation52_spill] sm:$0xff] }
 0x761   :  { %v3920_v20 = vpop.eup %3919  ;;  %2563 = vmatprep.subr.bf16.mxu0 %v6659_v60  ;;  %2604 = vmatprep.subr.bf16.mxu1 %v5295_v52  ;;  %v6712_v52 = vld [vmem:[#allocation41_spill] sm:$0xff] }
 0x762   :  { %v3922_v1 = vpop.eup %3921  ;;  %v2466_v53 = vmul.f32 %v3920_v20, %v3918_v21  ;;  %v6725_v60 = vld [vmem:[#allocation53_spill] sm:$0xff] }
 0x763   :  { %v2465_v28 = vmul.f32 %v3922_v1, %v5437_v49  ;;  %v3924_v62 = vpop.eup %3923  ;;  %v6726_v49 = vld [vmem:[#allocation54_spill] sm:$0xff] }
 0x764   :  { %2564 = vmatpush1.bf16.msra.mxu0 %v5299_v34  ;;  %2605 = vmatpush1.bf16.msra.mxu1 %v5302_v14  ;;  %v6713_v14 = vld [vmem:[#allocation42_spill] sm:$0xff] }
 0x765   :  { %v5635_v55 = vadd.f32 %v2466_v53, %v2465_v28  ;;  %2565 = vmatprep.subr.bf16.mxu0 %v5307_v18  ;;  %2606 = vmatprep.subr.bf16.mxu1 %v5310_v61  ;;  %v6714_v18 = vld [vmem:[#allocation73_spill] sm:$0xff]  ;;  %v5718_v1 = vld [vmem:[#allocation12 + $0x84] ss:$16 sps:$4 sm:$0xff]  }
 0x766   :  { %v5712_v21 = vld [vmem:[#allocation12 + $0x60] ss:$16 sps:$4 sm:$0xff]   ;;  %v5715_v20 = vld [vmem:[#allocation12 + $0x68] ss:$16 sps:$4 sm:$0xff]   ;;  %6757 = vst [vmem:[#allocation21_spill] sm:$0xff] %v5718_v1 }
 0x767   :  { %3925 = vtanh.f32 %v5635_v55  ;;  %6755 = vst [vmem:[#allocation72_spill] sm:$0xff] %v5712_v21  ;;  %6756 = vst [vmem:[#allocation20_spill] sm:$0xff] %v5715_v20  ;;  %v5724_v28 = vld [vmem:[#allocation12 + $0x80] ss:$16 sps:$4 sm:$0xff]   ;;  %v5727_v53 = vld [vmem:[#allocation12 + $0x88] ss:$16 sps:$4 sm:$0xff]  }
 0x768   :  { %2566 = vmatpush1.bf16.msra.mxu0 %v6660_v16  ;;  %2607 = vmatpush1.bf16.msra.mxu1 %v6661_v22  ;;  %v6727_v16 = vld [vmem:[#allocation55_spill] sm:$0xff]  ;;  %v6728_v22 = vld [vmem:[#allocation60_spill] sm:$0xff]  ;;  %6759 = vst [vmem:[#allocation23_spill] sm:$0xff] %v5724_v28  ;;  %6760 = vst [vmem:[#allocation24_spill] sm:$0xff] %v5727_v53 }
 0x769   :  { %2567 = vmatprep.subr.bf16.mxu0 %v6662_v47  ;;  %2608 = vmatprep.subr.bf16.mxu1 %v5323_v24  ;;  %v6715_v24 = vld [vmem:[#allocation43_spill] sm:$0xff] }
 0x76a   :  { %v6729_v47 = vld [vmem:[#allocation63_spill] sm:$0xff] }
 0x76c   :  { %2568 = vmatpush1.bf16.msra.mxu0 %v5326_v0  ;;  %2609 = vmatpush1.bf16.msra.mxu1 %v5329_v2  ;;  %v6716_v0 = vld [vmem:[#allocation44_spill] sm:$0xff]  ;;  %v6717_v2 = vld [vmem:[#allocation45_spill] sm:$0xff] }
 0x76d   :  { %2663 = vmatprep.subr.bf16.mxu0 %v5448_v38  ;;  %2704 = vmatprep.subr.bf16.mxu1 %v5451_v51 }
 0x771   :  { %v3926_v11 = vpop.eup %3925 }
 0x772   :  { %v2469_v34 = vmul.f32 %v3926_v11, %v3924_v62  ;;  %v5730_v62 = vld [vmem:[#allocation12 + $0xa4] ss:$16 sps:$4 sm:$0xff]   ;;  %v5733_v11 = vld [vmem:[#allocation12 + $0xac] ss:$16 sps:$4 sm:$0xff]  }
 0x773   :  { %6761 = vst [vmem:[#allocation25_spill] sm:$0xff] %v5730_v62  ;;  %6762 = vst [vmem:[#allocation26_spill] sm:$0xff] %v5733_v11 }
 0x774   :  { %v2470_v61 = vpack.c.bf16 %v2469_v34, %v2469_v34  ;;  %v5736_v34 = vld [vmem:[#allocation12 + $0xa0] ss:$16 sps:$4 sm:$0xff]  }
 0x775   :  { %6763 = vst [vmem:[#allocation27_spill] sm:$0xff] %v5736_v34 }
 0x776   :  { %2586 = vmatmul.mubr.bf16.vlgmr.msra.gmra.mrb[68].mxu0 %v2470_v61  ;;  %2627 = vmatmul.mubr.bf16.vlgmr.msra.gmra.mrb[68].mxu1 %v2470_v61 }
 0x777   :  { %2664 = vmatpush1.bf16.msra.mxu0 %v5458_v5  ;;  %2705 = vmatpush1.bf16.msra.mxu1 %v6712_v52 }
 0x778   :  { %2665 = vmatprep.subr.bf16.mxu0 %v6713_v14  ;;  %2706 = vmatprep.subr.bf16.mxu1 %v6714_v18 }
 0x779   :  { %2695 = vmatprep.mubr.bf16.mxu0 %v6419_v56  ;;  %2736 = vmatprep.mubr.bf16.mxu1 %v6419_v56 }
 0x77b   :  { %2666 = vmatpush1.bf16.msra.mxu0 %v6715_v24  ;;  %2707 = vmatpush1.bf16.msra.mxu1 %v6716_v0 }
 0x77c   :  { %2667 = vmatprep.subr.bf16.mxu0 %v6717_v2  ;;  %2708 = vmatprep.subr.bf16.mxu1 %v6718_v13 }
 0x77f   :  { %2668 = vmatpush1.bf16.msra.mxu0 %v6719_v8  ;;  %2709 = vmatpush1.bf16.msra.mxu1 %v6720_v6 }
 0x780   :  { %2669 = vmatprep.subr.bf16.mxu0 %v6721_v37  ;;  %2710 = vmatprep.subr.bf16.mxu1 %v6722_v59 }
 0x783   :  { %2670 = vmatpush1.bf16.msra.mxu0 %v6723_v3  ;;  %2711 = vmatpush1.bf16.msra.mxu1 %v6724_v7 }
 0x784   :  { %2671 = vmatprep.subr.bf16.mxu0 %v6725_v60  ;;  %2712 = vmatprep.subr.bf16.mxu1 %v6726_v49 }
 0x787   :  { %2672 = vmatpush1.bf16.msra.mxu0 %v6727_v16  ;;  %2713 = vmatpush1.bf16.msra.mxu1 %v6728_v22 }
 0x788   :  { %2673 = vmatprep.subr.bf16.mxu0 %v6729_v47  ;;  %2714 = vmatprep.subr.bf16.mxu1 %v6730_v32 }
 0x78b   :  { %2674 = vmatpush1.bf16.msra.mxu0 %v6731_v4  ;;  %2715 = vmatpush1.bf16.msra.mxu1 %v6732_v44 }
 0x78c   :  { %2675 = vmatprep.subr.bf16.mxu0 %v6733_v48  ;;  %2716 = vmatprep.subr.bf16.mxu1 %v6734_v58 }
 0x78f   :  { %2676 = vmatpush1.bf16.msra.mxu0 %v6735_v27  ;;  %2717 = vmatpush1.bf16.msra.mxu1 %v6736_v63 }
 0x790   :  { %2677 = vmatprep.subr.bf16.mxu0 %v6737_v23  ;;  %2718 = vmatprep.subr.bf16.mxu1 %v6738_v9 }
 0x793   :  { %2678 = vmatpush1.bf16.msra.mxu0 %v6739_v12  ;;  %2719 = vmatpush1.bf16.msra.mxu1 %v6740_v36 }
 0x794   :  { %2797 = vmatprep.subr.bf16.mxu0 %v6741_v26  ;;  %2838 = vmatprep.subr.bf16.mxu1 %v6742_v33 }
 0x796   :  { %2696 = vmatmul.mubr.bf16.vlgmr.msra.gmra.mrb[72].mxu0 %v2470_v61  ;;  %2737 = vmatmul.mubr.bf16.vlgmr.msra.gmra.mrb[72].mxu1 %v2470_v61  ;;  %v5739_v61 = vld [vmem:[#allocation12 + $0xa8] ss:$16 sps:$4 sm:$0xff]  }
 0x797   :  { %2798 = vmatpush1.bf16.msra.mxu0 %v6743_v50  ;;  %2839 = vmatpush1.bf16.msra.mxu1 %v6744_v40  ;;  %6764 = vst [vmem:[#allocation28_spill] sm:$0xff] %v5739_v61 }
 0x798   :  { %2799 = vmatprep.subr.bf16.mxu0 %v6745_v19  ;;  %2840 = vmatprep.subr.bf16.mxu1 %v6746_v42 }
 0x799   :  { %2829 = vmatprep.mubr.bf16.mxu0 %v6419_v56  ;;  %2870 = vmatprep.mubr.bf16.mxu1 %v6419_v56 }
 0x79b   :  { %2800 = vmatpush1.bf16.msra.mxu0 %v5688_v35  ;;  %2841 = vmatpush1.bf16.msra.mxu1 %v5691_v41 }
 0x79c   :  { %2801 = vmatprep.subr.bf16.mxu0 %v5694_v43  ;;  %2842 = vmatprep.subr.bf16.mxu1 %v5697_v29 }
 0x79f   :  { %2802 = vmatpush1.bf16.msra.mxu0 %v5700_v30  ;;  %2843 = vmatpush1.bf16.msra.mxu1 %v5703_v31 }
 0x7a0   :  { %2803 = vmatprep.subr.bf16.mxu0 %v5706_v25  ;;  %2844 = vmatprep.subr.bf16.mxu1 %v5709_v17 }
 0x7a3   :  { %2804 = vmatpush1.bf16.msra.mxu0 %v5712_v21  ;;  %2845 = vmatpush1.bf16.msra.mxu1 %v5715_v20 }
 0x7a4   :  { %2805 = vmatprep.subr.bf16.mxu0 %v5718_v1  ;;  %2846 = vmatprep.subr.bf16.mxu1 %v5721_v10 }
 0x7a7   :  { %2806 = vmatpush1.bf16.msra.mxu0 %v5724_v28  ;;  %2847 = vmatpush1.bf16.msra.mxu1 %v5727_v53  ;;  %v5742_v28 = vld [vmem:[#allocation12 + $0xc4] ss:$16 sps:$4 sm:$0xff]   ;;  %v5745_v53 = vld [vmem:[#allocation12 + $0xcc] ss:$16 sps:$4 sm:$0xff]  }
 0x7a8   :  { %2807 = vmatprep.subr.bf16.mxu0 %v5730_v62  ;;  %2848 = vmatprep.subr.bf16.mxu1 %v5733_v11  ;;  %6765 = vst [vmem:[#allocation29_spill] sm:$0xff] %v5742_v28  ;;  %6766 = vst [vmem:[#allocation41_spill] sm:$0xff] %v5745_v53  ;;  %v5748_v62 = vld [vmem:[#allocation12 + $0xc0] ss:$16 sps:$4 sm:$0xff]   ;;  %v5751_v11 = vld [vmem:[#allocation12 + $0xc8] ss:$16 sps:$4 sm:$0xff]  }
 0x7a9   :  { %6767 = vst [vmem:[#allocation42_spill] sm:$0xff] %v5748_v62  ;;  %6768 = vst [vmem:[#allocation73_spill] sm:$0xff] %v5751_v11 }
 0x7ab   :  { %2808 = vmatpush1.bf16.msra.mxu0 %v5736_v34  ;;  %2849 = vmatpush1.bf16.msra.mxu1 %v5739_v61  ;;  %v5754_v34 = vld [vmem:[#allocation12 + $0xe4] ss:$16 sps:$4 sm:$0xff]   ;;  %v5757_v61 = vld [vmem:[#allocation12 + $0xec] ss:$16 sps:$4 sm:$0xff]  }
 0x7ac   :  { %2809 = vmatprep.subr.bf16.mxu0 %v5742_v28  ;;  %2850 = vmatprep.subr.bf16.mxu1 %v5745_v53  ;;  %6769 = vst [vmem:[#allocation43_spill] sm:$0xff] %v5754_v34  ;;  %6770 = vst [vmem:[#allocation44_spill] sm:$0xff] %v5757_v61  ;;  %v5760_v28 = vld [vmem:[#allocation12 + $0xe0] ss:$16 sps:$4 sm:$0xff]   ;;  %v5763_v53 = vld [vmem:[#allocation12 + $0xe8] ss:$16 sps:$4 sm:$0xff]  }
 0x7ad   :  { %6771 = vst [vmem:[#allocation45_spill] sm:$0xff] %v5760_v28  ;;  %6772 = vst [vmem:[#allocation46_spill] sm:$0xff] %v5763_v53 }
 0x7af   :  { %2810 = vmatpush1.bf16.msra.mxu0 %v5748_v62  ;;  %2851 = vmatpush1.bf16.msra.mxu1 %v5751_v11  ;;  %v5766_v62 = vld [vmem:[#allocation11 + $0x4] ss:$16 sps:$4 sm:$0xff]   ;;  %v5769_v11 = vld [vmem:[#allocation11 + $0xc] ss:$16 sps:$4 sm:$0xff]  }
 0x7b0   :  { %2811 = vmatprep.subr.bf16.mxu0 %v5754_v34  ;;  %2852 = vmatprep.subr.bf16.mxu1 %v5757_v61  ;;  %6773 = vst [vmem:[#allocation47_spill] sm:$0xff] %v5766_v62  ;;  %6774 = vst [vmem:[#allocation48_spill] sm:$0xff] %v5769_v11 }
 0x7b3   :  { %2812 = vmatpush1.bf16.msra.mxu0 %v5760_v28  ;;  %2853 = vmatpush1.bf16.msra.mxu1 %v5763_v53 }
 0x7b4   :  { %2879 = vmatprep.subr.bf16.mxu0 %v5766_v62  ;;  %2920 = vmatprep.subr.bf16.mxu1 %v5769_v11 }
 0x822   :  { %v2505_v34 = vpop.f32.mrb[64].mxu0  ;;  %v2546_v10 = vpop.f32.mrb[64].mxu1 }
 0x823   :  { %v2507_v1 = vpop.f32.mrb[65].mxu0  ;;  %v2548_v61 = vpop.f32.mrb[65].mxu1 }
 0x824   :  { %v2509_v20 = vpop.f32.mrb[66].mxu0  ;;  %v2550_v21 = vpop.f32.mrb[66].mxu1 }
 0x825   :  { %v2510_v17 = vpop.f32.mrb[67].mxu0  ;;  %v2551_v28 = vpop.f32.mrb[67].mxu1 }
 0x849   :  { %v2587_v25 = vpop.f32.mrb[68].mxu0  ;;  %v2628_v31 = vpop.f32.mrb[68].mxu1 }
 0x84a   :  { %v2588_v30 = vadd.f32 %v2587_v25, %v2505_v34  ;;  %v2629_v53 = vadd.f32 %v2628_v31, %v2546_v10  ;;  %v2589_v29 = vpop.f32.mrb[69].mxu0  ;;  %v2630_v43 = vpop.f32.mrb[69].mxu1 }
 0x84b   :  { %v2590_v41 = vadd.f32 %v2589_v29, %v2507_v1  ;;  %v2631_v62 = vadd.f32 %v2630_v43, %v2548_v61  ;;  %v2591_v35 = vpop.f32.mrb[70].mxu0  ;;  %v2632_v42 = vpop.f32.mrb[70].mxu1 }
 0x84c   :  { %v2635_v11 = vadd.f32 %v2588_v30, %v4847_v39  ;;  %v2592_v19 = vpop.f32.mrb[71].mxu0  ;;  %v2633_v40 = vpop.f32.mrb[71].mxu1  ;;  %v2637_v43 = vadd.f32 %v2629_v53, %v4858_v15 }
 0x84d   :  { %v2636_v50 = vadd.f32 %v2590_v41, %v4849_v54  ;;  %v2638_v33 = vadd.f32 %v2631_v62, %v4854_v45 }
 0x84e   :  { %v2639_v20 = vsub.f32 0.0, %v2635_v11 }
 0x84f   :  { %v2644_v21 = vsub.f32 0.0, %v2636_v50  ;;  %v2650_v31 = vsub.f32 0.0, %v2638_v33 }
 0x850   :  { %v2640_v17 = vmul.f32 1.442695, %v2639_v20 }
 0x851   :  { %v2645_v28 = vmul.f32 1.442695, %v2644_v21  ;;  %v2651_v25 = vmul.f32 1.442695, %v2650_v31 }
 0x852   :  { %3927 = vpow2.f32 %v2640_v17 }
 0x853   :  { %3929 = vpow2.f32 %v2645_v28 }
 0x854   :  { %3931 = vpow2.f32 %v2651_v25 }
 0x855   :  { %3933 = vtanh.f32 %v2637_v43 }
 0x85c   :  { %v3928_v35 = vpop.eup %3927 }
 0x85d   :  { %v3930_v42 = vpop.eup %3929  ;;  %v2642_v29 = vadd.f32 1.0, %v3928_v35 }
 0x85e   :  { %v2647_v40 = vadd.f32 1.0, %v3930_v42  ;;  %v3932_v19 = vpop.eup %3931  ;;  %v2662_v42 = vld [vmem:[#allocation6 + $0x30] sm:$0xff] }
 0x85f   :  { %3935 = vrcp.f32 %v2642_v29  ;;  %v3934_v50 = vpop.eup %3933  ;;  %v2653_v11 = vadd.f32 1.0, %v3932_v19 }
 0x860   :  { %3937 = vrcp.f32 %v2647_v40 }
 0x861   :  { %3939 = vrcp.f32 %v2653_v11 }
 0x869   :  { %v3936_v41 = vpop.eup %3935  ;;  %v2697_v30 = vpop.f32.mrb[72].mxu0 }
 0x86a   :  { %v2738_v1 = vpop.f32.mrb[72].mxu1  ;;  %v3938_v10 = vpop.eup %3937  ;;  %v2656_v62 = vmul.f32 %v3936_v41, %v3934_v50 }
 0x86b   :  { %v2699_v33 = vpop.f32.mrb[73].mxu0  ;;  %v2740_v34 = vpop.f32.mrb[73].mxu1  ;;  %v2655_v53 = vmul.f32 %v3938_v10, %v5605_v46 }
 0x86c   :  { %v2749_v61 = vcombine.low %v2697_v30, %v2699_v33  ;;  %v2750_v20 = vcombine.low %v2738_v1, %v2740_v34  ;;  %v2701_v21 = vpop.f32.mrb[74].mxu0  ;;  %v2742_v17 = vpop.f32.mrb[74].mxu1 }
 0x86d   :  { %v2702_v28 = vpop.f32.mrb[75].mxu0  ;;  %v2743_v31 = vpop.f32.mrb[75].mxu1  ;;  %v5777_v25 = vadd.f32 %v2656_v62, %v2655_v53  ;;  %v5788_v21 = vld [vmem:[#allocation11 + $0x24] ss:$16 sps:$4 sm:$0xff]   ;;  %v5791_v17 = vld [vmem:[#allocation11 + $0x2c] ss:$16 sps:$4 sm:$0xff]  }
 0x86e   :  { %v2757_v43 = vrot.slane %v2749_v61, %v4767_v57  ;;  %v2764_v35 = vrot.slane %v2750_v20, %v4767_v57  ;;  %v3940_v10 = vpop.eup %3939  ;;  %v5782_v61 = vld [vmem:[#allocation11] ss:$16 sps:$4 sm:$0xff]   ;;  %v5785_v20 = vld [vmem:[#allocation11 + $0x8] ss:$16 sps:$4 sm:$0xff]  }
 0x86f   :  { %3941 = vtanh.f32 %v5777_v25 }
 0x870   :  { %v2765_v29 = vcombine.low %v2757_v43, %v2764_v35 }
 0x872   :  { %v2767_v40 = vadd.f32 %v2765_v29, %v2662_v42  ;;  %v5796_v42 = vld [vmem:[#allocation11 + $0x20] ss:$16 sps:$4 sm:$0xff]   ;;  %v5799_v29 = vld [vmem:[#allocation11 + $0x28] ss:$16 sps:$4 sm:$0xff]  }
 0x874   :  { %v2768_v19 = vsub.f32 0.0, %v2767_v40  ;;  %v2774_v46 = vrot.slane %v2767_v40, 2  ;;  %v2784_v1 = vrot.slane %v2767_v40, 6  ;;  %v2781_v31 = vrot.slane %v2767_v40, 4  ;;  %v5805_v40 = vld [vmem:[#allocation11 + $0x4c] ss:$16 sps:$4 sm:$0xff]  }
 0x876   :  { %v2769_v50 = vmul.f32 1.442695, %v2768_v19  ;;  %v2776_v41 = vsub.f32 0.0, %v2774_v46  ;;  %v2786_v34 = vsub.f32 0.0, %v2784_v1  ;;  %v5802_v46 = vld [vmem:[#allocation11 + $0x44] ss:$16 sps:$4 sm:$0xff]  }
 0x877   :  { %v5817_v1 = vld [vmem:[#allocation11 + $0x6c] ss:$16 sps:$4 sm:$0xff]  }
 0x878   :  { %3943 = vpow2.f32 %v2769_v50  ;;  %v2777_v30 = vmul.f32 1.442695, %v2776_v41  ;;  %v2787_v11 = vmul.f32 1.442695, %v2786_v34  ;;  %v5808_v50 = vld [vmem:[#allocation11 + $0x40] ss:$16 sps:$4 sm:$0xff]  }
 0x879   :  { %v3942_v62 = vpop.eup %3941  ;;  %v5811_v41 = vld [vmem:[#allocation11 + $0x48] ss:$16 sps:$4 sm:$0xff]   ;;  %6775 = vst [vmem:[#allocation49_spill] sm:$0xff] %v5817_v1  ;;  %v5829_v34 = vld [vmem:[#allocation11 + $0x8c] ss:$16 sps:$4 sm:$0xff]  }
 0x87a   :  { %3945 = vpow2.f32 %v2777_v30  ;;  %v2659_v33 = vmul.f32 %v3942_v62, %v3940_v10  ;;  %v5814_v30 = vld [vmem:[#allocation11 + $0x64] ss:$16 sps:$4 sm:$0xff]   ;;  %v5820_v10 = vld [vmem:[#allocation11 + $0x60] ss:$16 sps:$4 sm:$0xff]   ;;  %v5823_v62 = vld [vmem:[#allocation11 + $0x68] ss:$16 sps:$4 sm:$0xff]  }
 0x87b   :  { %3947 = vpow2.f32 %v2787_v11  ;;  %6776 = vst [vmem:[#allocation50_spill] sm:$0xff] %v5820_v10  ;;  %6777 = vst [vmem:[#allocation51_spill] sm:$0xff] %v5823_v62 }
 0x87c   :  { %v2660_v53 = vpack.c.bf16 %v2659_v33, %v2659_v33  ;;  %v5826_v33 = vld [vmem:[#allocation11 + $0x84] ss:$16 sps:$4 sm:$0xff]   ;;  %6779 = vst [vmem:[#allocation53_spill] sm:$0xff] %v5829_v34 }
 0x87d   :  { %6778 = vst [vmem:[#allocation52_spill] sm:$0xff] %v5826_v33 }
 0x87e   :  { %2830 = vmatmul.mubr.bf16.vlgmr.msra.gmra.mrb[76].mxu0 %v2660_v53  ;;  %2871 = vmatmul.mubr.bf16.vlgmr.msra.gmra.mrb[76].mxu1 %v2660_v53 }
 0x87f   :  { %2880 = vmatpush1.bf16.msra.mxu0 %v5782_v61  ;;  %2921 = vmatpush1.bf16.msra.mxu1 %v5785_v20 }
 0x880   :  { %2881 = vmatprep.subr.bf16.mxu0 %v5788_v21  ;;  %2922 = vmatprep.subr.bf16.mxu1 %v5791_v17 }
 0x881   :  { %2911 = vmatprep.mubr.bf16.mxu0 %v6419_v56  ;;  %2952 = vmatprep.mubr.bf16.mxu1 %v6419_v56 }
 0x882   :  { %v3944_v28 = vpop.eup %3943 }
 0x883   :  { %v2771_v43 = vadd.f32 1.0, %v3944_v28  ;;  %2882 = vmatpush1.bf16.msra.mxu0 %v5796_v42  ;;  %2923 = vmatpush1.bf16.msra.mxu1 %v5799_v29 }
 0x884   :  { %v3946_v35 = vpop.eup %3945  ;;  %2883 = vmatprep.subr.bf16.mxu0 %v5802_v46  ;;  %2924 = vmatprep.subr.bf16.mxu1 %v5805_v40 }
 0x885   :  { %3949 = vrcp.f32 %v2771_v43  ;;  %v2779_v19 = vadd.f32 1.0, %v3946_v35  ;;  %v3948_v53 = vpop.eup %3947  ;;  %v5835_v43 = vld [vmem:[#allocation11 + $0x88] ss:$16 sps:$4 sm:$0xff]  }
 0x886   :  { %3951 = vtanh.f32 %v2781_v31  ;;  %v5832_v31 = vld [vmem:[#allocation11 + $0x80] ss:$16 sps:$4 sm:$0xff]   ;;  %6781 = vst [vmem:[#allocation55_spill] sm:$0xff] %v5835_v43 }
 0x887   :  { %3953 = vrcp.f32 %v2779_v19  ;;  %2884 = vmatpush1.bf16.msra.mxu0 %v5808_v50  ;;  %2925 = vmatpush1.bf16.msra.mxu1 %v5811_v41  ;;  %6780 = vst [vmem:[#allocation54_spill] sm:$0xff] %v5832_v31  ;;  %v2789_v19 = vadd.f32 1.0, %v3948_v53 }
 0x888   :  { %2885 = vmatprep.subr.bf16.mxu0 %v5814_v30  ;;  %2926 = vmatprep.subr.bf16.mxu1 %v5817_v1  ;;  %v5845_v1 = vld [vmem:[#allocation11 + $0xa0] ss:$16 sps:$4 sm:$0xff]  }
 0x889   :  { %3955 = vrcp.f32 %v2789_v19 }
 0x88b   :  { %2886 = vmatpush1.bf16.msra.mxu0 %v5820_v10  ;;  %2927 = vmatpush1.bf16.msra.mxu1 %v5823_v62  ;;  %v5838_v62 = vld [vmem:[#allocation11 + $0xa4] ss:$16 sps:$4 sm:$0xff]  }
 0x88c   :  { %2887 = vmatprep.subr.bf16.mxu0 %v5826_v33  ;;  %2928 = vmatprep.subr.bf16.mxu1 %v5829_v34  ;;  %6782 = vst [vmem:[#allocation60_spill] sm:$0xff] %v5838_v62  ;;  %v5841_v33 = vld [vmem:[#allocation11 + $0xac] ss:$16 sps:$4 sm:$0xff]  }
 0x88f   :  { %v3950_v11 = vpop.eup %3949  ;;  %2888 = vmatpush1.bf16.msra.mxu0 %v5832_v31  ;;  %2929 = vmatpush1.bf16.msra.mxu1 %v5835_v43  ;;  %v5848_v31 = vld [vmem:[#allocation11 + $0xa8] ss:$16 sps:$4 sm:$0xff]   ;;  %v5853_v43 = vld [vmem:[#allocation11 + $0xc4] ss:$16 sps:$4 sm:$0xff]  }
 0x890   :  { %v3952_v28 = vpop.eup %3951  ;;  %2889 = vmatprep.subr.bf16.mxu0 %v5838_v62  ;;  %2930 = vmatprep.subr.bf16.mxu1 %v5841_v33  ;;  %v5856_v62 = vld [vmem:[#allocation11 + $0xcc] ss:$16 sps:$4 sm:$0xff]  }
 0x891   :  { %v3954_v35 = vpop.eup %3953  ;;  %v2792_v10 = vmul.f32 %v3952_v28, %v3950_v11  ;;  %v5863_v11 = vld [vmem:[#allocation11 + $0xc8] ss:$16 sps:$4 sm:$0xff]   ;;  %v5872_v28 = vld [vmem:[#allocation11 + $0xe0] ss:$16 sps:$4 sm:$0xff]  }
 0x892   :  { %v2791_v34 = vmul.f32 %v3954_v35, %v5635_v55  ;;  %v5860_v55 = vld [vmem:[#allocation11 + $0xc0] ss:$16 sps:$4 sm:$0xff]   ;;  %6784 = vst [vmem:[#allocation64_spill] sm:$0xff] %v5863_v11  ;;  %v5875_v35 = vld [vmem:[#allocation11 + $0xe8] ss:$16 sps:$4 sm:$0xff]  }
 0x893   :  { %2890 = vmatpush1.bf16.msra.mxu0 %v5845_v1  ;;  %2931 = vmatpush1.bf16.msra.mxu1 %v5848_v31  ;;  %6783 = vst [vmem:[#allocation63_spill] sm:$0xff] %v5860_v55  ;;  %v3956_v19 = vpop.eup %3955 }
 0x894   :  { %v5851_v53 = vadd.f32 %v2792_v10, %v2791_v34  ;;  %2891 = vmatprep.subr.bf16.mxu0 %v5853_v43  ;;  %2932 = vmatprep.subr.bf16.mxu1 %v5856_v62  ;;  %v5866_v10 = vld [vmem:[#allocation11 + $0xe4] ss:$16 sps:$4 sm:$0xff]   ;;  %v5869_v34 = vld [vmem:[#allocation11 + $0xec] ss:$16 sps:$4 sm:$0xff]  }
 0x895   :  { %6785 = vst [vmem:[#allocation65_spill] sm:$0xff] %v5866_v10 }
 0x896   :  { %3957 = vtanh.f32 %v5851_v53 }
 0x897   :  { %2892 = vmatpush1.bf16.msra.mxu0 %v5860_v55  ;;  %2933 = vmatpush1.bf16.msra.mxu1 %v5863_v11 }
 0x898   :  { %2893 = vmatprep.subr.bf16.mxu0 %v5866_v10  ;;  %2934 = vmatprep.subr.bf16.mxu1 %v5869_v34 }
 0x89b   :  { %2894 = vmatpush1.bf16.msra.mxu0 %v5872_v28  ;;  %2935 = vmatpush1.bf16.msra.mxu1 %v5875_v35 }
 0x89c   :  { %2989 = vmatprep.subr.bf16.mxu0 %v5448_v38  ;;  %3030 = vmatprep.subr.bf16.mxu1 %v5451_v51  ;;  %v6786_v38 = vld [vmem:[#allocation31_spill] sm:$0xff]  ;;  %v6787_v51 = vld [vmem:[#allocation32_spill] sm:$0xff] }
 0x8a0   :  { %v3958_v11 = vpop.eup %3957 }
 0x8a1   :  { %v2795_v55 = vmul.f32 %v3958_v11, %v3956_v19 }
 0x8a3   :  { %v2796_v10 = vpack.c.bf16 %v2795_v55, %v2795_v55 }
 0x8a5   :  { %2912 = vmatmul.mubr.bf16.vlgmr.msra.gmra.mrb[80].mxu0 %v2796_v10  ;;  %2953 = vmatmul.mubr.bf16.vlgmr.msra.gmra.mrb[80].mxu1 %v2796_v10 }
 0x8a6   :  { %2990 = vmatpush1.bf16.msra.mxu0 %v5458_v5  ;;  %3031 = vmatpush1.bf16.msra.mxu1 %v6712_v52  ;;  %v6788_v5 = vld [vmem:[#allocation33_spill] sm:$0xff]  ;;  %v6789_v52 = vld [vmem:[#allocation34_spill] sm:$0xff] }
 0x8a7   :  { %2991 = vmatprep.subr.bf16.mxu0 %v6713_v14  ;;  %3032 = vmatprep.subr.bf16.mxu1 %v6714_v18  ;;  %v6790_v14 = vld [vmem:[#allocation35_spill] sm:$0xff]  ;;  %v6791_v18 = vld [vmem:[#allocation36_spill] sm:$0xff] }
 0x8a8   :  { %3021 = vmatprep.mubr.bf16.mxu0 %v6419_v56  ;;  %3062 = vmatprep.mubr.bf16.mxu1 %v6419_v56 }
 0x8aa   :  { %2992 = vmatpush1.bf16.msra.mxu0 %v6715_v24  ;;  %3033 = vmatpush1.bf16.msra.mxu1 %v6716_v0  ;;  %v6792_v24 = vld [vmem:[#allocation37_spill] sm:$0xff]  ;;  %v6793_v0 = vld [vmem:[#allocation38_spill] sm:$0xff] }
 0x8ab   :  { %2993 = vmatprep.subr.bf16.mxu0 %v6717_v2  ;;  %3034 = vmatprep.subr.bf16.mxu1 %v6718_v13  ;;  %v6794_v2 = vld [vmem:[#allocation39_spill] sm:$0xff]  ;;  %v6795_v13 = vld [vmem:[#allocation40_spill] sm:$0xff] }
 0x8ae   :  { %2994 = vmatpush1.bf16.msra.mxu0 %v6719_v8  ;;  %3035 = vmatpush1.bf16.msra.mxu1 %v6720_v6  ;;  %v6796_v8 = vld [vmem:[#allocation67_spill] sm:$0xff]  ;;  %v6797_v6 = vld [vmem:[#allocation68_spill] sm:$0xff] }
 0x8af   :  { %2995 = vmatprep.subr.bf16.mxu0 %v6721_v37  ;;  %3036 = vmatprep.subr.bf16.mxu1 %v6722_v59  ;;  %v6798_v37 = vld [vmem:[#allocation71_spill] sm:$0xff]  ;;  %v6799_v59 = vld [vmem:[#allocation72_spill] sm:$0xff] }
 0x8b2   :  { %2996 = vmatpush1.bf16.msra.mxu0 %v6723_v3  ;;  %3037 = vmatpush1.bf16.msra.mxu1 %v6724_v7  ;;  %v6800_v3 = vld [vmem:[#allocation20_spill] sm:$0xff]  ;;  %v6801_v7 = vld [vmem:[#allocation21_spill] sm:$0xff] }
 0x8b3   :  { %2997 = vmatprep.subr.bf16.mxu0 %v6725_v60  ;;  %3038 = vmatprep.subr.bf16.mxu1 %v6726_v49  ;;  %v6802_v60 = vld [vmem:[#allocation22_spill] sm:$0xff]  ;;  %v6803_v49 = vld [vmem:[#allocation23_spill] sm:$0xff] }
 0x8b6   :  { %2998 = vmatpush1.bf16.msra.mxu0 %v6727_v16  ;;  %3039 = vmatpush1.bf16.msra.mxu1 %v6728_v22  ;;  %v6804_v16 = vld [vmem:[#allocation24_spill] sm:$0xff]  ;;  %v6805_v22 = vld [vmem:[#allocation25_spill] sm:$0xff] }
 0x8b7   :  { %2999 = vmatprep.subr.bf16.mxu0 %v6729_v47  ;;  %3040 = vmatprep.subr.bf16.mxu1 %v6730_v32  ;;  %v6806_v47 = vld [vmem:[#allocation26_spill] sm:$0xff]  ;;  %v6807_v32 = vld [vmem:[#allocation27_spill] sm:$0xff] }
 0x8ba   :  { %3000 = vmatpush1.bf16.msra.mxu0 %v6731_v4  ;;  %3041 = vmatpush1.bf16.msra.mxu1 %v6732_v44  ;;  %v6808_v4 = vld [vmem:[#allocation28_spill] sm:$0xff]  ;;  %v6809_v44 = vld [vmem:[#allocation29_spill] sm:$0xff] }
 0x8bb   :  { %3001 = vmatprep.subr.bf16.mxu0 %v6733_v48  ;;  %3042 = vmatprep.subr.bf16.mxu1 %v6734_v58  ;;  %v6810_v48 = vld [vmem:[#allocation41_spill] sm:$0xff]  ;;  %v6811_v58 = vld [vmem:[#allocation42_spill] sm:$0xff] }
 0x8be   :  { %3002 = vmatpush1.bf16.msra.mxu0 %v6735_v27  ;;  %3043 = vmatpush1.bf16.msra.mxu1 %v6736_v63  ;;  %v6812_v27 = vld [vmem:[#allocation73_spill] sm:$0xff]  ;;  %v6813_v63 = vld [vmem:[#allocation43_spill] sm:$0xff] }
 0x8bf   :  { %3003 = vmatprep.subr.bf16.mxu0 %v6737_v23  ;;  %3044 = vmatprep.subr.bf16.mxu1 %v6738_v9  ;;  %v6814_v23 = vld [vmem:[#allocation44_spill] sm:$0xff]  ;;  %v6815_v9 = vld [vmem:[#allocation45_spill] sm:$0xff] }
 0x8c2   :  { %3004 = vmatpush1.bf16.msra.mxu0 %v6739_v12  ;;  %3045 = vmatpush1.bf16.msra.mxu1 %v6740_v36  ;;  %v6816_v12 = vld [vmem:[#allocation46_spill] sm:$0xff]  ;;  %v6817_v36 = vld [vmem:[#allocation47_spill] sm:$0xff] }
 0x8c3   :  { %3123 = vmatprep.subr.bf16.mxu0 %v6741_v26  ;;  %3164 = vmatprep.subr.bf16.mxu1 %v6786_v38  ;;  %v6818_v26 = vld [vmem:[#allocation48_spill] sm:$0xff] }
 0x8c5   :  { %3022 = vmatmul.mubr.bf16.vlgmr.msra.gmra.mrb[84].mxu0 %v2796_v10  ;;  %3063 = vmatmul.mubr.bf16.vlgmr.msra.gmra.mrb[84].mxu1 %v2796_v10 }
 0x8c6   :  { %3124 = vmatpush1.bf16.msra.mxu0 %v6787_v51  ;;  %3165 = vmatpush1.bf16.msra.mxu1 %v6788_v5 }
 0x8c7   :  { %3125 = vmatprep.subr.bf16.mxu0 %v6789_v52  ;;  %3166 = vmatprep.subr.bf16.mxu1 %v6790_v14 }
 0x8c8   :  { %3155 = vmatprep.mubr.bf16.mxu0 %v6419_v56  ;;  %3196 = vmatprep.mubr.bf16.mxu1 %v6419_v56 }
 0x8ca   :  { %3126 = vmatpush1.bf16.msra.mxu0 %v6791_v18  ;;  %3167 = vmatpush1.bf16.msra.mxu1 %v6792_v24 }
 0x8cb   :  { %3127 = vmatprep.subr.bf16.mxu0 %v6793_v0  ;;  %3168 = vmatprep.subr.bf16.mxu1 %v6794_v2 }
 0x8ce   :  { %3128 = vmatpush1.bf16.msra.mxu0 %v6795_v13  ;;  %3169 = vmatpush1.bf16.msra.mxu1 %v6796_v8 }
 0x8cf   :  { %3129 = vmatprep.subr.bf16.mxu0 %v6797_v6  ;;  %3170 = vmatprep.subr.bf16.mxu1 %v6798_v37 }
 0x8d2   :  { %3130 = vmatpush1.bf16.msra.mxu0 %v6799_v59  ;;  %3171 = vmatpush1.bf16.msra.mxu1 %v6800_v3 }
 0x8d3   :  { %3131 = vmatprep.subr.bf16.mxu0 %v6801_v7  ;;  %3172 = vmatprep.subr.bf16.mxu1 %v6802_v60 }
 0x8d6   :  { %3132 = vmatpush1.bf16.msra.mxu0 %v6803_v49  ;;  %3173 = vmatpush1.bf16.msra.mxu1 %v6804_v16 }
 0x8d7   :  { %3133 = vmatprep.subr.bf16.mxu0 %v6805_v22  ;;  %3174 = vmatprep.subr.bf16.mxu1 %v6806_v47 }
 0x8da   :  { %3134 = vmatpush1.bf16.msra.mxu0 %v6807_v32  ;;  %3175 = vmatpush1.bf16.msra.mxu1 %v6808_v4 }
 0x8db   :  { %3135 = vmatprep.subr.bf16.mxu0 %v6809_v44  ;;  %3176 = vmatprep.subr.bf16.mxu1 %v6810_v48 }
 0x8de   :  { %3136 = vmatpush1.bf16.msra.mxu0 %v6811_v58  ;;  %3177 = vmatpush1.bf16.msra.mxu1 %v6812_v27 }
 0x8df   :  { %3137 = vmatprep.subr.bf16.mxu0 %v6813_v63  ;;  %3178 = vmatprep.subr.bf16.mxu1 %v6814_v23 }
 0x8e2   :  { %3138 = vmatpush1.bf16.msra.mxu0 %v6815_v9  ;;  %3179 = vmatpush1.bf16.msra.mxu1 %v6816_v12 }
 0x8e3   :  { %3205 = vmatprep.subr.bf16.mxu0 %v6817_v36  ;;  %3246 = vmatprep.subr.bf16.mxu1 %v6818_v26 }
 0x951   :  { %v2831_v55 = vpop.f32.mrb[76].mxu0  ;;  %v2872_v11 = vpop.f32.mrb[76].mxu1 }
 0x952   :  { %v2833_v10 = vpop.f32.mrb[77].mxu0  ;;  %v2874_v19 = vpop.f32.mrb[77].mxu1 }
 0x953   :  { %v2835_v38 = vpop.f32.mrb[78].mxu0  ;;  %v2876_v51 = vpop.f32.mrb[78].mxu1 }
 0x954   :  { %v2836_v5 = vpop.f32.mrb[79].mxu0  ;;  %v2877_v52 = vpop.f32.mrb[79].mxu1 }
 0x978   :  { %v2913_v14 = vpop.f32.mrb[80].mxu0  ;;  %v2954_v18 = vpop.f32.mrb[80].mxu1 }
 0x979   :  { %v2914_v24 = vadd.f32 %v2913_v14, %v2831_v55  ;;  %v2955_v0 = vadd.f32 %v2954_v18, %v2872_v11  ;;  %v2915_v2 = vpop.f32.mrb[81].mxu0  ;;  %v2956_v13 = vpop.f32.mrb[81].mxu1 }
 0x97a   :  { %v2916_v8 = vadd.f32 %v2915_v2, %v2833_v10  ;;  %v2957_v6 = vadd.f32 %v2956_v13, %v2874_v19  ;;  %v2917_v37 = vpop.f32.mrb[82].mxu0  ;;  %v2958_v59 = vpop.f32.mrb[82].mxu1 }
 0x97b   :  { %v2961_v3 = vadd.f32 %v2914_v24, %v4847_v39  ;;  %v2918_v7 = vpop.f32.mrb[83].mxu0  ;;  %v2959_v60 = vpop.f32.mrb[83].mxu1  ;;  %v2963_v58 = vadd.f32 %v2955_v0, %v4858_v15  ;;  %v2988_v59 = vld [vmem:[#allocation6 + $0x38] sm:$0xff] }
 0x97c   :  { %v2962_v49 = vadd.f32 %v2916_v8, %v4849_v54  ;;  %v2964_v4 = vadd.f32 %v2957_v6, %v4854_v45 }
 0x97d   :  { %v2965_v16 = vsub.f32 0.0, %v2961_v3 }
 0x97e   :  { %v2970_v22 = vsub.f32 0.0, %v2962_v49  ;;  %v2976_v44 = vsub.f32 0.0, %v2964_v4 }
 0x97f   :  { %v2966_v47 = vmul.f32 1.442695, %v2965_v16 }
 0x980   :  { %v2971_v32 = vmul.f32 1.442695, %v2970_v22  ;;  %v2977_v48 = vmul.f32 1.442695, %v2976_v44 }
 0x981   :  { %3959 = vpow2.f32 %v2966_v47 }
 0x982   :  { %3961 = vpow2.f32 %v2971_v32 }
 0x983   :  { %3963 = vpow2.f32 %v2977_v48 }
 0x984   :  { %3965 = vtanh.f32 %v2963_v58 }
 0x98b   :  { %v3960_v27 = vpop.eup %3959 }
 0x98c   :  { %v3962_v63 = vpop.eup %3961  ;;  %v2968_v23 = vadd.f32 1.0, %v3960_v27 }
 0x98d   :  { %v2973_v9 = vadd.f32 1.0, %v3962_v63  ;;  %v3964_v12 = vpop.eup %3963 }
 0x98e   :  { %3967 = vrcp.f32 %v2968_v23  ;;  %v3966_v36 = vpop.eup %3965  ;;  %v2979_v38 = vadd.f32 1.0, %v3964_v12  ;;  %v6824_v12 = vld [vmem:[#allocation54_spill] sm:$0xff] }
 0x98f   :  { %3969 = vrcp.f32 %v2973_v9 }
 0x990   :  { %3971 = vrcp.f32 %v2979_v38  ;;  %v3743_v38 = vld [vmem:[#allocation14] sm:$0xff]  }
 0x998   :  { %v3968_v26 = vpop.eup %3967  ;;  %v3023_v55 = vpop.f32.mrb[84].mxu0 }
 0x999   :  { %v3064_v11 = vpop.f32.mrb[84].mxu1  ;;  %v3970_v10 = vpop.eup %3969  ;;  %v2982_v19 = vmul.f32 %v3968_v26, %v3966_v36 }
 0x99a   :  { %v3025_v51 = vpop.f32.mrb[85].mxu0  ;;  %v3066_v5 = vpop.f32.mrb[85].mxu1  ;;  %v2981_v52 = vmul.f32 %v3970_v10, %v5777_v25  ;;  %v6827_v10 = vld [vmem:[#allocation63_spill] sm:$0xff] }
 0x99b   :  { %v3075_v14 = vcombine.low %v3023_v55, %v3025_v51  ;;  %v3076_v18 = vcombine.low %v3064_v11, %v3066_v5  ;;  %v3027_v24 = vpop.f32.mrb[86].mxu0  ;;  %v3068_v0 = vpop.f32.mrb[86].mxu1  ;;  %v3744_v51 = vld [vmem:[#allocation14 + $0x8] sm:$0xff]  }
 0x99c   :  { %v3028_v2 = vpop.f32.mrb[87].mxu0  ;;  %v3069_v13 = vpop.f32.mrb[87].mxu1  ;;  %v5953_v8 = vadd.f32 %v2982_v19, %v2981_v52  ;;  %v6828_v19 = vld [vmem:[#allocation64_spill] sm:$0xff]  ;;  %v3749_v52 = vld [vmem:[#allocation14 + $0x30] sm:$0xff]  }
 0x99d   :  { %v3083_v6 = vrot.slane %v3075_v14, %v4767_v57  ;;  %v3090_v37 = vrot.slane %v3076_v18, %v4767_v57  ;;  %v3972_v32 = vpop.eup %3971  ;;  %v3748_v5 = vld [vmem:[#allocation14 + $0x28] sm:$0xff]   ;;  %v3750_v14 = vld [vmem:[#allocation14 + $0x38] sm:$0xff]  }
 0x99e   :  { %3973 = vtanh.f32 %v5953_v8 }
 0x99f   :  { %v3091_v3 = vcombine.low %v3083_v6, %v3090_v37 }
 0x9a1   :  { %v3093_v7 = vadd.f32 %v3091_v3, %v2988_v59 }
 0x9a3   :  { %v3094_v60 = vsub.f32 0.0, %v3093_v7  ;;  %v3100_v25 = vrot.slane %v3093_v7, 2  ;;  %v3110_v47 = vrot.slane %v3093_v7, 6  ;;  %v3107_v63 = vrot.slane %v3093_v7, 4 }
 0x9a5   :  { %v3095_v49 = vmul.f32 1.442695, %v3094_v60  ;;  %v3102_v16 = vsub.f32 0.0, %v3100_v25  ;;  %v3112_v48 = vsub.f32 0.0, %v3110_v47 }
 0x9a7   :  { %3975 = vpow2.f32 %v3095_v49  ;;  %v3103_v22 = vmul.f32 1.442695, %v3102_v16  ;;  %v3113_v57 = vmul.f32 1.442695, %v3112_v48 }
 0x9a8   :  { %v3974_v4 = vpop.eup %3973 }
 0x9a9   :  { %3977 = vpow2.f32 %v3103_v22  ;;  %v2985_v44 = vmul.f32 %v3974_v4, %v3972_v32 }
 0x9aa   :  { %3979 = vpow2.f32 %v3113_v57 }
 0x9ab   :  { %v2986_v58 = vpack.c.bf16 %v2985_v44, %v2985_v44 }
 0x9ad   :  { %3156 = vmatmul.mubr.bf16.vlgmr.msra.gmra.mrb[88].mxu0 %v2986_v58  ;;  %3197 = vmatmul.mubr.bf16.vlgmr.msra.gmra.mrb[88].mxu1 %v2986_v58 }
 0x9ae   :  { %3206 = vmatpush1.bf16.msra.mxu0 %v5782_v61  ;;  %3247 = vmatpush1.bf16.msra.mxu1 %v5785_v20  ;;  %v6820_v20 = vld [vmem:[#allocation50_spill] sm:$0xff] }
 0x9af   :  { %3207 = vmatprep.subr.bf16.mxu0 %v5788_v21  ;;  %3248 = vmatprep.subr.bf16.mxu1 %v5791_v17  ;;  %v6821_v21 = vld [vmem:[#allocation51_spill] sm:$0xff]  ;;  %v6822_v17 = vld [vmem:[#allocation52_spill] sm:$0xff] }
 0x9b0   :  { %3237 = vmatprep.mubr.bf16.mxu0 %v6419_v56  ;;  %3278 = vmatprep.mubr.bf16.mxu1 %v6419_v56  ;;  %v6819_v56 = vld [vmem:[#allocation49_spill] sm:$0xff] }
 0x9b1   :  { %v3976_v27 = vpop.eup %3975 }
 0x9b2   :  { %v3097_v23 = vadd.f32 1.0, %v3976_v27  ;;  %3208 = vmatpush1.bf16.msra.mxu0 %v5796_v42  ;;  %3249 = vmatpush1.bf16.msra.mxu1 %v5799_v29  ;;  %v6823_v42 = vld [vmem:[#allocation53_spill] sm:$0xff] }
 0x9b3   :  { %v3978_v9 = vpop.eup %3977  ;;  %3209 = vmatprep.subr.bf16.mxu0 %v5802_v46  ;;  %3250 = vmatprep.subr.bf16.mxu1 %v5805_v40 }
 0x9b4   :  { %3981 = vrcp.f32 %v3097_v23  ;;  %v3105_v61 = vadd.f32 1.0, %v3978_v9  ;;  %v3980_v29 = vpop.eup %3979 }
 0x9b5   :  { %3983 = vtanh.f32 %v3107_v63  ;;  %v3115_v36 = vadd.f32 1.0, %v3980_v29 }
 0x9b6   :  { %3985 = vrcp.f32 %v3105_v61  ;;  %3210 = vmatpush1.bf16.msra.mxu0 %v5808_v50  ;;  %3251 = vmatpush1.bf16.msra.mxu1 %v5811_v41  ;;  %v6825_v50 = vld [vmem:[#allocation55_spill] sm:$0xff] }
 0x9b7   :  { %3211 = vmatprep.subr.bf16.mxu0 %v5814_v30  ;;  %3252 = vmatprep.subr.bf16.mxu1 %v6819_v56  ;;  %v6826_v30 = vld [vmem:[#allocation60_spill] sm:$0xff]  ;;  %3987 = vrcp.f32 %v3115_v36 }
 0x9ba   :  { %3212 = vmatpush1.bf16.msra.mxu0 %v6820_v20  ;;  %3253 = vmatpush1.bf16.msra.mxu1 %v6821_v21 }
 0x9bb   :  { %3213 = vmatprep.subr.bf16.mxu0 %v6822_v17  ;;  %3254 = vmatprep.subr.bf16.mxu1 %v6823_v42 }
 0x9be   :  { %v3982_v46 = vpop.eup %3981  ;;  %3214 = vmatpush1.bf16.msra.mxu0 %v6824_v12  ;;  %3255 = vmatpush1.bf16.msra.mxu1 %v6825_v50 }
 0x9bf   :  { %v3984_v40 = vpop.eup %3983  ;;  %3215 = vmatprep.subr.bf16.mxu0 %v6826_v30  ;;  %3256 = vmatprep.subr.bf16.mxu1 %v5841_v33  ;;  %v6829_v33 = vld [vmem:[#allocation65_spill] sm:$0xff] }
 0x9c0   :  { %v3986_v41 = vpop.eup %3985  ;;  %v3118_v55 = vmul.f32 %v3984_v40, %v3982_v46 }
 0x9c1   :  { %v3117_v26 = vmul.f32 %v3986_v41, %v5851_v53 }
 0x9c2   :  { %3216 = vmatpush1.bf16.msra.mxu0 %v5845_v1  ;;  %3257 = vmatpush1.bf16.msra.mxu1 %v5848_v31  ;;  %v6830_v1 = vmov 0.0   ;;  %v3988_v31 = vpop.eup %3987 }
 0x9c3   :  { %v3119_v11 = vadd.f32 %v3118_v55, %v3117_v26  ;;  %3217 = vmatprep.subr.bf16.mxu0 %v5853_v43  ;;  %3258 = vmatprep.subr.bf16.mxu1 %v5856_v62 }
 0x9c5   :  { %3989 = vtanh.f32 %v3119_v11  ;;  %3314 = vst [vmem:[#allocation3] sm:$0x3] %v3119_v11  ;;  %v3545_v11 = vld [vmem:[%s6026_s6] ss:$0 sm:$0xff] }
 0x9c6   :  { %3218 = vmatpush1.bf16.msra.mxu0 %v6827_v10  ;;  %3259 = vmatpush1.bf16.msra.mxu1 %v6828_v19 }
 0x9c7   :  { %3219 = vmatprep.subr.bf16.mxu0 %v6829_v33  ;;  %3260 = vmatprep.subr.bf16.mxu1 %v5869_v34  ;;  %v3745_v34 = vld [vmem:[#allocation14 + $0x10] sm:$0xff]  }
 0x9ca   :  { %3220 = vmatpush1.bf16.msra.mxu0 %v5872_v28  ;;  %3261 = vmatpush1.bf16.msra.mxu1 %v5875_v35  ;;  %v3746_v28 = vld [vmem:[#allocation14 + $0x18] sm:$0xff]   ;;  %v3747_v35 = vld [vmem:[#allocation14 + $0x20] sm:$0xff]  }
 0x9cb   :  { %3563 = vmatprep.subr.bf16.mxu0 %v6830_v1 }
 0x9cf   :  { %v3990_v43 = vpop.eup %3989 }
 0x9d0   :  { %v3121_v62 = vmul.f32 %v3990_v43, %v3988_v31 }
 0x9d2   :  { %v3122_v53 = vpack.c.bf16 %v3121_v62, %v3121_v62 }
 0x9d4   :  { %3238 = vmatmul.mubr.bf16.vlgmr.msra.gmra.mrb[92].mxu0 %v3122_v53  ;;  %3313 = vst [vmem:[#allocation2] sm:$0x1] %v3122_v53  ;;  %3279 = vmatmul.mubr.bf16.vlgmr.msra.gmra.mrb[92].mxu1 %v3122_v53 }
 0x9d5   :  { %3564 = vmatpush3.bf16.msra.mxu0 %v3743_v38  ;;  %3579 = vmatprep.mubr.msk.bf16.mxu0 %vm4353_vm0, %v6830_v1 }
 0x9d6   :  { %3565 = vmatprep.subr.bf16.mxu0 %v6830_v1 }
 0x9d9   :  { %3566 = vmatpush3.bf16.msra.mxu0 %v3744_v51 }
 0x9da   :  { %3567 = vmatprep.subr.bf16.mxu0 %v6830_v1 }
 0x9dd   :  { %3568 = vmatpush3.bf16.msra.mxu0 %v3745_v34 }
 0x9de   :  { %3569 = vmatprep.subr.bf16.mxu0 %v6830_v1 }
 0x9e1   :  { %3570 = vmatpush3.bf16.msra.mxu0 %v3746_v28 }
 0x9e2   :  { %3571 = vmatprep.subr.bf16.mxu0 %v6830_v1 }
 0x9e5   :  { %3572 = vmatpush3.bf16.msra.mxu0 %v3747_v35 }
 0x9e6   :  { %3573 = vmatprep.subr.bf16.mxu0 %v6830_v1 }
 0x9e9   :  { %3574 = vmatpush3.bf16.msra.mxu0 %v3748_v5 }
 0x9ea   :  { %3575 = vmatprep.subr.bf16.mxu0 %v6830_v1 }
 0x9ed   :  { %3576 = vmatpush3.bf16.msra.mxu0 %v3749_v52 }
 0x9ee   :  { %3577 = vmatprep.subr.bf16.mxu0 %v6830_v1 }
 0x9f1   :  { %3578 = vmatpush3.bf16.msra.mxu0 %v3750_v14 }
 0xa80   :  { %v3157_v18 = vpop.f32.mrb[88].mxu0  ;;  %v3198_v24 = vpop.f32.mrb[88].mxu1 }
 0xa81   :  { %v3159_v0 = vpop.f32.mrb[89].mxu0  ;;  %v3200_v2 = vpop.f32.mrb[89].mxu1 }
 0xa82   :  { %v3161_v13 = vpop.f32.mrb[90].mxu0  ;;  %v3202_v6 = vpop.f32.mrb[90].mxu1 }
 0xa83   :  { %v3162_v37 = vpop.f32.mrb[91].mxu0  ;;  %v3203_v59 = vpop.f32.mrb[91].mxu1 }
 0xaa7   :  { %v3239_v3 = vpop.f32.mrb[92].mxu0  ;;  %v3280_v7 = vpop.f32.mrb[92].mxu1 }
 0xaa8   :  { %v3240_v60 = vadd.f32 %v3239_v3, %v3157_v18  ;;  %v3281_v25 = vadd.f32 %v3280_v7, %v3198_v24  ;;  %v3241_v49 = vpop.f32.mrb[93].mxu0  ;;  %v3282_v16 = vpop.f32.mrb[93].mxu1 }
 0xaa9   :  { %v3242_v22 = vadd.f32 %v3241_v49, %v3159_v0  ;;  %v3283_v47 = vadd.f32 %v3282_v16, %v3200_v2  ;;  %v3243_v32 = vpop.f32.mrb[94].mxu0  ;;  %v3284_v4 = vpop.f32.mrb[94].mxu1 }
 0xaaa   :  { %v3287_v44 = vadd.f32 %v3240_v60, %v4847_v39  ;;  %v3244_v48 = vpop.f32.mrb[95].mxu0  ;;  %v3285_v58 = vpop.f32.mrb[95].mxu1  ;;  %v3289_v21 = vadd.f32 %v3281_v25, %v4858_v15 }
 0xaab   :  { %v3288_v57 = vadd.f32 %v3242_v22, %v4849_v54  ;;  %v3290_v61 = vadd.f32 %v3283_v47, %v4854_v45 }
 0xaac   :  { %v3291_v27 = vsub.f32 0.0, %v3287_v44 }
 0xaad   :  { %v3296_v63 = vsub.f32 0.0, %v3288_v57  ;;  %v3302_v56 = vsub.f32 0.0, %v3290_v61 }
 0xaae   :  { %v3292_v23 = vmul.f32 1.442695, %v3291_v27 }
 0xaaf   :  { %v3297_v9 = vmul.f32 1.442695, %v3296_v63  ;;  %v3303_v20 = vmul.f32 1.442695, %v3302_v56 }
 0xab0   :  { %3991 = vpow2.f32 %v3292_v23 }
 0xab1   :  { %3993 = vpow2.f32 %v3297_v9 }
 0xab2   :  { %3995 = vpow2.f32 %v3303_v20 }
 0xab3   :  { %3997 = vtanh.f32 %v3289_v21 }
 0xaba   :  { %v3992_v17 = vpop.eup %3991 }
 0xabb   :  { %v3994_v42 = vpop.eup %3993  ;;  %v3294_v29 = vadd.f32 1.0, %v3992_v17 }
 0xabc   :  { %v3299_v39 = vadd.f32 1.0, %v3994_v42  ;;  %v3996_v54 = vpop.eup %3995 }
 0xabd   :  { %3999 = vrcp.f32 %v3294_v29  ;;  %v3998_v46 = vpop.eup %3997  ;;  %v3305_v45 = vadd.f32 1.0, %v3996_v54 }
 0xabe   :  { %4001 = vrcp.f32 %v3299_v39 }
 0xabf   :  { %4003 = vrcp.f32 %v3305_v45 }
 0xac7   :  { %v4000_v40 = vpop.eup %3999 }
 0xac8   :  { %v4002_v12 = vpop.eup %4001  ;;  %v3308_v50 = vmul.f32 %v4000_v40, %v3998_v46 }
 0xac9   :  { %v3307_v41 = vmul.f32 %v4002_v12, %v5953_v8  ;;  %v4004_v15 = vpop.eup %4003 }
 0xacb   :  { %v3309_v36 = vadd.f32 %v3308_v50, %v3307_v41 }
 0xacd   :  { %3316 = vst [vmem:[#allocation5] sm:$0x3] %v3309_v36  ;;  %4005 = vtanh.f32 %v3309_v36 }
 0xad7   :  { %v4006_v30 = vpop.eup %4005 }
 0xad8   :  { %v3311_v26 = vmul.f32 %v4006_v30, %v4004_v15 }
 0xada   :  { %v3312_v55 = vpack.c.bf16 %v3311_v26, %v3311_v26 }
 0xadc   :  { %3315 = vst [vmem:[#allocation4] sm:$0x1] %v3312_v55  ;;  %3580 = vmatmul.mubr.bf16.vlgmr.msra.gmra.mrb[96].mxu0 %v3312_v55 }
 0xbaf   :  { %v3425_v10 = vpop.f32.mrb[96].mxu0 }
 0xbb0   :  { %v3426_v19 = vadd.f32 %v3545_v11, %v3425_v10  ;;  %v3581_v33 = vpop.f32.mrb[97].mxu0 }
 0xbb1   :  { %v3428_v8 = vpop.f32.mrb[98].mxu0 }
 0xbb2   :  { %3431 = vst [vmem:[#allocation15] sm:$0x3] %v3426_v19  ;;  %v3582_v1 = vpop.f32.mrb[99].mxu0 }
 0xbb3   :  { %4320 = shalt.err (!%p4317_p2)
}
 0xbb4   :  { %s4321_s6 = scalar_lea.hbm %s6027_s7, 32 }
 0xbb5   :  { %p4322_p3 = scmp.ne.s32.totalorder %s6027_s7, %s4321_s6  ;;  %p4325_p4 = scmp.lt.u32.totalorder %s4321_s6, %s6027_s7 }
 0xbb7   :  { %p4327_p5 = pnand %p4325_p4, %p4322_p3 }
 0xbb9   :  { %4330 = shalt.err (!%p4327_p5)
}
 0xbba   :  { %3441 = dma.vmem_to_hbm [thread:$0]  %s3439_s21, 32, %s6027_s7, [#allocation8]  }
 0xbbb   :  { %4337 = dma.done.wait [#allocation8], 32  }
 0xbbc   :  { %4338 = vsyncadd [#allocation8], 4294967264 }
 0xbbd   :  { %3445 = vsyncpa [#allocation7], 1 }
 0xbbe   :  { %3446 = vsyncpa [#allocation10], 1 }
 0xbbf   :  { %3447 = vsyncpa [#allocation13], 1 }
 0xbc0   :  { %3448 = vsyncpa [#allocation8], 1 }

</bundles_post_ra>
